<compile_context>
chip_gen: v6e
topology: v6e:2x2x1
jax: 0.10.0
libtpu: 0.0.40
codegen_flags: <defaults>
</compile_context>

<pallas_src>
import functools

import jax
import jax.numpy as jnp
from jax import lax
from jax.experimental import pallas as pl
from jax.experimental.pallas import tpu as pltpu

EMBED = 300   # d2v_embed (must equal 300 for the module's mlp to typecheck)
C_OUT = 300   # news_cnn output channels (hard-coded in the module)
KH = 3        # conv kernel size along the word axis
LANE = 128    # TPU lane width


def _round_up(n, m):
    return ((n + m - 1) // m) * m


# ----------------------------- fused Pallas kernel ---------------------------

def _fused_kernel(xw_ref, yw_ref, zw_ref, wcat_ref, cbias_ref, mlpwt_ref,
                  mlpb_ref, out_ref, *, B, P, Q, W):
    # xw_ref:    (B*P*W, E) prev-watch news words (f32)
    # yw_ref:    (B*W,   E) target news words (f32)
    # zw_ref:    (B*Q*W, E) candidate news words (f32)
    # wcat_ref:  (E, 3*Cp)  conv taps [K0|K1|K2] stacked on the output axis (bf16)
    # cbias_ref: (1, Cp)    conv bias, zero padded (f32)
    # mlpwt_ref: (Cp, Cp)   mlp weight transposed, zero padded (bf16)
    # mlpb_ref:  (1, Cp)    mlp bias, zero padded (f32)
    # out_ref:   (Rp, Cp)   rows [0,B)=mlp(prev mean), [B,2B)=tgt, [2B,2B+BQ)=cand
    Cp = cbias_ref.shape[1]
    Rp = out_ref.shape[0]

    # --- all news items on one flat word-row axis (bf16 BEFORE the concat) ---
    flat = jnp.concatenate(
        [xw_ref[...].astype(jnp.bfloat16),
         yw_ref[...].astype(jnp.bfloat16),
         zw_ref[...].astype(jnp.bfloat16)], axis=0)                # [M, E] bf16
    M = flat.shape[0]

    # --- one bf16 MXU push computes all three conv taps for every word row ---
    taps = jnp.dot(flat, wcat_ref[...],
                   preferred_element_type=jnp.float32)             # [M, 3*Cp]
    s_prev = taps[:, 0:Cp]             # row as word (w-1) @ K0 -> feeds row r+1
    s_ctr = taps[:, Cp:2 * Cp]         # row as word  w    @ K1 -> feeds row r
    s_next = taps[:, 2 * Cp:3 * Cp]    # row as word (w+1) @ K2 -> feeds row r-1

    # --- realign the +/-1 word taps with XLU rolls + (M,1) boundary masks.
    #     Conv2d padding=[1,0]: rows with w==0 / w==W-1 get no neighbour
    #     contribution (this also blocks bleed across item boundaries and the
    #     roll wrap-around, since every item is exactly W contiguous rows). ---
    w_row = lax.broadcasted_iota(jnp.int32, (M, 1), 0) % W
    mask_dn = (w_row != 0).astype(jnp.float32)
    mask_up = (w_row != W - 1).astype(jnp.float32)
    rolled_prev = pltpu.roll(s_prev, shift=1, axis=0)        # [r] <- s_prev[r-1]
    rolled_next = pltpu.roll(s_next, shift=M - 1, axis=0)    # [r] <- s_next[r+1]
    conv = (s_ctr
            + rolled_prev * mask_dn
            + rolled_next * mask_up
            + cbias_ref[...])                                      # [M, Cp] f32
    act = jnp.maximum(conv, 0.0).astype(jnp.bfloat16)              # ReLU

    # --- every mean pool as one small bf16 matmul with exact 0/1 weights:
    #       r in [0, B)        : all P*W rows of batch b=r        (prev branch)
    #       r in [B, 2B+B*Q)   : the W rows of item (B*P + r - B) (tgt / cand)
    #     rows >= 2B+B*Q are zero (sublane padding to Rp).  The 1/width mean
    #     scale is applied afterwards in f32 to keep it exact. -----------------
    r_id = lax.broadcasted_iota(jnp.int32, (Rp, M), 0)
    c_id = lax.broadcasted_iota(jnp.int32, (Rp, M), 1)
    is_prev = r_id < B
    start = jnp.where(is_prev, r_id * (P * W), (B * P - B + r_id) * W)
    width = jnp.where(is_prev, P * W, W)
    G = jnp.where((c_id >= start) & (c_id < start + width),
                  1.0, 0.0).astype(jnp.bfloat16)                   # [Rp, M]
    sums = jnp.dot(G, act, preferred_element_type=jnp.float32)     # [Rp, Cp]
    r_out = lax.broadcasted_iota(jnp.int32, (Rp, 1), 0)
    scale = jnp.where(r_out < B, 1.0 / (P * W), 1.0 / W).astype(jnp.float32)
    pooled = sums * scale

    # --- Linear(E,E) on every pooled row (tiny bf16 matmul), kept only for the
    #     prev rows; single full-vreg store of the merged output. -------------
    mlp_all = (jnp.dot(pooled.astype(jnp.bfloat16), mlpwt_ref[...],
                       preferred_element_type=jnp.float32)
               + mlpb_ref[...])
    out_ref[...] = jnp.where(r_out < B, mlp_all, pooled)


# ------------------------------ wrapper ---------------------------------------

def pack_params(params):
    """One-time weight packing (hoisted out of the per-step forward path)."""
    C, _, kh, E = params["conv_w"].shape
    assert kh == KH
    assert E == C == params["mlp_w"].shape[0] == params["mlp_w"].shape[1], (
        "SimpleAVGModel is only self-consistent when d2v_embed == 300")
    Cp = _round_up(C, LANE)
    # Conv weight [C,1,KH,E] -> three [E,Cp] taps stacked on the output axis,
    # zero-padded 300 -> 384 output channels, bf16 for the MXU.
    w3 = jnp.transpose(params["conv_w"][:, 0], (1, 2, 0))          # [KH, E, C]
    w3 = jnp.pad(w3, ((0, 0), (0, 0), (0, Cp - C)))                # [KH, E, Cp]
    wcat = jnp.concatenate([w3[0], w3[1], w3[2]], axis=1).astype(jnp.bfloat16)
    cbias = jnp.pad(params["conv_b"], (0, Cp - C)).reshape(1, Cp).astype(jnp.float32)
    mlp_wt = jnp.pad(params["mlp_w"].T,
                     ((0, Cp - C), (0, Cp - C))).astype(jnp.bfloat16)
    mlp_b = jnp.pad(params["mlp_b"], (0, Cp - C)).reshape(1, Cp).astype(jnp.float32)
    return dict(wcat=wcat, cbias=cbias, mlp_wt=mlp_wt, mlp_b=mlp_b)


def simple_avg_forward(packed, x, y, z):
    """x: [B,P,W,E], y: [B,W,E], z: [B,Q,W,E] -> (prev [B,C], tgt [B,C], cand [B,Q,C])."""
    B, P, W, E = x.shape
    Q = z.shape[1]
    assert y.shape == (B, W, E) and z.shape == (B, Q, W, E), (
        "item row-block structure (exactly W contiguous rows per item) relies "
        "on consistent W across x/y/z")
    C = C_OUT
    Cp = packed["cbias"].shape[1]

    # Flatten word rows (layout-preserving reshapes -- no HBM copies).
    xw = x.reshape(B * P * W, E)
    yw = y.reshape(B * W, E)
    zw = z.reshape(B * Q * W, E)

    M = (B * P + B + B * Q) * W
    R = 2 * B + B * Q
    Rp = _round_up(R, 8)                 # single sublane-dense merged output

    flops = 2 * M * E * (3 * Cp) + 2 * Rp * M * Cp + 2 * Rp * Cp * Cp
    bytes_accessed = (M * E * 4                      # word embeddings (f32 in)
                      + int(packed["wcat"].size) * 2
                      + int(packed["mlp_wt"].size) * 2
                      + 2 * Cp * 4                   # biases
                      + Rp * Cp * 4)                 # merged output

    vmem = pl.BlockSpec(memory_space=pltpu.MemorySpace.VMEM)
    out_p = pl.pallas_call(
        functools.partial(_fused_kernel, B=B, P=P, Q=Q, W=W),
        out_shape=jax.ShapeDtypeStruct((Rp, Cp), jnp.float32),
        in_specs=[vmem] * 7,
        out_specs=vmem,
        cost_estimate=pl.CostEstimate(flops=flops, transcendentals=0,
                                      bytes_accessed=bytes_accessed),
    )(xw, yw, zw, packed["wcat"], packed["cbias"], packed["mlp_wt"],
      packed["mlp_b"])

    prev_watches = out_p[0:B, :C]
    target_embed = out_p[B:2 * B, :C]
    candidate_embed = out_p[2 * B:2 * B + B * Q, :C].reshape(B, Q, C)
    return prev_watches, target_embed, candidate_embed


# --------------------------- pure-JAX reference ------------------------------

def _ref_forward(params, x, y, z):
    def enc(words):
        pad = jnp.pad(words, ((0, 0), (1, 1), (0, 0)))
        w = params["conv_w"][:, 0]                     # [C, 3, E]
        s = (jnp.einsum("nwe,ce->nwc", pad[:, :-2], w[:, 0])
             + jnp.einsum("nwe,ce->nwc", pad[:, 1:-1], w[:, 1])
             + jnp.einsum("nwe,ce->nwc", pad[:, 2:], w[:, 2])
             + params["conv_b"])
        return jnp.mean(jnp.maximum(s, 0.0), axis=1)
    B, P, W, E = x.shape
    Q = z.shape[1]
    prev = jnp.mean(enc(x.reshape(B * P, W, E)).reshape(B, P, -1), axis=1)
    prev = prev @ params["mlp_w"].T + params["mlp_b"]
    tgt = enc(y)
    cand = enc(z.reshape(B * Q, W, E)).reshape(B, Q, -1)
    return prev, tgt, cand


# --------------------------------- main ---------------------------------------

if __name__ == "__main__":
    B, P, Q, W = 2, 3, 4, 8      # batch, num_prev_watch, num candidates, words

    key = jax.random.PRNGKey(0)
    ks = jax.random.split(key, 7)
    params = dict(
        conv_w=0.02 * jax.random.normal(ks[0], (C_OUT, 1, KH, EMBED), jnp.float32),
        conv_b=0.02 * jax.random.normal(ks[1], (C_OUT,), jnp.float32),
        mlp_w=0.02 * jax.random.normal(ks[2], (EMBED, EMBED), jnp.float32),  # [out, in]
        mlp_b=0.02 * jax.random.normal(ks[3], (EMBED,), jnp.float32),
    )

    x = jax.random.normal(ks[4], (B, P, W, EMBED), jnp.float32)
    y = jax.random.normal(ks[5], (B, W, EMBED), jnp.float32)
    z = jax.random.normal(ks[6], (B, Q, W, EMBED), jnp.float32)

    # Weight packing happens exactly once, outside the jitted forward path.
    packed = jax.tree_util.tree_map(jax.block_until_ready, pack_params(params))

    fwd = jax.jit(functools.partial(simple_avg_forward, packed))
    prev_watches, target_embed, candidate_embed = fwd(x, y, z)
    jax.block_until_ready((prev_watches, target_embed, candidate_embed))

    assert prev_watches.shape == (B, EMBED)
    assert target_embed.shape == (B, C_OUT)
    assert candidate_embed.shape == (B, Q, C_OUT)

    r_prev, r_tgt, r_cand = _ref_forward(params, x, y, z)
    for got, ref in ((prev_watches, r_prev), (target_embed, r_tgt),
                     (candidate_embed, r_cand)):
        if not jnp.allclose(got, ref, rtol=2e-2, atol=2e-2):
            raise SystemExit("FAIL: kernel output does not match reference")

    print("KERNEL_OK")
</pallas_src>

<mosaic_0001>
module attributes {stable_mosaic.version = 11 : i64} {
  func.func @_fused_kernel(%arg0: memref<48x300xf32, #tpu.memory_space<vmem>>, %arg1: memref<16x300xf32, #tpu.memory_space<vmem>>, %arg2: memref<64x300xf32, #tpu.memory_space<vmem>>, %arg3: memref<300x1152xbf16, #tpu.memory_space<vmem>>, %arg4: memref<1x384xf32, #tpu.memory_space<vmem>>, %arg5: memref<384x384xbf16, #tpu.memory_space<vmem>>, %arg6: memref<1x384xf32, #tpu.memory_space<vmem>>, %arg7: memref<16x384xf32, #tpu.memory_space<vmem>>) attributes {dimension_semantics = [], scalar_prefetch = 0 : i64, scratch_operands = 0 : i64, tpu.core_type = #tpu.core_type<tc>} {
    %c0 = arith.constant 0 : index
    %c0_0 = arith.constant 0 : index
    %0 = vector.load %arg0[%c0, %c0_0] : memref<48x300xf32, #tpu.memory_space<vmem>>, vector<48x300xf32>
    %1 = arith.truncf %0 : vector<48x300xf32> to vector<48x300xbf16>
    %c0_1 = arith.constant 0 : index
    %c0_2 = arith.constant 0 : index
    %2 = vector.load %arg1[%c0_1, %c0_2] : memref<16x300xf32, #tpu.memory_space<vmem>>, vector<16x300xf32>
    %3 = arith.truncf %2 : vector<16x300xf32> to vector<16x300xbf16>
    %c0_3 = arith.constant 0 : index
    %c0_4 = arith.constant 0 : index
    %4 = vector.load %arg2[%c0_3, %c0_4] : memref<64x300xf32, #tpu.memory_space<vmem>>, vector<64x300xf32>
    %5 = arith.truncf %4 : vector<64x300xf32> to vector<64x300xbf16>
    %6 = tpu.concatenate %1, %3, %5 in 0 : vector<48x300xbf16>, vector<16x300xbf16>, vector<64x300xbf16> -> vector<128x300xbf16>
    %c0_5 = arith.constant 0 : index
    %c0_6 = arith.constant 0 : index
    %7 = vector.load %arg3[%c0_5, %c0_6] : memref<300x1152xbf16, #tpu.memory_space<vmem>>, vector<300x1152xbf16>
    %cst = arith.constant dense<0.000000e+00> : vector<128x1152xf32>
    %8 = tpu.matmul %6, %7, %cst {dimension_numbers = #tpu.dot_dimension_numbers<[1], [0], [0], [1], [0, 0, 1, 1], [], []>} : vector<128x300xbf16>, vector<300x1152xbf16>, vector<128x1152xf32> -> vector<128x1152xf32>
    %9 = vector.extract_strided_slice %8 {offsets = [0, 0], sizes = [128, 384], strides = [1, 1]} : vector<128x1152xf32> to vector<128x384xf32>
    %10 = vector.extract_strided_slice %8 {offsets = [0, 384], sizes = [128, 384], strides = [1, 1]} : vector<128x1152xf32> to vector<128x384xf32>
    %11 = vector.extract_strided_slice %8 {offsets = [0, 768], sizes = [128, 384], strides = [1, 1]} : vector<128x1152xf32> to vector<128x384xf32>
    %12 = tpu.iota {dimensions = array<i32: 0>} : vector<128x1xi32>
    %c8_i32 = arith.constant 8 : i32
    %c0_i32 = arith.constant 0 : i32
    %13 = arith.cmpi eq, %c8_i32, %c0_i32 : i32
    %c1_i32 = arith.constant 1 : i32
    %14 = arith.select %13, %c1_i32, %c8_i32 : i32
    %15 = vector.broadcast %14 : i32 to vector<128x1xi32>
    %16 = arith.remsi %12, %15 : vector<128x1xi32>
    %c0_i32_7 = arith.constant 0 : i32
    %17 = vector.broadcast %c0_i32_7 : i32 to vector<128x1xi32>
    %18 = arith.cmpi ne, %16, %17 : vector<128x1xi32>
    %c0_i32_8 = arith.constant 0 : i32
    %19 = vector.broadcast %c0_i32_8 : i32 to vector<128x1xi32>
    %20 = arith.cmpi slt, %16, %19 : vector<128x1xi32>
    %c0_i32_9 = arith.constant 0 : i32
    %21 = arith.cmpi slt, %14, %c0_i32_9 : i32
    %22 = vector.broadcast %21 : i1 to vector<128x1xi1>
    %23 = vector.broadcast %22 : vector<128x1xi1> to vector<128x1xi1>
    %24 = arith.xori %20, %23 : vector<128x1xi1>
    %25 = arith.andi %24, %18 : vector<128x1xi1>
    %26 = vector.broadcast %14 : i32 to vector<128x1xi32>
    %27 = arith.addi %16, %26 : vector<128x1xi32>
    %28 = arith.select %25, %27, %16 : vector<128x1xi1>, vector<128x1xi32>
    %c0_i32_10 = arith.constant 0 : i32
    %29 = vector.broadcast %c0_i32_10 : i32 to vector<128x1xi32>
    %30 = arith.cmpi ne, %28, %29 : vector<128x1xi32>
    %31 = arith.extui %30 : vector<128x1xi1> to vector<128x1xi32>
    %32 = arith.sitofp %31 : vector<128x1xi32> to vector<128x1xf32>
    %c7_i32 = arith.constant 7 : i32
    %33 = vector.broadcast %c7_i32 : i32 to vector<128x1xi32>
    %34 = arith.cmpi ne, %28, %33 : vector<128x1xi32>
    %35 = arith.extui %34 : vector<128x1xi1> to vector<128x1xi32>
    %36 = arith.sitofp %35 : vector<128x1xi32> to vector<128x1xf32>
    %c1_i32_11 = arith.constant 1 : i32
    %37 = tpu.dynamic_rotate %9 by %c1_i32_11 dim 0 : vector<128x384xf32>, i32 -> vector<128x384xf32>
    %c127_i32 = arith.constant 127 : i32
    %38 = tpu.dynamic_rotate %11 by %c127_i32 dim 0 : vector<128x384xf32>, i32 -> vector<128x384xf32>
    %39 = vector.broadcast %32 : vector<128x1xf32> to vector<128x384xf32>
    %40 = arith.mulf %37, %39 : vector<128x384xf32>
    %41 = arith.addf %10, %40 : vector<128x384xf32>
    %42 = vector.broadcast %36 : vector<128x1xf32> to vector<128x384xf32>
    %43 = arith.mulf %38, %42 : vector<128x384xf32>
    %44 = arith.addf %41, %43 : vector<128x384xf32>
    %c0_12 = arith.constant 0 : index
    %c0_13 = arith.constant 0 : index
    %45 = vector.load %arg4[%c0_12, %c0_13] : memref<1x384xf32, #tpu.memory_space<vmem>>, vector<1x384xf32>
    %46 = vector.broadcast %45 : vector<1x384xf32> to vector<128x384xf32>
    %47 = arith.addf %44, %46 : vector<128x384xf32>
    %cst_14 = arith.constant 0.000000e+00 : f32
    %48 = vector.broadcast %cst_14 : f32 to vector<128x384xf32>
    %49 = arith.maximumf %47, %48 : vector<128x384xf32>
    %50 = arith.truncf %49 : vector<128x384xf32> to vector<128x384xbf16>
    %51 = tpu.iota {dimensions = array<i32: 0>} : vector<16x128xi32>
    %52 = tpu.iota {dimensions = array<i32: 1>} : vector<16x128xi32>
    %c2_i32 = arith.constant 2 : i32
    %53 = vector.broadcast %c2_i32 : i32 to vector<16x128xi32>
    %54 = arith.cmpi slt, %51, %53 : vector<16x128xi32>
    %c24_i32 = arith.constant 24 : i32
    %55 = vector.broadcast %c24_i32 : i32 to vector<16x128xi32>
    %56 = arith.muli %51, %55 : vector<16x128xi32>
    %c4_i32 = arith.constant 4 : i32
    %57 = vector.broadcast %c4_i32 : i32 to vector<16x128xi32>
    %58 = arith.addi %57, %51 : vector<16x128xi32>
    %c8_i32_15 = arith.constant 8 : i32
    %59 = vector.broadcast %c8_i32_15 : i32 to vector<16x128xi32>
    %60 = arith.muli %58, %59 : vector<16x128xi32>
    %61 = arith.select %54, %56, %60 : vector<16x128xi1>, vector<16x128xi32>
    %c24_i32_16 = arith.constant 24 : i32
    %c8_i32_17 = arith.constant 8 : i32
    %62 = vector.broadcast %c24_i32_16 : i32 to vector<16x128xi32>
    %63 = vector.broadcast %c8_i32_17 : i32 to vector<16x128xi32>
    %64 = arith.select %54, %62, %63 : vector<16x128xi1>, vector<16x128xi32>
    %65 = arith.cmpi sge, %52, %61 : vector<16x128xi32>
    %66 = arith.addi %61, %64 : vector<16x128xi32>
    %67 = arith.cmpi slt, %52, %66 : vector<16x128xi32>
    %68 = arith.andi %65, %67 : vector<16x128xi1>
    %cst_18 = arith.constant 1.000000e+00 : f32
    %cst_19 = arith.constant 0.000000e+00 : f32
    %69 = vector.broadcast %cst_18 : f32 to vector<16x128xf32>
    %70 = vector.broadcast %cst_19 : f32 to vector<16x128xf32>
    %71 = arith.select %68, %69, %70 : vector<16x128xi1>, vector<16x128xf32>
    %72 = arith.truncf %71 : vector<16x128xf32> to vector<16x128xbf16>
    %cst_20 = arith.constant dense<0.000000e+00> : vector<16x384xf32>
    %73 = tpu.matmul %72, %50, %cst_20 {dimension_numbers = #tpu.dot_dimension_numbers<[1], [0], [0], [1], [0, 0, 1, 1], [], []>} : vector<16x128xbf16>, vector<128x384xbf16>, vector<16x384xf32> -> vector<16x384xf32>
    %74 = tpu.iota {dimensions = array<i32: 0>} : vector<16x1xi32>
    %c2_i32_21 = arith.constant 2 : i32
    %75 = vector.broadcast %c2_i32_21 : i32 to vector<16x1xi32>
    %76 = arith.cmpi slt, %74, %75 : vector<16x1xi32>
    %cst_22 = arith.constant 0.0416666679 : f32
    %cst_23 = arith.constant 1.250000e-01 : f32
    %77 = vector.broadcast %cst_22 : f32 to vector<16x1xf32>
    %78 = vector.broadcast %cst_23 : f32 to vector<16x1xf32>
    %79 = arith.select %76, %77, %78 : vector<16x1xi1>, vector<16x1xf32>
    %80 = vector.broadcast %79 : vector<16x1xf32> to vector<16x384xf32>
    %81 = arith.mulf %73, %80 : vector<16x384xf32>
    %82 = arith.truncf %81 : vector<16x384xf32> to vector<16x384xbf16>
    %c0_24 = arith.constant 0 : index
    %c0_25 = arith.constant 0 : index
    %83 = vector.load %arg5[%c0_24, %c0_25] : memref<384x384xbf16, #tpu.memory_space<vmem>>, vector<384x384xbf16>
    %cst_26 = arith.constant dense<0.000000e+00> : vector<16x384xf32>
    %84 = tpu.matmul %82, %83, %cst_26 {dimension_numbers = #tpu.dot_dimension_numbers<[1], [0], [0], [1], [0, 0, 1, 1], [], []>} : vector<16x384xbf16>, vector<384x384xbf16>, vector<16x384xf32> -> vector<16x384xf32>
    %c0_27 = arith.constant 0 : index
    %c0_28 = arith.constant 0 : index
    %85 = vector.load %arg6[%c0_27, %c0_28] : memref<1x384xf32, #tpu.memory_space<vmem>>, vector<1x384xf32>
    %86 = vector.broadcast %85 : vector<1x384xf32> to vector<16x384xf32>
    %87 = arith.addf %84, %86 : vector<16x384xf32>
    %c2_i32_29 = arith.constant 2 : i32
    %88 = vector.broadcast %c2_i32_29 : i32 to vector<16x1xi32>
    %89 = arith.cmpi slt, %74, %88 : vector<16x1xi32>
    %90 = vector.shape_cast %89 : vector<16x1xi1> to vector<16x1xi1>
    %91 = vector.broadcast %90 : vector<16x1xi1> to vector<16x384xi1>
    %92 = arith.select %91, %87, %81 : vector<16x384xi1>, vector<16x384xf32>
    %c0_30 = arith.constant 0 : index
    %c0_31 = arith.constant 0 : index
    %93 = vector.load %arg7[%c0_30, %c0_31] : memref<16x384xf32, #tpu.memory_space<vmem>>, vector<16x384xf32>
    tpu.vector_store %arg7[%c0_30, %c0_31], %92 {strides = array<i32>} : memref<16x384xf32, #tpu.memory_space<vmem>>, vector<16x384xf32>,
    return
  }
}

</mosaic_0001>

<bundles_post_ra>
// kernel: simple_avg_forward.1
= control target key start
LH: loop header
LB: loop body
LE: loop exit
PB: predicated region body
PF: predicated region fallthrough
CT: control target
= control target key end

     0   :  { %12 = vsyncpa [#allocation3], 0  ;;  %s6926_s0 = inlined_call_operand.hbm [shape: f32[48,300], index: 0, kind: input, shape index: {}]   ;;  %s6927_s1 = inlined_call_operand.hbm [shape: f32[16,300], index: 1, kind: input, shape index: {}]   ;;  %s6928_s2 = inlined_call_operand.hbm [shape: f32[64,300], index: 2, kind: input, shape index: {}]   ;;  %s6929_s3 = inlined_call_operand.hbm [shape: bf16[300,1152], index: 3, kind: input, shape index: {}]   ;;  %s6930_s4 = inlined_call_operand.vmem [shape: f32[1,384], index: 4, kind: input, shape index: {}]   ;;  %s6931_s5 = inlined_call_operand.hbm [shape: bf16[384,384], index: 5, kind: input, shape index: {}]   ;;  %s6932_s6 = inlined_call_operand.vmem [shape: f32[1,384], index: 6, kind: input, shape index: {}]   ;;  %s6933_s7 = inlined_call_operand.vmem [shape: f32[16,384], index: 7, kind: output, shape index: {}]  }
   0x1   :  { %13 = vsyncpa [#allocation5], 0 }
   0x2   :  { %14 = vsyncpa [#allocation8], 0  ;;  %s4976_s24 = smov [#allocation4]   ;;  %s4977_s26 = smov [#allocation7]  }
   0x3   :  { %s32_s25 = sshll.u32 %s4976_s24, 4  ;;  %s56_s27 = sshll.u32 %s4977_s26, 4  ;;  %s33_s25 = int_to_ptr.vmem [resolvable:$true] %s32_s25  ;;  %s57_s27 = int_to_ptr.vmem [resolvable:$true] %s56_s27 }
   0x4   :  { %s4878_s28 = scalar_lea.vmem %s33_s25, 768  ;;  %p4883_p1 = scmp.lt.s32.totalorder %s33_s25, %s33_s25 }
   0x5   :  { %p4879_p0 = scmp.ne.s32.totalorder %s33_s25, %s4878_s28  ;;  %p4884_p2 = scmp.lt.s32.totalorder %s4878_s28, %s4878_s28 }
   0x7   :  { %p4885_p3 = por %p4884_p2, %p4883_p1 }
   0x9   :  { %p4886_p4 = pnand %p4885_p3, %p4879_p0 }
   0xb   :  { %4889 = shalt.err (!%p4886_p4)
}
   0xc   :  { %s4978_s29 = smov 384   ;;  %s4979_s30 = smov 24  }
   0xd   :  { %38 = dma.hbm_to_vmem [thread:$0]  %s6927_s1, 768, %s33_s25, [#allocation5], %s4978_s29, %s4978_s29, %s4979_s30  }
   0xe   :  { %s4898_s10 = scalar_lea.vmem %s57_s27, 21888  ;;  %p4903_p6 = scmp.lt.s32.totalorder %s57_s27, %s57_s27 }
   0xf   :  { %p4899_p5 = scmp.ne.s32.totalorder %s57_s27, %s4898_s10  ;;  %p4904_p7 = scmp.lt.s32.totalorder %s4898_s10, %s4898_s10 }
  0x11   :  { %p4905_p8 = por %p4904_p7, %p4903_p6 }
  0x13   :  { %p4906_p9 = pnand %p4905_p8, %p4899_p5 }
  0x15   :  { %4909 = shalt.err (!%p4906_p9)
}
  0x16   :  { %s4980_s11 = smov 576   ;;  %s4981_s12 = smov 36  }
  0x17   :  { %62 = dma.hbm_to_vmem [thread:$0]  %s6929_s3, 21888, %s57_s27, [#allocation8], %s4980_s11, %s4980_s11, %s4981_s12  }
  0x18   :  { %s4982_s15 = smov [#allocation2]   ;;  %s4983_s17 = smov [#allocation6]  }
  0x19   :  { %s20_s16 = sshll.u32 %s4982_s15, 4  ;;  %s44_s18 = sshll.u32 %s4983_s17, 4  ;;  %s21_s16 = int_to_ptr.vmem [resolvable:$true] %s20_s16  ;;  %s45_s18 = int_to_ptr.vmem [resolvable:$true] %s44_s18 }
  0x1a   :  { %s4918_s1 = scalar_lea.vmem %s21_s16, 2304  ;;  %p4923_p11 = scmp.lt.s32.totalorder %s21_s16, %s21_s16 }
  0x1b   :  { %p4919_p10 = scmp.ne.s32.totalorder %s21_s16, %s4918_s1  ;;  %p4924_p12 = scmp.lt.s32.totalorder %s4918_s1, %s4918_s1 }
  0x1d   :  { %p4925_p13 = por %p4924_p12, %p4923_p11 }
  0x1f   :  { %p4926_p0 = pnand %p4925_p13, %p4919_p10 }
  0x21   :  { %4929 = shalt.err (!%p4926_p0)
}
  0x22   :  { %26 = dma.hbm_to_vmem [thread:$0]  %s6926_s0, 2304, %s21_s16, [#allocation3], %s4978_s29, %s4978_s29, %s4979_s30  }
  0x23   :  { %s4938_s3 = scalar_lea.vmem %s45_s18, 3072  ;;  %p4943_p2 = scmp.lt.s32.totalorder %s45_s18, %s45_s18 }
  0x24   :  { %p4939_p1 = scmp.ne.s32.totalorder %s45_s18, %s4938_s3  ;;  %p4944_p3 = scmp.lt.s32.totalorder %s4938_s3, %s4938_s3 }
  0x26   :  { %p4945_p4 = por %p4944_p3, %p4943_p2 }
  0x28   :  { %p4946_p5 = pnand %p4945_p4, %p4939_p1 }
  0x2a   :  { %4949 = shalt.err (!%p4946_p5)
}
  0x2b   :  { %50 = dma.hbm_to_vmem [thread:$0]  %s6928_s2, 3072, %s45_s18, [#allocation5], %s4978_s29, %s4978_s29, %s4979_s30  }
  0x2c   :  { %s4984_s23 = smov [#allocation9]  }
  0x2d   :  { %s70_s24 = sshll.u32 %s4984_s23, 4  ;;  %s71_s24 = int_to_ptr.vmem [resolvable:$true] %s70_s24 }
  0x2e   :  { %s4958_s25 = scalar_lea.vmem %s71_s24, 9216  ;;  %p4963_p7 = scmp.lt.s32.totalorder %s71_s24, %s71_s24 }
  0x2f   :  { %p4959_p6 = scmp.ne.s32.totalorder %s71_s24, %s4958_s25  ;;  %p4964_p8 = scmp.lt.s32.totalorder %s4958_s25, %s4958_s25 }
  0x31   :  { %p4965_p9 = por %p4964_p8, %p4963_p7 }
  0x33   :  { %p4966_p10 = pnand %p4965_p9, %p4959_p6 }
  0x35   :  { %4969 = shalt.err (!%p4966_p10)
}
  0x36   :  { %s4985_s0 = smov 192   ;;  %s4986_s26 = smov 12  }
  0x37   :  { %76 = dma.hbm_to_vmem [thread:$0]  %s6931_s5, 9216, %s71_s24, [#allocation8], %s4985_s0, %s4985_s0, %s4986_s26  }
  0x38   :  { %4970 = dma.done.wait [#allocation3], 2304  }
  0x39   :  { %4971 = vsyncadd [#allocation3], 4294964992 }
  0x3a   :  { %4972 = dma.done.wait [#allocation5], 3840  }
  0x3b   :  { %4973 = vsyncadd [#allocation5], 4294963456 }
  0x3c   :  { %4974 = dma.done.wait [#allocation8], 31104  }
  0x3d   :  { %4975 = vsyncadd [#allocation8], 4294936192  ;;  %v6937_v0 = vmov 0   ;;  %v4527_v1 = vld [vmem:[#allocation7 + $0x1fc] ss:$36 sps:$4 sm:$0xff]   ;;  %vm1247_vm0 = vcmask 1045504  }
  0x3e   :  { %1420 = vmatprep.mubr.bf16.mxu1 %v6937_v0  ;;  %v4529_v2 = vld [vmem:[#allocation7 + $0x1f8] ss:$36 sps:$4 sm:$0xff]   ;;  %1275 = vmatprep.subr.bf16.mxu0 %v4527_v1  ;;  %v4532_v4 = vld [vmem:[#allocation7 + $0x1b0] ss:$36 sps:$4 sm:$0xff]   ;;  %v4535_v8 = vld [vmem:[#allocation7 + $0x168] ss:$36 sps:$4 sm:$0xff]  }
  0x3f   :  { %v4530_v3 = vld [vmem:[#allocation7 + $0x1b4] ss:$36 sps:$4 sm:$0xff]   ;;  %1276 = vmatpush1.bf16.msra.mxu0 %v4529_v2  ;;  %v4533_v5 = vld [vmem:[#allocation7 + $0x16c] ss:$36 sps:$4 sm:$0xff]   ;;  %v4536_v9 = vld [vmem:[#allocation7 + $0x124] ss:$36 sps:$4 sm:$0xff]  }
  0x40   :  { %1277 = vmatprep.subr.bf16.mxu0 %v4530_v3  ;;  %v4538_v6 = vld [vmem:[#allocation7 + $0x514] ss:$36 sps:$4 sm:$0x3f]   ;;  %v4544_v11 = vld [vmem:[#allocation7 + $0x4cc] ss:$36 sps:$4 sm:$0xff]   ;;  %vm1222_vm1 = vcmask 359424  }
  0x41   :  { %v4541_v7 = vld [vmem:[#allocation7 + $0x510] ss:$36 sps:$4 sm:$0x3f]   ;;  %4180 = vmatprep.subr.msk.bf16.mxu1 %vm1247_vm0, %v4538_v6  ;;  %v4547_v12 = vld [vmem:[#allocation7 + $0x4c8] ss:$36 sps:$4 sm:$0xff]   ;;  %v103_v28 = vld [vmem:[#allocation2 + $0x40] sm:$0xff] }
  0x42   :  { %v1249_v10 = vsel %vm1247_vm0, %v4541_v7, 0  ;;  %v4540_v13 = vld [vmem:[#allocation7 + $0x120] ss:$36 sps:$4 sm:$0xff]   ;;  %v97_v17 = vld [vmem:[#allocation2 + $0x10] sm:$0xff]  ;;  %v100_v18 = vld [vmem:[#allocation2 + $0x28] sm:$0xff] }
  0x43   :  { %1278 = vmatpush1.bf16.msra.mxu0 %v4532_v4  ;;  %1399 = vmatpush1.bf16.msra.mxu1 %v1249_v10  ;;  %v4542_v14 = vld [vmem:[#allocation7 + $0xdc] ss:$36 sps:$4 sm:$0xff]   ;;  %v4550_v15 = vld [vmem:[#allocation7 + $0x484] ss:$36 sps:$4 sm:$0xff]   ;;  %v4548_v21 = vld [vmem:[#allocation7 + $0x94] ss:$36 sps:$4 sm:$0xff]   ;;  %v5060_v22 = vpack.c.bf16 %v100_v18, %v97_v17 }
  0x44   :  { %1279 = vmatprep.subr.bf16.mxu0 %v4533_v5  ;;  %1400 = vmatprep.subr.bf16.mxu1 %v4544_v11  ;;  %v4553_v16 = vld [vmem:[#allocation7 + $0x480] ss:$36 sps:$4 sm:$0xff]   ;;  %v4546_v20 = vld [vmem:[#allocation7 + $0xd8] ss:$36 sps:$4 sm:$0xff]   ;;  %v4552_v25 = vld [vmem:[#allocation7 + $0x90] ss:$36 sps:$4 sm:$0xff]  }
  0x45   :  { %v4558_v19 = vld [vmem:[#allocation7 + $0x204] ss:$36 sps:$4 sm:$0xff]   ;;  %v4564_v24 = vld [vmem:[#allocation7 + $0x1bc] ss:$36 sps:$4 sm:$0xff]   ;;  %v4554_v26 = vld [vmem:[#allocation7 + $0x4c] ss:$36 sps:$4 sm:$0xff]  }
  0x46   :  { %v4556_v23 = vld [vmem:[#allocation7 + $0x200] ss:$36 sps:$4 sm:$0xff]   ;;  %v4562_v27 = vld [vmem:[#allocation7 + $0x1b8] ss:$36 sps:$4 sm:$0xff]   ;;  %v4559_v31 = vld [vmem:[#allocation7 + $0x48] ss:$36 sps:$4 sm:$0xff]  }
  0x47   :  { %1280 = vmatpush1.bf16.msra.mxu0 %v4535_v8  ;;  %1401 = vmatpush1.bf16.msra.mxu1 %v4547_v12  ;;  %v106_v29 = vld [vmem:[#allocation2 + $0x58] sm:$0xff]  ;;  %v4560_v32 = vld [vmem:[#allocation7 + $0x4] ss:$36 sps:$4 sm:$0xff]   ;;  %v4568_v34 = vld [vmem:[#allocation7 + $0x170] ss:$36 sps:$4 sm:$0xff]  }
  0x48   :  { %1281 = vmatprep.subr.bf16.mxu0 %v4536_v9  ;;  %1402 = vmatprep.subr.bf16.mxu1 %v4550_v15  ;;  %v4570_v30 = vld [vmem:[#allocation7 + $0x174] ss:$36 sps:$4 sm:$0xff]   ;;  %v5065_v33 = vpack.c.bf16 %v106_v29, %v103_v28  ;;  %v4576_v35 = vld [vmem:[#allocation7 + $0x12c] ss:$36 sps:$4 sm:$0xff]   ;;  %v4565_v36 = vld [vmem:[#allocation7] ss:$36 sps:$4 sm:$0xff]  }
  0x49   :  { %v4566_v37 = vld [vmem:[#allocation7 + $0x43c] ss:$36 sps:$4 sm:$0xff]   ;;  %v4574_v38 = vld [vmem:[#allocation7 + $0x128] ss:$36 sps:$4 sm:$0xff]   ;;  %v109_v39 = vld [vmem:[#allocation2 + $0x70] sm:$0xff] }
  0x4a   :  { %v112_v40 = vld [vmem:[#allocation2 + $0x88] sm:$0xff]  ;;  %v4571_v42 = vld [vmem:[#allocation7 + $0x438] ss:$36 sps:$4 sm:$0xff]   ;;  %v4580_v45 = vld [vmem:[#allocation7 + $0xe0] ss:$36 sps:$4 sm:$0xff]  }
  0x4b   :  { %1282 = vmatpush1.bf16.msra.mxu0 %v4540_v13  ;;  %1403 = vmatpush1.bf16.msra.mxu1 %v4553_v16  ;;  %v4582_v41 = vld [vmem:[#allocation7 + $0xe4] ss:$36 sps:$4 sm:$0xff]   ;;  %v4572_v43 = vld [vmem:[#allocation7 + $0x3f4] ss:$36 sps:$4 sm:$0xff]   ;;  %v5070_v44 = vpack.c.bf16 %v112_v40, %v109_v39  ;;  %v4588_v46 = vld [vmem:[#allocation7 + $0x9c] ss:$36 sps:$4 sm:$0xff]  }
  0x4c   :  { %1283 = vmatprep.subr.bf16.mxu0 %v4542_v14  ;;  %1501 = vmatprep.subr.bf16.mxu1 %v4558_v19  ;;  %v4577_v47 = vld [vmem:[#allocation7 + $0x3f0] ss:$36 sps:$4 sm:$0xff]   ;;  %v4586_v49 = vld [vmem:[#allocation7 + $0x98] ss:$36 sps:$4 sm:$0xff]   ;;  %v124_v50 = vld [vmem:[#allocation4 + $0x10] sm:$0xff] }
  0x4d   :  { %v4578_v48 = vld [vmem:[#allocation7 + $0x3ac] ss:$36 sps:$4 sm:$0xff]   ;;  %v127_v51 = vld [vmem:[#allocation4 + $0x28] sm:$0xff]  ;;  %v4584_v54 = vld [vmem:[#allocation7 + $0x364] ss:$36 sps:$4 sm:$0xff]  }
  0x4e   :  { %4181 = vmatmul.mubr.msk.bf16.vlgmr.msra.gmra.mxu1 %vm1222_vm1, %v5060_v22  ;;  %v4594_v52 = vld [vmem:[#allocation7 + $0x54] ss:$36 sps:$4 sm:$0xff]   ;;  %v4583_v53 = vld [vmem:[#allocation7 + $0x3a8] ss:$36 sps:$4 sm:$0xff]   ;;  %v5075_v55 = vpack.c.bf16 %v127_v51, %v124_v50  ;;  %v99_v59 = vld [vmem:[#allocation2 + $0x20] sm:$0xff] }
  0x4f   :  { %1284 = vmatpush1.bf16.msra.mxu0 %v4546_v20  ;;  %1502 = vmatpush1.bf16.msra.mxu1 %v4556_v23  ;;  %v4592_v56 = vld [vmem:[#allocation7 + $0x50] ss:$36 sps:$4 sm:$0xff]   ;;  %v96_v58 = vld [vmem:[#allocation2 + $0x8] sm:$0xff]  ;;  %v4589_v60 = vld [vmem:[#allocation7 + $0x360] ss:$36 sps:$4 sm:$0xff]  }
  0x50   :  { %1285 = vmatprep.subr.bf16.mxu0 %v4548_v21  ;;  %1430 = vmatprep.mubr.bf16.mxu1 %v6937_v0  ;;  %v4600_v57 = vld [vmem:[#allocation7 + $0xc] ss:$36 sps:$4 sm:$0xff]   ;;  %v4590_v61 = vld [vmem:[#allocation7 + $0x31c] ss:$36 sps:$4 sm:$0xff]   ;;  %v5077_v63 = vpack.c.bf16 %v99_v59, %v96_v58  ;;  %v4606_v3 = vld [vmem:[#allocation7 + $0x444] ss:$36 sps:$4 sm:$0xff]  }
  0x51   :  { %1503 = vmatprep.subr.bf16.mxu1 %v4564_v24  ;;  %v4598_v62 = vld [vmem:[#allocation7 + $0x8] ss:$36 sps:$4 sm:$0xff]   ;;  %v133_v1 = vld [vmem:[#allocation6 + $0x10] sm:$0xff]  ;;  %v4595_v4 = vld [vmem:[#allocation7 + $0x318] ss:$36 sps:$4 sm:$0xff]  }
  0x52   :  { %v136_v2 = vld [vmem:[#allocation6 + $0x28] sm:$0xff]  ;;  %1307 = vmatprep.mubr.bf16.mxu0 %v5077_v63  ;;  %v4596_v5 = vld [vmem:[#allocation7 + $0x2d4] ss:$36 sps:$4 sm:$0xff]   ;;  %v4604_v7 = vld [vmem:[#allocation7 + $0x440] ss:$36 sps:$4 sm:$0xff]  }
  0x53   :  { %1286 = vmatpush1.bf16.msra.mxu0 %v4552_v25  ;;  %1504 = vmatpush1.bf16.msra.mxu1 %v4562_v27  ;;  %v5083_v6 = vpack.c.bf16 %v136_v2, %v133_v1  ;;  %v4612_v8 = vld [vmem:[#allocation7 + $0x3fc] ss:$36 sps:$4 sm:$0xff]   ;;  %v4601_v9 = vld [vmem:[#allocation7 + $0x2d0] ss:$36 sps:$4 sm:$0xff]   ;;  %v4607_v15 = vld [vmem:[#allocation7 + $0x288] ss:$36 sps:$4 sm:$0xff]  }
  0x54   :  { %1287 = vmatprep.subr.bf16.mxu0 %v4554_v26  ;;  %1505 = vmatprep.subr.bf16.mxu1 %v4570_v30  ;;  %v4602_v10 = vld [vmem:[#allocation7 + $0x28c] ss:$36 sps:$4 sm:$0xff]   ;;  %v4610_v11 = vld [vmem:[#allocation7 + $0x3f8] ss:$36 sps:$4 sm:$0xff]   ;;  %v139_v12 = vld [vmem:[#allocation6 + $0x40] sm:$0xff] }
  0x55   :  { %v142_v13 = vld [vmem:[#allocation6 + $0x58] sm:$0xff]  ;;  %v4608_v16 = vld [vmem:[#allocation7 + $0x244] ss:$36 sps:$4 sm:$0xff]   ;;  %v4614_v20 = vld [vmem:[#allocation7 + $0x3b0] ss:$36 sps:$4 sm:$0xff]  }
  0x56   :  { %4182 = vmatmul.mubr.msk.bf16.gmra.mxu1 %vm1222_vm1, %v5065_v33  ;;  %v4616_v14 = vld [vmem:[#allocation7 + $0x3b4] ss:$36 sps:$4 sm:$0xff]   ;;  %v5088_v17 = vpack.c.bf16 %v142_v13, %v139_v12  ;;  %v4613_v18 = vld [vmem:[#allocation7 + $0x240] ss:$36 sps:$4 sm:$0xff]   ;;  %v4622_v25 = vld [vmem:[#allocation7 + $0x36c] ss:$36 sps:$4 sm:$0xff]  }
  0x57   :  { %1288 = vmatpush1.bf16.msra.mxu0 %v4559_v31  ;;  %1506 = vmatpush1.bf16.msra.mxu1 %v4568_v34  ;;  %v95_v19 = vld [vmem:[#allocation2] sm:$0xff]  ;;  %v98_v21 = vld [vmem:[#allocation2 + $0x18] sm:$0xff]  ;;  %v4620_v26 = vld [vmem:[#allocation7 + $0x368] ss:$36 sps:$4 sm:$0xff]  }
  0x58   :  { %1289 = vmatprep.subr.bf16.mxu0 %v4560_v32  ;;  %1440 = vmatprep.mubr.bf16.mxu1 %v6937_v0  ;;  %v4617_v23 = vld [vmem:[#allocation7 + $0x51c] ss:$36 sps:$4 sm:$0x3f]   ;;  %v105_v28 = vld [vmem:[#allocation2 + $0x50] sm:$0xff]  ;;  %v148_v30 = vld [vmem:[#allocation6 + $0x88] sm:$0xff]  ;;  %v5093_v31 = vpack.c.bf16 %v98_v21, %v95_v19 }
  0x59   :  { %1507 = vmatprep.subr.bf16.mxu1 %v4576_v35  ;;  %v4619_v24 = vld [vmem:[#allocation7 + $0x518] ss:$36 sps:$4 sm:$0x3f]   ;;  %v145_v29 = vld [vmem:[#allocation6 + $0x70] sm:$0xff]  ;;  %v4625_v32 = vld [vmem:[#allocation7 + $0x324] ss:$36 sps:$4 sm:$0xff]  }
  0x5a   :  { %v102_v27 = vld [vmem:[#allocation2 + $0x38] sm:$0xff]  ;;  %v1255_v35 = vsel %vm1247_vm0, %v4619_v24, 0  ;;  %v4623_v39 = vld [vmem:[#allocation7 + $0x320] ss:$36 sps:$4 sm:$0xff]   ;;  %v104_v40 = vld [vmem:[#allocation2 + $0x48] sm:$0xff] }
  0x5b   :  { %1290 = vmatpush1.bf16.msra.mxu0 %v4565_v36  ;;  %1508 = vmatpush1.bf16.msra.mxu1 %v4574_v38  ;;  %v5095_v34 = vpack.c.bf16 %v105_v28, %v102_v27  ;;  %v5099_v36 = vpack.c.bf16 %v148_v30, %v145_v29  ;;  %v101_v38 = vld [vmem:[#allocation2 + $0x30] sm:$0xff]  ;;  %v110_v59 = vld [vmem:[#allocation2 + $0x78] sm:$0xff]  ;;  %v4641_v12 = vld [vmem:[#allocation7 + $0x1c0] ss:$36 sps:$4 sm:$0xff]  }
  0x5c   :  { %1291 = vmatprep.subr.bf16.mxu0 %v4566_v37  ;;  %1509 = vmatprep.subr.bf16.mxu1 %v4582_v41  ;;  %v4637_v37 = vld [vmem:[#allocation7 + $0x4d4] ss:$36 sps:$4 sm:$0xff]   ;;  %v4628_v41 = vld [vmem:[#allocation7 + $0x2dc] ss:$36 sps:$4 sm:$0xff]   ;;  %v4634_v58 = vld [vmem:[#allocation7 + $0x24c] ss:$36 sps:$4 sm:$0xff]  }
  0x5d   :  { %v4631_v50 = vld [vmem:[#allocation7 + $0x294] ss:$36 sps:$4 sm:$0xff]   ;;  %v4640_v2 = vld [vmem:[#allocation7 + $0x20c] ss:$36 sps:$4 sm:$0xff]  }
  0x5e   :  { %4183 = vmatmul.mubr.msk.bf16.gmra.mxu1 %vm1222_vm1, %v5070_v44  ;;  %v134_v19 = vld [vmem:[#allocation6 + $0x18] sm:$0xff]  ;;  %v4647_v24 = vld [vmem:[#allocation7 + $0x130] ss:$36 sps:$4 sm:$0xff]   ;;  %v4650_v29 = vld [vmem:[#allocation7 + $0xe8] ss:$36 sps:$4 sm:$0xff]  }
  0x5f   :  { %1292 = vmatpush2.bf16.msra.mxu0 %v4571_v42  ;;  %1510 = vmatpush1.bf16.msra.mxu1 %v4580_v45  ;;  %v4626_v42 = vld [vmem:[#allocation7 + $0x2d8] ss:$36 sps:$4 sm:$0xff]   ;;  %v4635_v45 = vld [vmem:[#allocation7 + $0x4d0] ss:$36 sps:$4 sm:$0xff]   ;;  %v140_v30 = vld [vmem:[#allocation6 + $0x48] sm:$0xff] }
  0x60   :  { %1293 = vmatprep.subr.bf16.mxu0 %v4572_v43  ;;  %1450 = vmatprep.mubr.bf16.mxu1 %v6937_v0  ;;  %v108_v43 = vld [vmem:[#allocation2 + $0x68] sm:$0xff]  ;;  %v138_v21 = vld [vmem:[#allocation6 + $0x38] sm:$0xff]  ;;  %v137_v28 = vld [vmem:[#allocation6 + $0x30] sm:$0xff] }
  0x61   :  { %1511 = vmatprep.subr.bf16.mxu1 %v4588_v46  ;;  %v111_v46 = vld [vmem:[#allocation2 + $0x80] sm:$0xff] }
  0x62   :  { %v5108_v51 = vpack.c.bf16 %v111_v46, %v108_v43  ;;  %v4659_v43 = vld [vmem:[#allocation7 + $0x58] ss:$36 sps:$4 sm:$0xff]  }
  0x63   :  { %1294 = vmatpush2.bf16.msra.mxu0 %v4577_v47  ;;  %1512 = vmatpush1.bf16.msra.mxu1 %v4586_v49  ;;  %v151_v47 = vld [vmem:[#allocation6 + $0xa0] sm:$0xff]  ;;  %v5106_v49 = vpack.c.bf16 %v104_v40, %v101_v38  ;;  %v4664_v46 = vld [vmem:[#allocation7 + $0x14] ss:$36 sps:$4 sm:$0xff]  }
  0x64   :  { %1295 = vmatprep.subr.bf16.mxu0 %v4578_v48  ;;  %1513 = vmatprep.subr.bf16.mxu1 %v4594_v52  ;;  %v154_v48 = vld [vmem:[#allocation6 + $0xb8] sm:$0xff]  ;;  %v4653_v38 = vld [vmem:[#allocation7 + $0xa0] ss:$36 sps:$4 sm:$0xff]  }
  0x65   :  { %v5110_v52 = vpack.c.bf16 %v154_v48, %v151_v47  ;;  %v4661_v40 = vld [vmem:[#allocation7 + $0x5c] ss:$36 sps:$4 sm:$0xff]   ;;  %v153_v48 = vld [vmem:[#allocation6 + $0xb0] sm:$0xff] }
  0x66   :  { %4184 = vmatmul.mubr.msk.bf16.gmra.mxu1 %vm1222_vm1, %v5075_v55  ;;  %v150_v47 = vld [vmem:[#allocation6 + $0x98] sm:$0xff] }
  0x67   :  { %1296 = vmatpush2.bf16.msra.mxu0 %v4583_v53  ;;  %1514 = vmatpush1.bf16.msra.mxu1 %v4592_v56  ;;  %v4656_v53 = vld [vmem:[#allocation7 + $0x488] ss:$36 sps:$4 sm:$0xff]   ;;  %v4629_v56 = vld [vmem:[#allocation7 + $0x290] ss:$36 sps:$4 sm:$0xff]  }
  0x68   :  { %1297 = vmatprep.subr.bf16.mxu0 %v4584_v54  ;;  %1460 = vmatprep.mubr.bf16.mxu1 %v6937_v0  ;;  %v4658_v54 = vld [vmem:[#allocation7 + $0x48c] ss:$36 sps:$4 sm:$0xff]  }
  0x69   :  { %1515 = vmatprep.subr.bf16.mxu1 %v4600_v57  ;;  %v107_v57 = vld [vmem:[#allocation2 + $0x60] sm:$0xff] }
  0x6a   :  { %v5117_v1 = vpack.c.bf16 %v110_v59, %v107_v57  ;;  %v4665_v57 = vld [vmem:[#allocation7 + $0x448] ss:$36 sps:$4 sm:$0xff]  }
  0x6b   :  { %1298 = vmatpush2.bf16.msra.mxu0 %v4589_v60  ;;  %1516 = vmatpush1.bf16.msra.mxu1 %v4598_v62  ;;  %v123_v60 = vld [vmem:[#allocation4 + $0x8] sm:$0xff]  ;;  %v4632_v62 = vld [vmem:[#allocation7 + $0x248] ss:$36 sps:$4 sm:$0xff]  }
  0x6c   :  { %1299 = vmatprep.subr.bf16.mxu0 %v4590_v61  ;;  %1517 = vmatprep.subr.bf16.mxu1 %v4606_v3  ;;  %v126_v61 = vld [vmem:[#allocation4 + $0x20] sm:$0xff]  ;;  %v4670_v59 = vld [vmem:[#allocation7 + $0x404] ss:$36 sps:$4 sm:$0xff]  }
  0x6d   :  { %v5119_v3 = vpack.c.bf16 %v126_v61, %v123_v60  ;;  %v152_v60 = vld [vmem:[#allocation6 + $0xa8] sm:$0xff]  ;;  %v4668_v61 = vld [vmem:[#allocation7 + $0x400] ss:$36 sps:$4 sm:$0xff]  }
  0x6e   :  { %4185 = vmatmul.mubr.msk.bf16.gmra.mxu1 %vm1222_vm1, %v5083_v6 }
  0x6f   :  { %1300 = vmatpush2.bf16.msra.mxu0 %v4595_v4  ;;  %1518 = vmatpush2.bf16.msra.mxu1 %v4604_v7  ;;  %v122_v4 = vld [vmem:[#allocation4] sm:$0xff]  ;;  %v4643_v7 = vld [vmem:[#allocation7 + $0x1c4] ss:$36 sps:$4 sm:$0xff]  }
  0x70   :  { %1301 = vmatprep.subr.bf16.mxu0 %v4596_v5  ;;  %1470 = vmatprep.mubr.bf16.mxu1 %v6937_v0  ;;  %v4638_v5 = vld [vmem:[#allocation7 + $0x208] ss:$36 sps:$4 sm:$0xff]  }
  0x71   :  { %1519 = vmatprep.subr.bf16.mxu1 %v4612_v8  ;;  %v4674_v8 = vld [vmem:[#allocation7 + $0x524] ss:$36 sps:$4 sm:$0x3f]  }
  0x73   :  { %1302 = vmatpush2.bf16.msra.mxu0 %v4601_v9  ;;  %1520 = vmatpush2.bf16.msra.mxu1 %v4610_v11  ;;  %v125_v9 = vld [vmem:[#allocation4 + $0x18] sm:$0xff]  ;;  %v135_v11 = vld [vmem:[#allocation6 + $0x20] sm:$0xff] }
  0x74   :  { %1303 = vmatprep.subr.bf16.mxu0 %v4602_v10  ;;  %1521 = vmatprep.subr.bf16.mxu1 %v4616_v14  ;;  %v132_v10 = vld [vmem:[#allocation6 + $0x8] sm:$0xff]  ;;  %v5126_v13 = vpack.c.bf16 %v125_v9, %v122_v4  ;;  %v4646_v14 = vld [vmem:[#allocation7 + $0x17c] ss:$36 sps:$4 sm:$0xff]  }
  0x75   :  { %v4671_v4 = vld [vmem:[#allocation7 + $0x3b8] ss:$36 sps:$4 sm:$0xff]  }
  0x76   :  { %4186 = vmatmul.mubr.msk.bf16.gmra.mxu1 %vm1222_vm1, %v5088_v17 }
  0x77   :  { %1304 = vmatpush2.bf16.msra.mxu0 %v4607_v15  ;;  %1522 = vmatpush2.bf16.msra.mxu1 %v4614_v20  ;;  %v5128_v15 = vpack.c.bf16 %v135_v11, %v132_v10  ;;  %v4649_v20 = vld [vmem:[#allocation7 + $0x134] ss:$36 sps:$4 sm:$0xff]   ;;  %v4682_v10 = vld [vmem:[#allocation7 + $0x32c] ss:$36 sps:$4 sm:$0xff]  }
  0x78   :  { %1305 = vmatprep.subr.bf16.mxu0 %v4608_v16  ;;  %1480 = vmatprep.mubr.bf16.mxu1 %v6937_v0  ;;  %v131_v16 = vld [vmem:[#allocation6] sm:$0xff]  ;;  %v4680_v11 = vld [vmem:[#allocation7 + $0x328] ss:$36 sps:$4 sm:$0xff]  }
  0x79   :  { %1523 = vmatprep.subr.bf16.mxu1 %v4622_v25  ;;  %v5134_v25 = vpack.c.bf16 %v134_v19, %v131_v16  ;;  %v4692_v16 = vld [vmem:[#allocation7 + $0x4d8] ss:$36 sps:$4 sm:$0xff]   ;;  %v4683_v19 = vld [vmem:[#allocation7 + $0x2e0] ss:$36 sps:$4 sm:$0xff]  }
  0x7b   :  { %1306 = vmatpush2.bf16.msra.mxu0 %v4613_v18  ;;  %1524 = vmatpush2.bf16.msra.mxu1 %v4620_v26  ;;  %v4644_v18 = vld [vmem:[#allocation7 + $0x178] ss:$36 sps:$4 sm:$0xff]   ;;  %v4652_v26 = vld [vmem:[#allocation7 + $0xec] ss:$36 sps:$4 sm:$0xff]  }
  0x7c   :  { %4189 = vmatprep.subr.msk.bf16.mxu0 %vm1247_vm0, %v4617_v23  ;;  %1525 = vmatprep.subr.bf16.mxu1 %v4625_v32  ;;  %v141_v23 = vld [vmem:[#allocation6 + $0x50] sm:$0xff]  ;;  %v4655_v32 = vld [vmem:[#allocation7 + $0xa4] ss:$36 sps:$4 sm:$0xff]  }
  0x7d   :  { %v5136_v27 = vpack.c.bf16 %v141_v23, %v138_v21  ;;  %v4713_v21 = vld [vmem:[#allocation7 + $0x490] ss:$36 sps:$4 sm:$0xff]   ;;  %v4686_v23 = vld [vmem:[#allocation7 + $0x298] ss:$36 sps:$4 sm:$0xff]  }
  0x7e   :  { %1308 = vmatmul.mubr.bf16.vlgmr.msra.gmra.mxu0 %v5093_v31  ;;  %4187 = vmatmul.mubr.msk.bf16.gmra.mxu1 %vm1222_vm1, %v5099_v36 }
  0x7f   :  { %1625 = vmatpush1.bf16.msra.mxu0 %v1255_v35  ;;  %1317 = vmatprep.mubr.bf16.mxu0 %v5095_v34  ;;  %v144_v35 = vld [vmem:[#allocation6 + $0x68] sm:$0xff] }
  0x80   :  { %1626 = vmatprep.subr.bf16.mxu0 %v4637_v37  ;;  %1526 = vmatpush2.bf16.msra.mxu1 %v4623_v39  ;;  %v147_v37 = vld [vmem:[#allocation6 + $0x80] sm:$0xff]  ;;  %v5142_v39 = vpack.c.bf16 %v140_v30, %v137_v28  ;;  %v4689_v28 = vld [vmem:[#allocation7 + $0x250] ss:$36 sps:$4 sm:$0xff]  }
  0x81   :  { %1490 = vmatprep.mubr.bf16.mxu1 %v6937_v0  ;;  %1527 = vmatprep.subr.bf16.mxu1 %v4628_v41  ;;  %v5144_v41 = vpack.c.bf16 %v147_v37, %v144_v35  ;;  %v4695_v30 = vld [vmem:[#allocation7 + $0x210] ss:$36 sps:$4 sm:$0xff]   ;;  %v4698_v35 = vld [vmem:[#allocation7 + $0x1c8] ss:$36 sps:$4 sm:$0xff]  }
  0x82   :  { %v4703_v37 = vld [vmem:[#allocation7 + $0x184] ss:$36 sps:$4 sm:$0xff]  }
  0x83   :  { %1627 = vmatpush1.bf16.msra.mxu0 %v4635_v45  ;;  %v146_v45 = vld [vmem:[#allocation6 + $0x78] sm:$0xff] }
  0x84   :  { %1528 = vmatpush2.bf16.msra.mxu1 %v4626_v42  ;;  %1628 = vmatprep.subr.bf16.mxu0 %v4658_v54  ;;  %v143_v42 = vld [vmem:[#allocation6 + $0x60] sm:$0xff]  ;;  %v4667_v54 = vld [vmem:[#allocation7 + $0x44c] ss:$36 sps:$4 sm:$0xff]  }
  0x85   :  { %1529 = vmatprep.subr.bf16.mxu1 %v4631_v50  ;;  %v4662_v50 = vld [vmem:[#allocation7 + $0x10] ss:$36 sps:$4 sm:$0xff]  }
  0x86   :  { %1318 = vmatmul.mubr.bf16.gmra.mxu0 %v5106_v49  ;;  %4188 = vmatmul.mubr.msk.bf16.gmra.mxu1 %vm1222_vm1, %v5110_v52 }
  0x87   :  { %1327 = vmatprep.mubr.bf16.mxu0 %v5108_v51  ;;  %1629 = vmatpush1.bf16.msra.mxu0 %v4656_v53  ;;  %v5150_v53 = vpack.c.bf16 %v146_v45, %v143_v42  ;;  %v4704_v42 = vld [vmem:[#allocation7 + $0x138] ss:$36 sps:$4 sm:$0xff]   ;;  %v4707_v45 = vld [vmem:[#allocation7 + $0xf0] ss:$36 sps:$4 sm:$0xff]  }
  0x88   :  { %1530 = vmatpush2.bf16.msra.mxu1 %v4629_v56  ;;  %1533 = vmatprep.mubr.bf16.mxu1 %v5077_v63  ;;  %v5152_v56 = vpack.c.bf16 %v153_v48, %v150_v47  ;;  %v4710_v47 = vld [vmem:[#allocation7 + $0xa8] ss:$36 sps:$4 sm:$0xff]  }
  0x89   :  { %1531 = vmatprep.subr.bf16.mxu1 %v4634_v58  ;;  %4198 = vmatprep.subr.msk.bf16.mxu0 %vm1247_vm0, %v4674_v8  ;;  %v149_v58 = vld [vmem:[#allocation6 + $0x90] sm:$0xff]  ;;  %v4718_v48 = vld [vmem:[#allocation7 + $0x64] ss:$36 sps:$4 sm:$0xff]  }
  0x8a   :  { %6996 = vst [vmem:[#allocation13_spill] sm:$0xff] %v5152_v56  ;;  %v4677_v8 = vld [vmem:[#allocation7 + $0x370] ss:$36 sps:$4 sm:$0xff]  }
  0x8c   :  { %1532 = vmatpush2.bf16.msra.mxu1 %v4632_v62  ;;  %v5158_v62 = vpack.c.bf16 %v152_v60, %v149_v58  ;;  %v4724_v58 = vld [vmem:[#allocation7 + $0x454] ss:$36 sps:$4 sm:$0xff]   ;;  %v4727_v60 = vld [vmem:[#allocation7 + $0x40c] ss:$36 sps:$4 sm:$0xff]  }
  0x8d   :  { %1727 = vmatprep.subr.bf16.mxu1 %v4640_v2  ;;  %v4673_v2 = vld [vmem:[#allocation7 + $0x3bc] ss:$36 sps:$4 sm:$0xff]  }
  0x8e   :  { %1328 = vmatmul.mubr.bf16.gmra.mxu0 %v5117_v1 }
  0x8f   :  { %1337 = vmatprep.mubr.bf16.mxu0 %v5119_v3  ;;  %1534 = vmatmul.mubr.bf16.vlgmr.msra.gmra.mxu1 %v5093_v31 }
  0x90   :  { %1728 = vmatpush1.bf16.msra.mxu1 %v4638_v5  ;;  %1543 = vmatprep.mubr.bf16.mxu1 %v5095_v34  ;;  %v4676_v5 = vld [vmem:[#allocation7 + $0x520] ss:$36 sps:$4 sm:$0x3f]  }
  0x91   :  { %1729 = vmatprep.subr.bf16.mxu1 %v4643_v7  ;;  %v4679_v7 = vld [vmem:[#allocation7 + $0x374] ss:$36 sps:$4 sm:$0xff]   ;;  %v1261_v9 = vsel %vm1247_vm0, %v4676_v5, 0  ;;  %v4736_v5 = vld [vmem:[#allocation7 + $0x37c] ss:$36 sps:$4 sm:$0xff]  }
  0x94   :  { %1730 = vmatpush1.bf16.msra.mxu1 %v4641_v12  ;;  %v4694_v12 = vld [vmem:[#allocation7 + $0x4dc] ss:$36 sps:$4 sm:$0xff]  }
  0x95   :  { %1731 = vmatprep.subr.bf16.mxu1 %v4646_v14  ;;  %v4685_v14 = vld [vmem:[#allocation7 + $0x2e4] ss:$36 sps:$4 sm:$0xff]  }
  0x96   :  { %1338 = vmatmul.mubr.bf16.gmra.mxu0 %v5126_v13 }
  0x97   :  { %1347 = vmatprep.mubr.bf16.mxu0 %v5128_v15  ;;  %1544 = vmatmul.mubr.bf16.gmra.mxu1 %v5106_v49 }
  0x98   :  { %1732 = vmatpush1.bf16.msra.mxu1 %v4644_v18  ;;  %1553 = vmatprep.mubr.bf16.mxu1 %v5108_v51  ;;  %v4715_v18 = vld [vmem:[#allocation7 + $0x494] ss:$36 sps:$4 sm:$0xff]  }
  0x99   :  { %1733 = vmatprep.subr.bf16.mxu1 %v4649_v20  ;;  %v4688_v20 = vld [vmem:[#allocation7 + $0x29c] ss:$36 sps:$4 sm:$0xff]  }
  0x9c   :  { %1734 = vmatpush1.bf16.msra.mxu1 %v4647_v24  ;;  %v4731_v24 = vld [vmem:[#allocation7 + $0x52c] ss:$36 sps:$4 sm:$0x3f]  }
  0x9d   :  { %1735 = vmatprep.subr.bf16.mxu1 %v4652_v26  ;;  %v4691_v26 = vld [vmem:[#allocation7 + $0x254] ss:$36 sps:$4 sm:$0xff]  }
  0x9e   :  { %1348 = vmatmul.mubr.bf16.gmra.mxu0 %v5134_v25 }
  0x9f   :  { %1357 = vmatprep.mubr.bf16.mxu0 %v5136_v27  ;;  %1554 = vmatmul.mubr.bf16.gmra.mxu1 %v5117_v1 }
  0xa0   :  { %1736 = vmatpush1.bf16.msra.mxu1 %v4650_v29  ;;  %1563 = vmatprep.mubr.bf16.mxu1 %v5119_v3  ;;  %v4697_v29 = vld [vmem:[#allocation7 + $0x214] ss:$36 sps:$4 sm:$0xff]  }
  0xa1   :  { %1737 = vmatprep.subr.bf16.mxu1 %v4655_v32  ;;  %v4700_v32 = vld [vmem:[#allocation7 + $0x1cc] ss:$36 sps:$4 sm:$0xff]  }
  0xa4   :  { %1738 = vmatpush1.bf16.msra.mxu1 %v4653_v38  ;;  %v4701_v38 = vld [vmem:[#allocation7 + $0x180] ss:$36 sps:$4 sm:$0xff]  }
  0xa5   :  { %1739 = vmatprep.subr.bf16.mxu1 %v4661_v40  ;;  %v4706_v40 = vld [vmem:[#allocation7 + $0x13c] ss:$36 sps:$4 sm:$0xff]  }
  0xa6   :  { %1358 = vmatmul.mubr.bf16.gmra.mxu0 %v5142_v39 }
  0xa7   :  { %1367 = vmatprep.mubr.bf16.mxu0 %v5144_v41  ;;  %1564 = vmatmul.mubr.bf16.gmra.mxu1 %v5126_v13 }
  0xa8   :  { %1740 = vmatpush1.bf16.msra.mxu1 %v4659_v43  ;;  %1573 = vmatprep.mubr.bf16.mxu1 %v5128_v15  ;;  %v4709_v43 = vld [vmem:[#allocation7 + $0xf4] ss:$36 sps:$4 sm:$0xff]  }
  0xa9   :  { %1741 = vmatprep.subr.bf16.mxu1 %v4664_v46  ;;  %v4712_v46 = vld [vmem:[#allocation7 + $0xac] ss:$36 sps:$4 sm:$0xff]  }
  0xac   :  { %1742 = vmatpush1.bf16.msra.mxu1 %v4662_v50  ;;  %v4716_v50 = vld [vmem:[#allocation7 + $0x60] ss:$36 sps:$4 sm:$0xff]  }
  0xad   :  { %1743 = vmatprep.subr.bf16.mxu1 %v4667_v54  ;;  %v4721_v54 = vld [vmem:[#allocation7 + $0x1c] ss:$36 sps:$4 sm:$0xff]  }
  0xae   :  { %1368 = vmatmul.mubr.bf16.gmra.mxu0 %v5150_v53 }
  0xaf   :  { %1377 = vmatprep.mubr.bf16.mxu0 %v5152_v56  ;;  %1574 = vmatmul.mubr.bf16.gmra.mxu1 %v5134_v25 }
  0xb0   :  { %1744 = vmatpush2.bf16.msra.mxu1 %v4665_v57  ;;  %1583 = vmatprep.mubr.bf16.mxu1 %v5136_v27  ;;  %v4719_v57 = vld [vmem:[#allocation7 + $0x18] ss:$36 sps:$4 sm:$0xff]  }
  0xb1   :  { %1745 = vmatprep.subr.bf16.mxu1 %v4670_v59  ;;  %v4722_v59 = vld [vmem:[#allocation7 + $0x450] ss:$36 sps:$4 sm:$0xff]  }
  0xb4   :  { %1746 = vmatpush2.bf16.msra.mxu1 %v4668_v61  ;;  %v4725_v61 = vld [vmem:[#allocation7 + $0x408] ss:$36 sps:$4 sm:$0xff]  }
  0xb5   :  { %1747 = vmatprep.subr.bf16.mxu1 %v4673_v2  ;;  %v4730_v2 = vld [vmem:[#allocation7 + $0x3c4] ss:$36 sps:$4 sm:$0xff]  }
  0xb6   :  { %1378 = vmatmul.mubr.bf16.gmra.mxu0 %v5158_v62 }
  0xb7   :  { %1646 = vmatprep.mubr.bf16.mxu0 %v6937_v0  ;;  %1584 = vmatmul.mubr.bf16.gmra.mxu1 %v5142_v39 }
  0xb8   :  { %1748 = vmatpush2.bf16.msra.mxu1 %v4671_v4  ;;  %1593 = vmatprep.mubr.bf16.mxu1 %v5144_v41  ;;  %v4728_v4 = vld [vmem:[#allocation7 + $0x3c0] ss:$36 sps:$4 sm:$0xff]  }
  0xb9   :  { %1749 = vmatprep.subr.bf16.mxu1 %v4679_v7  ;;  %v4733_v7 = vld [vmem:[#allocation7 + $0x528] ss:$36 sps:$4 sm:$0x3f]  }
  0xbc   :  { %1750 = vmatpush2.bf16.msra.mxu1 %v4677_v8  ;;  %v4734_v8 = vld [vmem:[#allocation7 + $0x378] ss:$36 sps:$4 sm:$0xff]  }
  0xbd   :  { %1751 = vmatprep.subr.bf16.mxu1 %v4682_v10  ;;  %v1267_v10 = vsel %vm1247_vm0, %v4733_v7, 0 }
  0xbe   :  { %4190 = vmatmul.mubr.msk.bf16.vlgmr.msra.gmra.mxu0 %vm1222_vm1, %v5060_v22 }
  0xbf   :  { %1851 = vmatpush1.bf16.msra.mxu0 %v1261_v9  ;;  %1656 = vmatprep.mubr.bf16.mxu0 %v6937_v0  ;;  %v4739_v9 = vld [vmem:[#allocation7 + $0x334] ss:$36 sps:$4 sm:$0xff]  }
  0xc0   :  { %1594 = vmatmul.mubr.bf16.gmra.mxu1 %v5150_v53  ;;  %1852 = vmatprep.subr.bf16.mxu0 %v4694_v12  ;;  %v4737_v12 = vld [vmem:[#allocation7 + $0x330] ss:$36 sps:$4 sm:$0xff]  }
  0xc1   :  { %1752 = vmatpush2.bf16.msra.mxu1 %v4680_v11  ;;  %1603 = vmatprep.mubr.bf16.mxu1 %v5152_v56  ;;  %v4751_v11 = vld [vmem:[#allocation7 + $0x4e4] ss:$36 sps:$4 sm:$0xff]  }
  0xc2   :  { %1753 = vmatprep.subr.bf16.mxu1 %v4685_v14  ;;  %v4742_v14 = vld [vmem:[#allocation7 + $0x2ec] ss:$36 sps:$4 sm:$0xff]  }
  0xc3   :  { %1853 = vmatpush1.bf16.msra.mxu0 %v4692_v16  ;;  %v4749_v16 = vld [vmem:[#allocation7 + $0x4e0] ss:$36 sps:$4 sm:$0xff]  }
  0xc4   :  { %1854 = vmatprep.subr.bf16.mxu0 %v4715_v18  ;;  %v4758_v18 = vld [vmem:[#allocation7 + $0x49c] ss:$36 sps:$4 sm:$0xff]  }
  0xc5   :  { %1754 = vmatpush2.bf16.msra.mxu1 %v4683_v19  ;;  %v4740_v19 = vld [vmem:[#allocation7 + $0x2e8] ss:$36 sps:$4 sm:$0xff]  }
  0xc6   :  { %4191 = vmatmul.mubr.msk.bf16.gmra.mxu0 %vm1222_vm1, %v5065_v33  ;;  %1755 = vmatprep.subr.bf16.mxu1 %v4688_v20  ;;  %v4745_v20 = vld [vmem:[#allocation7 + $0x2a4] ss:$36 sps:$4 sm:$0xff]  }
  0xc7   :  { %1666 = vmatprep.mubr.bf16.mxu0 %v6937_v0  ;;  %1855 = vmatpush1.bf16.msra.mxu0 %v4713_v21  ;;  %v4756_v21 = vld [vmem:[#allocation7 + $0x498] ss:$36 sps:$4 sm:$0xff]  }
  0xc8   :  { %1604 = vmatmul.mubr.bf16.gmra.mxu1 %v5158_v62  ;;  %4207 = vmatprep.subr.msk.bf16.mxu0 %vm1247_vm0, %v4731_v24  ;;  %v4743_v24 = vld [vmem:[#allocation7 + $0x2a0] ss:$36 sps:$4 sm:$0xff]  }
  0xc9   :  { %1756 = vmatpush2.bf16.msra.mxu1 %v4686_v23  ;;  %1759 = vmatprep.mubr.bf16.mxu1 %v5077_v63  ;;  %v5212_v23 = vld [vmem:[#allocation7 + $0x530] ss:$36 sps:$4 sm:$0x3f]  }
  0xca   :  { %1757 = vmatprep.subr.bf16.mxu1 %v4691_v26  ;;  %v4748_v26 = vld [vmem:[#allocation7 + $0x25c] ss:$36 sps:$4 sm:$0xff]  }
  0xcd   :  { %1758 = vmatpush2.bf16.msra.mxu1 %v4689_v28  ;;  %v4746_v28 = vld [vmem:[#allocation7 + $0x258] ss:$36 sps:$4 sm:$0xff]  }
  0xce   :  { %4192 = vmatmul.mubr.msk.bf16.gmra.mxu0 %vm1222_vm1, %v5070_v44  ;;  %1953 = vmatprep.subr.bf16.mxu1 %v4697_v29  ;;  %v4752_v29 = vld [vmem:[#allocation7 + $0x458] ss:$36 sps:$4 sm:$0xff]  }
  0xcf   :  { %1676 = vmatprep.mubr.bf16.mxu0 %v6937_v0 }
  0xd0   :  { %1760 = vmatmul.mubr.bf16.vlgmr.msra.gmra.mxu1 %v5093_v31 }
  0xd1   :  { %1954 = vmatpush1.bf16.msra.mxu1 %v4695_v30  ;;  %1769 = vmatprep.mubr.bf16.mxu1 %v5095_v34  ;;  %v4753_v30 = vld [vmem:[#allocation7 + $0x218] ss:$36 sps:$4 sm:$0xff]  }
  0xd2   :  { %1955 = vmatprep.subr.bf16.mxu1 %v4700_v32  ;;  %v4754_v32 = vld [vmem:[#allocation7 + $0x410] ss:$36 sps:$4 sm:$0xff]  }
  0xd5   :  { %1956 = vmatpush1.bf16.msra.mxu1 %v4698_v35 }
  0xd6   :  { %4193 = vmatmul.mubr.msk.bf16.gmra.mxu0 %vm1222_vm1, %v5075_v55  ;;  %1957 = vmatprep.subr.bf16.mxu1 %v4703_v37  ;;  %v4755_v37 = vld [vmem:[#allocation7 + $0x1d0] ss:$36 sps:$4 sm:$0xff]  }
  0xd7   :  { %1686 = vmatprep.mubr.bf16.mxu0 %v6937_v0 }
  0xd8   :  { %1770 = vmatmul.mubr.bf16.gmra.mxu1 %v5106_v49 }
  0xd9   :  { %1958 = vmatpush1.bf16.msra.mxu1 %v4701_v38  ;;  %1779 = vmatprep.mubr.bf16.mxu1 %v5108_v51 }
  0xda   :  { %1959 = vmatprep.subr.bf16.mxu1 %v4706_v40  ;;  %v4759_v40 = vld [vmem:[#allocation7 + $0x3c8] ss:$36 sps:$4 sm:$0xff]  }
  0xdd   :  { %1960 = vmatpush1.bf16.msra.mxu1 %v4704_v42 }
  0xde   :  { %4194 = vmatmul.mubr.msk.bf16.gmra.mxu0 %vm1222_vm1, %v5083_v6  ;;  %1961 = vmatprep.subr.bf16.mxu1 %v4709_v43  ;;  %v4760_v43 = vld [vmem:[#allocation7 + $0x188] ss:$36 sps:$4 sm:$0xff]  }
  0xdf   :  { %1696 = vmatprep.mubr.bf16.mxu0 %v6937_v0 }
  0xe0   :  { %1780 = vmatmul.mubr.bf16.gmra.mxu1 %v5117_v1 }
  0xe1   :  { %1962 = vmatpush1.bf16.msra.mxu1 %v4707_v45  ;;  %1789 = vmatprep.mubr.bf16.mxu1 %v5119_v3 }
  0xe2   :  { %1963 = vmatprep.subr.bf16.mxu1 %v4712_v46  ;;  %v4761_v46 = vld [vmem:[#allocation7 + $0x380] ss:$36 sps:$4 sm:$0xff]  }
  0xe5   :  { %1964 = vmatpush1.bf16.msra.mxu1 %v4710_v47 }
  0xe6   :  { %4195 = vmatmul.mubr.msk.bf16.gmra.mxu0 %vm1222_vm1, %v5088_v17  ;;  %1965 = vmatprep.subr.bf16.mxu1 %v4718_v48  ;;  %v4762_v48 = vld [vmem:[#allocation7 + $0x140] ss:$36 sps:$4 sm:$0xff]  }
  0xe7   :  { %1706 = vmatprep.mubr.bf16.mxu0 %v6937_v0 }
  0xe8   :  { %1790 = vmatmul.mubr.bf16.gmra.mxu1 %v5126_v13 }
  0xe9   :  { %1966 = vmatpush1.bf16.msra.mxu1 %v4716_v50  ;;  %1799 = vmatprep.mubr.bf16.mxu1 %v5128_v15 }
  0xea   :  { %1967 = vmatprep.subr.bf16.mxu1 %v4721_v54  ;;  %v4763_v54 = vld [vmem:[#allocation7 + $0x338] ss:$36 sps:$4 sm:$0xff]  }
  0xed   :  { %1968 = vmatpush1.bf16.msra.mxu1 %v4719_v57 }
  0xee   :  { %4196 = vmatmul.mubr.msk.bf16.gmra.mxu0 %vm1222_vm1, %v5099_v36  ;;  %1969 = vmatprep.subr.bf16.mxu1 %v4724_v58  ;;  %v4764_v58 = vld [vmem:[#allocation7 + $0xf8] ss:$36 sps:$4 sm:$0xff]  }
  0xef   :  { %1716 = vmatprep.mubr.bf16.mxu0 %v6937_v0 }
  0xf0   :  { %1800 = vmatmul.mubr.bf16.gmra.mxu1 %v5134_v25 }
  0xf1   :  { %1970 = vmatpush2.bf16.msra.mxu1 %v4722_v59  ;;  %1809 = vmatprep.mubr.bf16.mxu1 %v5136_v27 }
  0xf2   :  { %1971 = vmatprep.subr.bf16.mxu1 %v4727_v60  ;;  %v4766_v60 = vld [vmem:[#allocation7 + $0x2f0] ss:$36 sps:$4 sm:$0xff]  }
  0xf5   :  { %1972 = vmatpush2.bf16.msra.mxu1 %v4725_v61 }
  0xf6   :  { %4197 = vmatmul.mubr.msk.bf16.gmra.mxu0 %vm1222_vm1, %v5110_v52  ;;  %1973 = vmatprep.subr.bf16.mxu1 %v4730_v2  ;;  %v4767_v2 = vld [vmem:[#allocation7 + $0xb0] ss:$36 sps:$4 sm:$0xff]  }
  0xf7   :  { %1872 = vmatprep.mubr.bf16.mxu0 %v6937_v0 }
  0xf8   :  { %1810 = vmatmul.mubr.bf16.gmra.mxu1 %v5142_v39 }
  0xf9   :  { %1974 = vmatpush2.bf16.msra.mxu1 %v4728_v4  ;;  %1819 = vmatprep.mubr.bf16.mxu1 %v5144_v41 }
  0xfa   :  { %1975 = vmatprep.subr.bf16.mxu1 %v4736_v5  ;;  %v4768_v5 = vld [vmem:[#allocation7 + $0x2a8] ss:$36 sps:$4 sm:$0xff]  }
  0xfd   :  { %1976 = vmatpush2.bf16.msra.mxu1 %v4734_v8  ;;  %v4769_v8 = vld [vmem:[#allocation7 + $0x68] ss:$36 sps:$4 sm:$0xff]  }
  0xfe   :  { %4199 = vmatmul.mubr.msk.bf16.vlgmr.msra.gmra.mxu0 %vm1222_vm1, %v5060_v22  ;;  %1977 = vmatprep.subr.bf16.mxu1 %v4739_v9 }
  0xff   :  { %2077 = vmatpush1.bf16.msra.mxu0 %v1267_v10  ;;  %1882 = vmatprep.mubr.bf16.mxu0 %v6937_v0  ;;  %v4770_v10 = vld [vmem:[#allocation7 + $0x260] ss:$36 sps:$4 sm:$0xff]  }
 0x100   :  { %1820 = vmatmul.mubr.bf16.gmra.mxu1 %v5150_v53  ;;  %2078 = vmatprep.subr.bf16.mxu0 %v4751_v11 }
 0x101   :  { %1978 = vmatpush2.bf16.msra.mxu1 %v4737_v12  ;;  %1829 = vmatprep.mubr.bf16.mxu1 %v5152_v56  ;;  %v4771_v12 = vld [vmem:[#allocation7 + $0x20] ss:$36 sps:$4 sm:$0xff]  }
 0x102   :  { %1979 = vmatprep.subr.bf16.mxu1 %v4742_v14 }
 0x103   :  { %2079 = vmatpush1.bf16.msra.mxu0 %v4749_v16 }
 0x104   :  { %2080 = vmatprep.subr.bf16.mxu0 %v4758_v18 }
 0x105   :  { %1980 = vmatpush2.bf16.msra.mxu1 %v4740_v19 }
 0x106   :  { %4200 = vmatmul.mubr.msk.bf16.gmra.mxu0 %vm1222_vm1, %v5065_v33  ;;  %1981 = vmatprep.subr.bf16.mxu1 %v4745_v20 }
 0x107   :  { %1892 = vmatprep.mubr.bf16.mxu0 %v6937_v0  ;;  %2081 = vmatpush1.bf16.msra.mxu0 %v4756_v21 }
 0x108   :  { %1830 = vmatmul.mubr.bf16.gmra.mxu1 %v5158_v62  ;;  %4509 = vmatprep.subr.msk.bf16.mxu0 %vm1247_vm0, %v5212_v23 }
 0x109   :  { %1982 = vmatpush2.bf16.msra.mxu1 %v4743_v24  ;;  %1985 = vmatprep.mubr.bf16.mxu1 %v5077_v63 }
 0x10a   :  { %1983 = vmatprep.subr.bf16.mxu1 %v4748_v26 }
 0x10d   :  { %1984 = vmatpush2.bf16.msra.mxu1 %v4746_v28 }
 0x10e   :  { %4201 = vmatmul.mubr.msk.bf16.gmra.mxu0 %vm1222_vm1, %v5070_v44  ;;  %4332 = vmatprep.subr.bf16.mxu1 %v4752_v29  ;;  %v5224_v35 = vpop.f32.mrf.mxu1  ;;  %v1273_v29 = vsel %vm1247_vm0, %v5212_v23, 0  ;;  %v4773_v23 = vld [vmem:[#allocation7 + $0x4a0] ss:$36 sps:$4 sm:$0xff]  }
 0x10f   :  { %1902 = vmatprep.mubr.bf16.mxu0 %v6937_v0 }
 0x110   :  { %1986 = vmatmul.mubr.bf16.vlgmr.msra.gmra.mxu1 %v5093_v31  ;;  %v5228_v38 = vpop.f32.mrf.mxu1 }
 0x111   :  { %1995 = vmatprep.mubr.bf16.mxu1 %v5095_v34  ;;  %4333 = vmatpush3.bf16.msra.mxu1 %v4753_v30 }
 0x112   :  { %4334 = vmatprep.subr.bf16.mxu1 %v4754_v32  ;;  %v5230_v42 = vpop.f32.mrf.mxu1  ;;  %v4772_v32 = vld [vmem:[#allocation7 + $0x4e8] ss:$36 sps:$4 sm:$0xff]  }
 0x114   :  { %v5234_v45 = vpop.f32.mrf.mxu1 }
 0x115   :  { %4335 = vmatpush3.bf16.msra.mxu1 %v4755_v37 }
 0x116   :  { %4202 = vmatmul.mubr.msk.bf16.gmra.mxu0 %vm1222_vm1, %v5075_v55  ;;  %4336 = vmatprep.subr.bf16.mxu1 %v4759_v40  ;;  %v5237_v47 = vpop.f32.mrf.mxu1  ;;  %v6934_v40 = vlaneseq }
 0x117   :  { %1912 = vmatprep.mubr.bf16.mxu0 %v6937_v0 }
 0x118   :  { %1996 = vmatmul.mubr.bf16.gmra.mxu1 %v5106_v49  ;;  %v5241_v50 = vpop.f32.mrf.mxu1 }
 0x119   :  { %2005 = vmatprep.mubr.bf16.mxu1 %v5108_v51  ;;  %4337 = vmatpush3.bf16.msra.mxu1 %v4760_v43 }
 0x11a   :  { %4338 = vmatprep.subr.bf16.mxu1 %v4761_v46  ;;  %v5243_v57 = vpop.f32.mrf.mxu1 }
 0x11c   :  { %v5247_v59 = vpop.f32.mrf.mxu1 }
 0x11d   :  { %4339 = vmatpush3.bf16.msra.mxu1 %v4762_v48 }
 0x11e   :  { %4203 = vmatmul.mubr.msk.bf16.gmra.mxu0 %vm1222_vm1, %v5083_v6  ;;  %4340 = vmatprep.subr.bf16.mxu1 %v4763_v54  ;;  %v5250_v61 = vpop.f32.mrf.mxu1 }
 0x11f   :  { %1922 = vmatprep.mubr.bf16.mxu0 %v6937_v0 }
 0x120   :  { %2006 = vmatmul.mubr.bf16.gmra.mxu1 %v5117_v1  ;;  %v5254_v4 = vpop.f32.mrf.mxu1 }
 0x121   :  { %2015 = vmatprep.mubr.bf16.mxu1 %v5119_v3  ;;  %4341 = vmatpush3.bf16.msra.mxu1 %v4764_v58 }
 0x122   :  { %4342 = vmatprep.subr.bf16.mxu1 %v4766_v60  ;;  %v5256_v7 = vpop.f32.mrf.mxu1 }
 0x124   :  { %v5260_v9 = vpop.f32.mrf.mxu1 }
 0x125   :  { %4343 = vmatpush3.bf16.msra.mxu1 %v4767_v2  ;;  %v5315_v2 = vshrl.u32 %v6934_v40, 7 }
 0x126   :  { %4204 = vmatmul.mubr.msk.bf16.gmra.mxu0 %vm1222_vm1, %v5088_v17  ;;  %4344 = vmatprep.subr.bf16.mxu1 %v4768_v5  ;;  %v5263_v11 = vpop.f32.mrf.mxu1 }
 0x127   :  { %1932 = vmatprep.mubr.bf16.mxu0 %v6937_v0  ;;  %vm2726_vm2 = vcmp.lt.s32.totalorder %v5315_v2, 1 }
 0x128   :  { %2016 = vmatmul.mubr.bf16.gmra.mxu1 %v5126_v13  ;;  %v5267_v14 = vpop.f32.mrf.mxu1 }
 0x129   :  { %2025 = vmatprep.mubr.bf16.mxu1 %v5128_v15  ;;  %4345 = vmatpush3.bf16.msra.mxu1 %v4769_v8 }
 0x12a   :  { %4346 = vmatprep.subr.bf16.mxu1 %v4770_v10  ;;  %v5269_v16 = vpop.f32.mrf.mxu1 }
 0x12c   :  { %v5273_v18 = vpop.f32.mrf.mxu1 }
 0x12d   :  { %4347 = vmatpush3.bf16.msra.mxu1 %v4771_v12 }
 0x12e   :  { %4205 = vmatmul.mubr.msk.bf16.gmra.mxu0 %vm1222_vm1, %v5099_v36  ;;  %v5276_v19 = vpop.f32.mrf.mxu1 }
 0x12f   :  { %1942 = vmatprep.mubr.bf16.mxu0 %v6937_v0 }
 0x130   :  { %2026 = vmatmul.mubr.bf16.gmra.mxu1 %v5134_v25  ;;  %v5280_v20 = vpop.f32.mrf.mxu1 }
 0x131   :  { %2035 = vmatprep.mubr.bf16.mxu1 %v5136_v27 }
 0x132   :  { %v5282_v21 = vpop.f32.mrf.mxu1 }
 0x134   :  { %v5286_v24 = vpop.f32.mrf.mxu1 }
 0x136   :  { %4206 = vmatmul.mubr.msk.bf16.gmra.mxu0 %vm1222_vm1, %v5110_v52  ;;  %v5289_v26 = vpop.f32.mrf.mxu1 }
 0x137   :  { %2098 = vmatprep.mubr.bf16.mxu0 %v6937_v0 }
 0x138   :  { %2036 = vmatmul.mubr.bf16.gmra.mxu1 %v5142_v39  ;;  %v5293_v28 = vpop.f32.mrf.mxu1 }
 0x139   :  { %2045 = vmatprep.mubr.bf16.mxu1 %v5144_v41 }
 0x13a   :  { %v5297_v30 = vpop.f32.mrf.mxu1 }
 0x13c   :  { %v5301_v43 = vpop.f32.mrf.mxu1 }
 0x13e   :  { %v1309_v37 = vpop.f32.mrf.mxu0  ;;  %4208 = vmatmul.mubr.msk.bf16.vlgmr.msra.gmra.mxu0 %vm1222_vm1, %v5060_v22  ;;  %v5307_v54 = vpop.f32.mrf.mxu1 }
 0x13f   :  { %v5304_v46 = vadd.f32 %v5224_v35, %v1309_v37  ;;  %4448 = vmatpush3.bf16.msra.mxu0 %v1273_v29  ;;  %2108 = vmatprep.mubr.bf16.mxu0 %v6937_v0 }
 0x140   :  { %v1311_v48 = vpop.f32.mrf.mxu0  ;;  %2046 = vmatmul.mubr.bf16.gmra.mxu1 %v5150_v53  ;;  %4449 = vmatprep.subr.bf16.mxu0 %v4772_v32  ;;  %v5317_v35 = vpop.f32.mrf.mxu1 }
 0x141   :  { %v5311_v58 = vadd.f32 %v5228_v38, %v1311_v48  ;;  %2055 = vmatprep.mubr.bf16.mxu1 %v5152_v56  ;;  %v6936_v38 = vrot.slane %v5304_v46, 7 }
 0x142   :  { %v1313_v60 = vpop.f32.mrf.mxu0  ;;  %v5321_v10 = vpop.f32.mrf.mxu1 }
 0x143   :  { %v1427_v5 = vadd.f32 %v5230_v42, %v1313_v60  ;;  %4450 = vmatpush3.bf16.msra.mxu0 %v4772_v32 }
 0x144   :  { %v1315_v8 = vpop.f32.mrf.mxu0  ;;  %4451 = vmatprep.subr.bf16.mxu0 %v4773_v23  ;;  %v5327_v48 = vpop.f32.mrf.mxu1 }
 0x145   :  { %v2681_v12 = vrot.slane %v1427_v5, 7  ;;  %v1429_v29 = vadd.f32 %v5234_v45, %v1315_v8  ;;  %v6939_v8 = vmov 0.0  }
 0x146   :  { %v1319_v37 = vpop.f32.mrf.mxu0  ;;  %4209 = vmatmul.mubr.msk.bf16.gmra.mxu0 %vm1222_vm1, %v5065_v33  ;;  %v5338_v5 = vpop.f32.mrf.mxu1 }
 0x147   :  { %v5334_v32 = vsel %vm2726_vm2, %v6936_v38, %v2681_v12  ;;  %v2682_v60 = vrot.slane %v1429_v29, 7  ;;  %v1433_v40 = vadd.f32 %v5237_v47, %v1319_v37  ;;  %2118 = vmatprep.mubr.bf16.mxu0 %v6937_v0  ;;  %4452 = vmatpush3.bf16.msra.mxu0 %v4773_v23  ;;  %v6997_v29 = vrot.slane %v5311_v58, 7 }
 0x148   :  { %v1321_v45 = vpop.f32.mrf.mxu0  ;;  %2056 = vmatmul.mubr.bf16.gmra.mxu1 %v5158_v62  ;;  %4469 = vmatprep.subr.bf16.mxu0 %v6939_v8  ;;  %v5350_v37 = vpop.f32.mrf.mxu1 }
 0x149   :  { %v2684_v42 = vrot.slane %v1433_v40, 7  ;;  %v1435_v56 = vadd.f32 %v5241_v50, %v1321_v45  ;;  %2211 = vmatprep.mubr.bf16.mxu1 %v5077_v63  ;;  %v5348_v47 = vsel %vm2726_vm2, %v6997_v29, %v2682_v60 }
 0x14a   :  { %6998 = vst [vmem:[#allocation14_spill] sm:$0xff] %v5348_v47  ;;  %v1323_v23 = vpop.f32.mrf.mxu0  ;;  %v5357_v50 = vpop.f32.mrf.mxu1 }
 0x14b   :  { %v2685_v38 = vrot.slane %v1435_v56, 7  ;;  %v1437_v0 = vadd.f32 %v5243_v57, %v1323_v23  ;;  %v5355_v8 = vsel %vm2726_vm2, %v2681_v12, %v2684_v42 }
 0x14c   :  { %6999 = vst [vmem:[#allocation15_spill] sm:$0xff] %v5355_v8  ;;  %v1325_v40 = vpop.f32.mrf.mxu0  ;;  %v5366_v56 = vpop.f32.mrf.mxu1 }
 0x14d   :  { %v2687_v63 = vrot.slane %v1437_v0, 7  ;;  %v1439_v45 = vadd.f32 %v5247_v59, %v1325_v40  ;;  %v5362_v29 = vsel %vm2726_vm2, %v2682_v60, %v2685_v38  ;;  %v7002_v0 = vmov 0  }
 0x14e   :  { %7000 = vst [vmem:[#allocation16_spill] sm:$0xff] %v5362_v29  ;;  %v1329_v47 = vpop.f32.mrf.mxu0  ;;  %4210 = vmatmul.mubr.msk.bf16.gmra.mxu0 %vm1222_vm1, %v5070_v44 }
 0x14f   :  { %v5370_v57 = vsel %vm2726_vm2, %v2684_v42, %v2687_v63  ;;  %v2688_v12 = vrot.slane %v1439_v45, 7  ;;  %v1443_v23 = vadd.f32 %v5250_v61, %v1329_v47  ;;  %2128 = vmatprep.mubr.bf16.mxu0 %v7002_v0  ;;  %v5374_v40 = vpop.f32.mrf.mxu1 }
 0x150   :  { %7001 = vst [vmem:[#allocation17_spill] sm:$0xff] %v5370_v57  ;;  %v1331_v59 = vpop.f32.mrf.mxu0  ;;  %2212 = vmatmul.mubr.bf16.vlgmr.msra.gmra.mxu1 %v5093_v31 }
 0x151   :  { %v2690_v60 = vrot.slane %v1443_v23, 7  ;;  %v1445_v29 = vadd.f32 %v5254_v4, %v1331_v59  ;;  %2219 = vmatprep.mubr.bf16.mxu1 %v5095_v34  ;;  %v5381_v8 = vsel %vm2726_vm2, %v2685_v38, %v2688_v12  ;;  %v5383_v45 = vpop.f32.mrf.mxu1 }
 0x152   :  { %7003 = vst [vmem:[#allocation18_spill] sm:$0xff] %v5381_v8  ;;  %v1333_v42 = vpop.f32.mrf.mxu0 }
 0x153   :  { %v2691_v61 = vrot.slane %v1445_v29, 7  ;;  %v1447_v47 = vadd.f32 %v5256_v7, %v1333_v42  ;;  %v5388_v57 = vsel %vm2726_vm2, %v2687_v63, %v2690_v60  ;;  %v5390_v23 = vpop.f32.mrf.mxu1 }
 0x154   :  { %v1335_v31 = vpop.f32.mrf.mxu0 }
 0x155   :  { %v2693_v4 = vrot.slane %v1447_v47, 7  ;;  %v1449_v34 = vadd.f32 %v5260_v9, %v1335_v31  ;;  %v5395_v38 = vsel %vm2726_vm2, %v2688_v12, %v2691_v61  ;;  %v5399_v29 = vpop.f32.mrf.mxu1 }
 0x156   :  { %7004 = vst [vmem:[#allocation19_spill] sm:$0xff] %v5395_v38  ;;  %v1339_v59 = vpop.f32.mrf.mxu0  ;;  %4211 = vmatmul.mubr.msk.bf16.gmra.mxu0 %vm1222_vm1, %v5075_v55 }
 0x157   :  { %v5403_v7 = vsel %vm2726_vm2, %v2690_v60, %v2693_v4  ;;  %v2694_v63 = vrot.slane %v1449_v34, 7  ;;  %v1453_v42 = vadd.f32 %v5263_v11, %v1339_v59  ;;  %2138 = vmatprep.mubr.bf16.mxu0 %v7002_v0  ;;  %v5407_v47 = vpop.f32.mrf.mxu1 }
 0x158   :  { %v1341_v9 = vpop.f32.mrf.mxu0  ;;  %2220 = vmatmul.mubr.bf16.gmra.mxu1 %v5106_v49 }
 0x159   :  { %v2696_v12 = vrot.slane %v1453_v42, 7  ;;  %v1455_v31 = vadd.f32 %v5267_v14, %v1341_v9  ;;  %2227 = vmatprep.mubr.bf16.mxu1 %v5108_v51  ;;  %v5414_v38 = vsel %vm2726_vm2, %v2691_v61, %v2694_v63  ;;  %v5416_v34 = vpop.f32.mrf.mxu1 }
 0x15a   :  { %7005 = vst [vmem:[#allocation20_spill] sm:$0xff] %v5414_v38  ;;  %v1343_v60 = vpop.f32.mrf.mxu0 }
 0x15b   :  { %v2697_v11 = vrot.slane %v1455_v31, 7  ;;  %v1457_v59 = vadd.f32 %v5269_v16, %v1343_v60  ;;  %v5421_v8 = vsel %vm2726_vm2, %v2693_v4, %v2696_v12  ;;  %v5423_v42 = vpop.f32.mrf.mxu1 }
 0x15c   :  { %v1345_v49 = vpop.f32.mrf.mxu0 }
 0x15d   :  { %v2699_v14 = vrot.slane %v1457_v59, 7  ;;  %v1459_v51 = vadd.f32 %v5273_v18, %v1345_v49  ;;  %v5428_v61 = vsel %vm2726_vm2, %v2694_v63, %v2697_v11  ;;  %v5432_v31 = vpop.f32.mrf.mxu1 }
 0x15e   :  { %7006 = vst [vmem:[#allocation21_spill] sm:$0xff] %v5428_v61  ;;  %v1349_v9 = vpop.f32.mrf.mxu0  ;;  %4212 = vmatmul.mubr.msk.bf16.gmra.mxu0 %vm1222_vm1, %v5083_v6 }
 0x15f   :  { %v2700_v16 = vrot.slane %v1459_v51, 7  ;;  %v1463_v4 = vadd.f32 %v5276_v19, %v1349_v9  ;;  %2148 = vmatprep.mubr.bf16.mxu0 %v7002_v0  ;;  %v5438_v60 = vsel %vm2726_vm2, %v2696_v12, %v2699_v14  ;;  %v5440_v59 = vpop.f32.mrf.mxu1 }
 0x160   :  { %v1351_v18 = vpop.f32.mrf.mxu0  ;;  %2228 = vmatmul.mubr.bf16.gmra.mxu1 %v5117_v1 }
 0x161   :  { %v2702_v63 = vrot.slane %v1463_v4, 7  ;;  %v1465_v49 = vadd.f32 %v5280_v20, %v1351_v18  ;;  %2235 = vmatprep.mubr.bf16.mxu1 %v5119_v3  ;;  %v5447_v51 = vsel %vm2726_vm2, %v2697_v11, %v2700_v16  ;;  %v5449_v9 = vpop.f32.mrf.mxu1 }
 0x162   :  { %7007 = vst [vmem:[#allocation22_spill] sm:$0xff] %v5447_v51  ;;  %v1353_v19 = vpop.f32.mrf.mxu0 }
 0x163   :  { %v2703_v61 = vrot.slane %v1465_v49, 7  ;;  %v1467_v12 = vadd.f32 %v5282_v21, %v1353_v19  ;;  %v5454_v38 = vsel %vm2726_vm2, %v2699_v14, %v2702_v63  ;;  %v5456_v4 = vpop.f32.mrf.mxu1 }
 0x164   :  { %v1355_v1 = vpop.f32.mrf.mxu0 }
 0x165   :  { %v2705_v20 = vrot.slane %v1467_v12, 7  ;;  %v1469_v3 = vadd.f32 %v5286_v24, %v1355_v1  ;;  %v5461_v11 = vsel %vm2726_vm2, %v2700_v16, %v2703_v61  ;;  %v5465_v49 = vpop.f32.mrf.mxu1 }
 0x166   :  { %7008 = vst [vmem:[#allocation23_spill] sm:$0xff] %v5461_v11  ;;  %v1359_v18 = vpop.f32.mrf.mxu0  ;;  %4213 = vmatmul.mubr.msk.bf16.gmra.mxu0 %vm1222_vm1, %v5088_v17 }
 0x167   :  { %v2706_v21 = vrot.slane %v1469_v3, 7  ;;  %v1473_v14 = vadd.f32 %v5289_v26, %v1359_v18  ;;  %2158 = vmatprep.mubr.bf16.mxu0 %v7002_v0  ;;  %v5471_v19 = vsel %vm2726_vm2, %v2702_v63, %v2705_v20  ;;  %v5473_v12 = vpop.f32.mrf.mxu1 }
 0x168   :  { %v1361_v24 = vpop.f32.mrf.mxu0  ;;  %2236 = vmatmul.mubr.bf16.gmra.mxu1 %v5126_v13 }
 0x169   :  { %v2708_v16 = vrot.slane %v1473_v14, 7  ;;  %v1475_v1 = vadd.f32 %v5293_v28, %v1361_v24  ;;  %2243 = vmatprep.mubr.bf16.mxu1 %v5128_v15  ;;  %v5480_v3 = vsel %vm2726_vm2, %v2703_v61, %v2706_v21  ;;  %v5482_v18 = vpop.f32.mrf.mxu1 }
 0x16a   :  { %7009 = vst [vmem:[#allocation24_spill] sm:$0xff] %v5480_v3  ;;  %v1363_v26 = vpop.f32.mrf.mxu0 }
 0x16b   :  { %v2709_v11 = vrot.slane %v1475_v1, 7  ;;  %v1477_v63 = vadd.f32 %v5297_v30, %v1363_v26  ;;  %v5487_v51 = vsel %vm2726_vm2, %v2705_v20, %v2708_v16  ;;  %v5489_v14 = vpop.f32.mrf.mxu1 }
 0x16c   :  { %v1365_v13 = vpop.f32.mrf.mxu0 }
 0x16d   :  { %v2711_v28 = vrot.slane %v1477_v63, 7  ;;  %v1479_v15 = vadd.f32 %v5301_v43, %v1365_v13  ;;  %v5494_v61 = vsel %vm2726_vm2, %v2706_v21, %v2709_v11  ;;  %v5498_v1 = vpop.f32.mrf.mxu1 }
 0x16e   :  { %7010 = vst [vmem:[#allocation25_spill] sm:$0xff] %v5494_v61  ;;  %v1369_v24 = vpop.f32.mrf.mxu0  ;;  %4214 = vmatmul.mubr.msk.bf16.gmra.mxu0 %vm1222_vm1, %v5099_v36 }
 0x16f   :  { %v2712_v30 = vrot.slane %v1479_v15, 7  ;;  %v1483_v20 = vadd.f32 %v5307_v54, %v1369_v24  ;;  %2168 = vmatprep.mubr.bf16.mxu0 %v7002_v0  ;;  %v5504_v26 = vsel %vm2726_vm2, %v2708_v16, %v2711_v28  ;;  %v5506_v63 = vpop.f32.mrf.mxu1 }
 0x170   :  { %v1371_v43 = vpop.f32.mrf.mxu0  ;;  %2244 = vmatmul.mubr.bf16.gmra.mxu1 %v5134_v25 }
 0x171   :  { %v2714_v21 = vrot.slane %v1483_v20, 7  ;;  %v1485_v13 = vadd.f32 %v5317_v35, %v1371_v43  ;;  %2251 = vmatprep.mubr.bf16.mxu1 %v5136_v27  ;;  %v5513_v15 = vsel %vm2726_vm2, %v2709_v11, %v2712_v30  ;;  %v5515_v24 = vpop.f32.mrf.mxu1 }
 0x172   :  { %7011 = vst [vmem:[#allocation26_spill] sm:$0xff] %v5513_v15  ;;  %v1373_v54 = vpop.f32.mrf.mxu0  ;;  %v5559_v15 = vadd.s32 16, %v5315_v2 }
 0x173   :  { %v2715_v61 = vrot.slane %v1485_v13, 7  ;;  %v1487_v16 = vadd.f32 %v5321_v10, %v1373_v54  ;;  %v5520_v3 = vsel %vm2726_vm2, %v2711_v28, %v2714_v21  ;;  %v5522_v20 = vpop.f32.mrf.mxu1  ;;  %v5535_v28 = vadd.s32 8, %v5315_v2 }
 0x174   :  { %v1375_v25 = vpop.f32.mrf.mxu0  ;;  %7017 = vst [vmem:[#allocation31_spill] sm:$0xff] %v5559_v15 }
 0x175   :  { %v2717_v35 = vrot.slane %v1487_v16, 7  ;;  %v1489_v27 = vadd.f32 %v5327_v48, %v1375_v25  ;;  %v5527_v11 = vsel %vm2726_vm2, %v2712_v30, %v2715_v61  ;;  %v5531_v13 = vpop.f32.mrf.mxu1  ;;  %7013 = vst [vmem:[#allocation28_spill] sm:$0xff] %v5535_v28 }
 0x176   :  { %7012 = vst [vmem:[#allocation27_spill] sm:$0xff] %v5527_v11  ;;  %v1379_v43 = vpop.f32.mrf.mxu0  ;;  %4215 = vmatmul.mubr.msk.bf16.gmra.mxu0 %vm1222_vm1, %v5110_v52 }
 0x177   :  { %v2718_v54 = vrot.slane %v1489_v27, 7  ;;  %v1493_v16 = vadd.f32 %v5338_v5, %v1379_v43  ;;  %4453 = vmatprep.mubr.msk.bf16.mxu0 %vm1222_vm1, %v5060_v22  ;;  %v5542_v48 = vsel %vm2726_vm2, %v2714_v21, %v2717_v35  ;;  %v5544_v25 = vpop.f32.mrf.mxu1  ;;  %v7016_v21 = vand.u32 7, %v5315_v2 }
 0x178   :  { %7014 = vst [vmem:[#allocation29_spill] sm:$0xff] %v5542_v48  ;;  %v1381_v30 = vpop.f32.mrf.mxu0  ;;  %2252 = vmatmul.mubr.bf16.gmra.mxu1 %v5142_v39  ;;  %v7019_v48 = vmov 0.0  }
 0x179   :  { %v2720_v11 = vrot.slane %v1493_v16, 7  ;;  %v1495_v10 = vadd.f32 %v5350_v37, %v1381_v30  ;;  %2259 = vmatprep.mubr.bf16.mxu1 %v5144_v41  ;;  %v5551_v5 = vsel %vm2726_vm2, %v2715_v61, %v2718_v54  ;;  %v5553_v22 = vpop.f32.mrf.mxu1  ;;  %vm2582_vm3 = vcmp.ne.s32.totalorder %v7016_v21, 0 }
 0x17a   :  { %7015 = vst [vmem:[#allocation30_spill] sm:$0xff] %v5551_v5  ;;  %v1383_v27 = vpop.f32.mrf.mxu0  ;;  %v5570_v21 = vsel %vm2582_vm3, 1.0, %v7019_v48 }
 0x17b   :  { %v2721_v39 = vrot.slane %v1495_v10, 7  ;;  %v1497_v37 = vadd.f32 %v5357_v50, %v1383_v27  ;;  %v5564_v41 = vsel %vm2726_vm2, %v2717_v35, %v2720_v11  ;;  %v5566_v16 = vpop.f32.mrf.mxu1  ;;  %v7021_v35 = vand.u32 7, %v5535_v28 }
 0x17c   :  { %7018 = vst [vmem:[#allocation32_spill] sm:$0xff] %v5564_v41  ;;  %v1385_v61 = vpop.f32.mrf.mxu0 }
 0x17d   :  { %v2723_v30 = vrot.slane %v1497_v37, 7  ;;  %v1499_v5 = vadd.f32 %v5366_v56, %v1385_v61  ;;  %v5574_v43 = vsel %vm2726_vm2, %v2718_v54, %v2721_v39  ;;  %v5578_v50 = vpop.f32.mrf.mxu1  ;;  %vm5582_vm4 = vcmp.ne.s32.totalorder %v7021_v35, 0 }
 0x17e   :  { %7020 = vst [vmem:[#allocation33_spill] sm:$0xff] %v5574_v43  ;;  %v1648_v10 = vpop.f32.mrf.mxu0  ;;  %4454 = vmatmul.mubr.msk.bf16.vlgmr.msra.gmra.mxu0 %vm1222_vm1, %v5065_v33  ;;  %v5588_v37 = vadd.s32 24, %v5315_v2  ;;  %v7025_v43 = vrot.slane %v5304_v46, 7  ;;  %v7026_v46 = vld [vmem:[#allocation13_spill] sm:$0xff] }
 0x17f   :  { %v2724_v61 = vrot.slane %v1499_v5, 7  ;;  %v5591_v54 = vadd.f32 %v1648_v10, %v5374_v40  ;;  %4457 = vmatprep.mubr.msk.bf16.mxu0 %vm1222_vm1, %v5070_v44  ;;  %v5601_v35 = vsel %vm2726_vm2, %v2720_v11, %v2723_v30  ;;  %v7027_v5 = vrot.slane %v5311_v58, 7 }
 0x180   :  { %7024 = vst [vmem:[#allocation34_spill] sm:$0xff] %v5588_v37  ;;  %v2772_v33 = vsel %vm2726_vm2, %v2723_v30, %v7025_v43  ;;  %v1650_v56 = vpop.f32.mrf.mxu0  ;;  %v5604_v41 = vpop.f32.mrf.mxu1  ;;  %2260 = vmatmul.mubr.bf16.gmra.mxu1 %v5150_v53  ;;  %v5622_v30 = vsel %vm5582_vm4, 1.0, %v7019_v48 }
 0x181   :  { %v2872_v28 = vmul.f32 %v5570_v21, %v2772_v33  ;;  %v1651_v40 = vadd.f32 %v1650_v56, %v5383_v45  ;;  %2267 = vmatprep.mubr.bf16.mxu1 %v7026_v46  ;;  %v5613_v44 = vsel %vm2726_vm2, %v2724_v61, %v7027_v5  ;;  %v5617_v11 = vsel %vm2726_vm2, %v2721_v39, %v2724_v61 }
 0x182   :  { %7028 = vst [vmem:[#allocation13_spill] sm:$0xff] %v5617_v11  ;;  %v1652_v43 = vpop.f32.mrf.mxu0  ;;  %v5624_v53 = vpop.f32.mrf.mxu1  ;;  %v5627_v45 = vadd.s32 32, %v5315_v2  ;;  %v7031_v56 = vand.u32 7, %v5559_v15  ;;  %v6943_v39 = vand.u32 7, %v5588_v37  ;;  %v6944_v27 = vrot.slane %v5591_v54, 7 }
 0x183   :  { %v5629_v58 = vadd.f32 %v2872_v28, %v1651_v40  ;;  %v1653_v10 = vadd.f32 %v1652_v43, %v5390_v23  ;;  %v2875_v11 = vmul.f32 %v5622_v30, %v5334_v32 }
 0x184   :  { %7029 = vst [vmem:[#allocation35_spill] sm:$0xff] %v5627_v45  ;;  %vm2584_vm5 = vcmp.ne.s32.totalorder %v7031_v56, 0  ;;  %v1654_v61 = vpop.f32.mrf.mxu0  ;;  %v5635_v33 = vpop.f32.mrf.mxu1  ;;  %v5650_v56 = vadd.s32 40, %v5315_v2  ;;  %vm2585_vm6 = vcmp.ne.s32.totalorder %v6943_v39, 0 }
 0x185   :  { %7030 = vst [vmem:[#allocation36_spill] sm:$0xff] %v5629_v58  ;;  %v2683_v46 = vrot.slane %v1653_v10, 7  ;;  %v1655_v5 = vadd.f32 %v1654_v61, %v5399_v29  ;;  %v5644_v23 = vsel %vm2584_vm5, 1.0, %v7019_v48  ;;  %v5673_v39 = vsel %vm2585_vm6, 1.0, %v7019_v48 }
 0x186   :  { %v1658_v28 = vpop.f32.mrf.mxu0  ;;  %4458 = vmatmul.mubr.msk.bf16.gmra.mxu0 %vm1222_vm1, %v5075_v55  ;;  %v5646_v40 = vpop.f32.mrf.mxu1  ;;  %7032 = vst [vmem:[#allocation37_spill] sm:$0xff] %v5650_v56  ;;  %vm2823_vm6 = vcmp.lt.s32.totalorder %v5315_v2, 7 }
 0x187   :  { %v5652_v10 = vadd.f32 %v2875_v11, %v1655_v5  ;;  %v1659_v29 = vadd.f32 %v1658_v28, %v5407_v47  ;;  %4461 = vmatprep.mubr.msk.bf16.mxu0 %vm1222_vm1, %v5083_v6  ;;  %v5663_v55 = vsel %vm2726_vm2, %v6944_v27, %v2683_v46  ;;  %v7034_v5 = vld [vmem:[#allocation15_spill] sm:$0xff]  ;;  %v7035_v27 = vand.u32 7, %v5627_v45 }
 0x188   :  { %v1660_v32 = vpop.f32.mrf.mxu0  ;;  %v5665_v61 = vpop.f32.mrf.mxu1  ;;  %2268 = vmatmul.mubr.bf16.gmra.mxu1 %v5158_v62  ;;  %v2878_v28 = vmul.f32 %v5644_v23, %v7034_v5 }
 0x189   :  { %7033 = vst [vmem:[#allocation38_spill] sm:$0xff] %v5652_v10  ;;  %v2686_v11 = vrot.slane %v1659_v29, 7  ;;  %v1661_v47 = vadd.f32 %v1660_v32, %v5416_v34  ;;  %3258 = vmatprep.mubr.bf16.mxu1 %v7002_v0  ;;  %vm2586_vm7 = vcmp.ne.s32.totalorder %v7035_v27, 0  ;;  %v5684_v29 = vadd.s32 48, %v5315_v2  ;;  %v7038_v27 = vld [vmem:[#allocation17_spill] sm:$0xff] }
 0x18a   :  { %v1662_v6 = vpop.f32.mrf.mxu0  ;;  %v5675_v43 = vpop.f32.mrf.mxu1  ;;  %v2881_v10 = vmul.f32 %v5673_v39, %v7038_v27 }
 0x18b   :  { %v5680_v62 = vadd.f32 %v2878_v28, %v1661_v47  ;;  %v1663_v34 = vadd.f32 %v1662_v6, %v5423_v42  ;;  %7037 = vst [vmem:[#allocation39_spill] sm:$0xff] %v5684_v29  ;;  %v5688_v32 = vsel %vm2726_vm2, %v2683_v46, %v2686_v11  ;;  %v5698_v42 = vsel %vm2586_vm7, 1.0, %v7019_v48 }
 0x18c   :  { %v1664_v5 = vpop.f32.mrf.mxu0  ;;  %v5690_v0 = vpop.f32.mrf.mxu1  ;;  %v7039_v46 = vand.u32 7, %v5650_v56  ;;  %v5705_v6 = vadd.s32 56, %v5315_v2 }
 0x18d   :  { %7036 = vst [vmem:[#allocation15_spill] sm:$0xff] %v5680_v62  ;;  %v2689_v58 = vrot.slane %v1663_v34, 7  ;;  %v1665_v45 = vadd.f32 %v1664_v5, %v5432_v31 }
 0x18e   :  { %v1668_v47 = vpop.f32.mrf.mxu0  ;;  %4462 = vmatmul.mubr.msk.bf16.gmra.mxu0 %vm1222_vm1, %v5088_v17  ;;  %v5700_v28 = vpop.f32.mrf.mxu1  ;;  %vm2587_vm8 = vcmp.ne.s32.totalorder %v7039_v46, 0  ;;  %7040 = vst [vmem:[#allocation17_spill] sm:$0xff] %v5705_v6 }
 0x18f   :  { %v5707_v34 = vadd.f32 %v2881_v10, %v1665_v45  ;;  %v1669_v31 = vadd.f32 %v1668_v47, %v5440_v59  ;;  %4465 = vmatprep.mubr.msk.bf16.mxu0 %vm1222_vm1, %v5099_v36  ;;  %v5715_v5 = vsel %vm2726_vm2, %v2686_v11, %v2689_v58  ;;  %v2884_v45 = vmul.f32 %v5698_v42, %v5388_v57 }
 0x190   :  { %v1670_v27 = vpop.f32.mrf.mxu0  ;;  %v5717_v62 = vpop.f32.mrf.mxu1  ;;  %v5723_v59 = vsel %vm2587_vm8, 1.0, %v7019_v48  ;;  %v5729_v11 = vadd.s32 64, %v5315_v2 }
 0x191   :  { %7041 = vst [vmem:[#allocation40_spill] sm:$0xff] %v5707_v34  ;;  %v2692_v46 = vrot.slane %v1669_v31, 7  ;;  %v1671_v56 = vadd.f32 %v1670_v27, %v5449_v9  ;;  %v7044_v9 = vand.u32 7, %v5684_v29  ;;  %v2887_v15 = vmul.f32 %v5723_v59, %v5403_v7 }
 0x192   :  { %v1672_v10 = vpop.f32.mrf.mxu0  ;;  %v5725_v36 = vpop.f32.mrf.mxu1  ;;  %7042 = vst [vmem:[#allocation41_spill] sm:$0xff] %v5729_v11  ;;  %v5759_v7 = vadd.s32 72, %v5315_v2 }
 0x193   :  { %v5731_v17 = vadd.f32 %v2884_v45, %v1671_v56  ;;  %v1673_v31 = vadd.f32 %v1672_v10, %v5456_v4  ;;  %vm2588_vm9 = vcmp.ne.s32.totalorder %v7044_v9, 0  ;;  %v5738_v57 = vsel %vm2726_vm2, %v2689_v58, %v2692_v46 }
 0x194   :  { %v1674_v27 = vpop.f32.mrf.mxu0  ;;  %v5740_v34 = vpop.f32.mrf.mxu1  ;;  %v5748_v4 = vsel %vm2588_vm9, 1.0, %v7019_v48  ;;  %v7046_v45 = vand.u32 7, %v5705_v6  ;;  %7048 = vst [vmem:[#allocation45_spill] sm:$0xff] %v5759_v7 }
 0x195   :  { %7043 = vst [vmem:[#allocation42_spill] sm:$0xff] %v5731_v17  ;;  %v2695_v37 = vrot.slane %v1673_v31, 7  ;;  %v1675_v47 = vadd.f32 %v1674_v27, %v5465_v49  ;;  %7045 = vst [vmem:[#allocation43_spill] sm:$0xff] %v5748_v4  ;;  %v2890_v10 = vmul.f32 %v5748_v4, %v5421_v8 }
 0x196   :  { %v1678_v56 = vpop.f32.mrf.mxu0  ;;  %4466 = vmatmul.mubr.msk.bf16.gmra.mxu0 %vm1222_vm1, %v5110_v52  ;;  %vm2589_vm10 = vcmp.ne.s32.totalorder %v7046_v45, 0  ;;  %v5752_v58 = vpop.f32.mrf.mxu1 }
 0x197   :  { %v5755_v31 = vadd.f32 %v2887_v15, %v1675_v47  ;;  %v1679_v49 = vadd.f32 %v1678_v56, %v5473_v12  ;;  %v5763_v52 = vsel %vm2726_vm2, %v2692_v46, %v2695_v37  ;;  %v5771_v47 = vsel %vm2589_vm10, 1.0, %v7019_v48 }
 0x198   :  { %v1680_v9 = vpop.f32.mrf.mxu0  ;;  %v5765_v27 = vpop.f32.mrf.mxu1  ;;  %7049 = vst [vmem:[#allocation46_spill] sm:$0xff] %v5771_v47  ;;  %v7050_v12 = vand.u32 7, %v5729_v11  ;;  %v5778_v46 = vadd.s32 80, %v5315_v2  ;;  %v2893_v29 = vmul.f32 %v5771_v47, %v5438_v60 }
 0x199   :  { %7047 = vst [vmem:[#allocation44_spill] sm:$0xff] %v5755_v31  ;;  %v2698_v17 = vrot.slane %v1679_v49, 7  ;;  %v1681_v45 = vadd.f32 %v1680_v9, %v5482_v18  ;;  %v6957_v18 = vand.u32 7, %v5759_v7 }
 0x19a   :  { %v1682_v15 = vpop.f32.mrf.mxu0  ;;  %vm2590_vm11 = vcmp.ne.s32.totalorder %v7050_v12, 0  ;;  %v5775_v56 = vpop.f32.mrf.mxu1  ;;  %7051 = vst [vmem:[#allocation47_spill] sm:$0xff] %v5778_v46 }
 0x19b   :  { %v5780_v31 = vadd.f32 %v2890_v10, %v1681_v45  ;;  %v1683_v49 = vadd.f32 %v1682_v15, %v5489_v14  ;;  %v5786_v8 = vsel %vm2726_vm2, %v2695_v37, %v2698_v17  ;;  %v5794_v10 = vsel %vm2590_vm11, 1.0, %v7019_v48 }
 0x19c   :  { %v1684_v9 = vpop.f32.mrf.mxu0  ;;  %v5788_v6 = vpop.f32.mrf.mxu1  ;;  %v5800_v37 = vadd.s32 88, %v5315_v2  ;;  %vm2591_vm12 = vcmp.ne.s32.totalorder %v6957_v18, 0  ;;  %v2896_v47 = vmul.f32 %v5794_v10, %v5454_v38 }
 0x19d   :  { %7052 = vst [vmem:[#allocation48_spill] sm:$0xff] %v5780_v31  ;;  %v2701_v11 = vrot.slane %v1683_v49, 7  ;;  %v1685_v12 = vadd.f32 %v1684_v9, %v5498_v1 }
 0x19e   :  { %v1688_v4 = vpop.f32.mrf.mxu0  ;;  %v5796_v14 = vpop.f32.mrf.mxu1  ;;  %7053 = vst [vmem:[#allocation49_spill] sm:$0xff] %v5800_v37 }
 0x19f   :  { %v5802_v15 = vadd.f32 %v2893_v29, %v1685_v12  ;;  %v1689_v49 = vadd.f32 %v1688_v4, %v5506_v63  ;;  %v5809_v60 = vsel %vm2726_vm2, %v2698_v17, %v2701_v11  ;;  %v5817_v12 = vsel %vm2591_vm12, 1.0, %v7019_v48 }
 0x1a0   :  { %v1690_v1 = vpop.f32.mrf.mxu0  ;;  %v5811_v9 = vpop.f32.mrf.mxu1  ;;  %7055 = vst [vmem:[#allocation51_spill] sm:$0xff] %v5817_v12  ;;  %v7056_v63 = vand.u32 7, %v5778_v46  ;;  %v2899_v17 = vmul.f32 %v5817_v12, %v5471_v19 }
 0x1a1   :  { %7054 = vst [vmem:[#allocation50_spill] sm:$0xff] %v5802_v15  ;;  %v2704_v31 = vrot.slane %v1689_v49, 7  ;;  %v1691_v45 = vadd.f32 %v1690_v1, %v5515_v24  ;;  %v5828_v24 = vadd.s32 96, %v5315_v2 }
 0x1a2   :  { %v1692_v29 = vpop.f32.mrf.mxu0  ;;  %vm2592_vm13 = vcmp.ne.s32.totalorder %v7056_v63, 0  ;;  %v5821_v4 = vpop.f32.mrf.mxu1 }
 0x1a3   :  { %v5824_v18 = vadd.f32 %v2896_v47, %v1691_v45  ;;  %v1693_v49 = vadd.f32 %v1692_v29, %v5522_v20  ;;  %7058 = vst [vmem:[#allocation53_spill] sm:$0xff] %v5828_v24  ;;  %v5832_v38 = vsel %vm2726_vm2, %v2701_v11, %v2704_v31  ;;  %v5840_v45 = vsel %vm2592_vm13, 1.0, %v7019_v48 }
 0x1a4   :  { %7059 = vst [vmem:[#allocation54_spill] sm:$0xff] %v5832_v38  ;;  %v1694_v1 = vpop.f32.mrf.mxu0  ;;  %v5834_v15 = vpop.f32.mrf.mxu1  ;;  %7060 = vst [vmem:[#allocation55_spill] sm:$0xff] %v5840_v45  ;;  %v7061_v20 = vand.u32 7, %v5800_v37  ;;  %v5847_v11 = vadd.s32 104, %v5315_v2  ;;  %v2902_v12 = vmul.f32 %v5840_v45, %v5487_v51 }
 0x1a5   :  { %7057 = vst [vmem:[#allocation52_spill] sm:$0xff] %v5824_v18  ;;  %v2707_v46 = vrot.slane %v1693_v49, 7  ;;  %v1695_v63 = vadd.f32 %v1694_v1, %v5531_v13  ;;  %v6965_v13 = vand.u32 7, %v5828_v24 }
 0x1a6   :  { %v1698_v47 = vpop.f32.mrf.mxu0  ;;  %vm2593_vm14 = vcmp.ne.s32.totalorder %v7061_v20, 0  ;;  %v5844_v29 = vpop.f32.mrf.mxu1  ;;  %7062 = vst [vmem:[#allocation56_spill] sm:$0xff] %v5847_v11 }
 0x1a7   :  { %v5849_v18 = vadd.f32 %v2899_v17, %v1695_v63  ;;  %v1699_v49 = vadd.f32 %v1698_v47, %v5544_v25  ;;  %v5855_v19 = vsel %vm2726_vm2, %v2704_v31, %v2707_v46  ;;  %v5863_v17 = vsel %vm2593_vm14, 1.0, %v7019_v48 }
 0x1a8   :  { %v1700_v1 = vpop.f32.mrf.mxu0  ;;  %v5857_v7 = vpop.f32.mrf.mxu1  ;;  %v5869_v31 = vadd.s32 112, %v5315_v2  ;;  %vm2594_vm15 = vcmp.ne.s32.totalorder %v6965_v13, 0  ;;  %v2905_v45 = vmul.f32 %v5863_v17, %v5504_v26 }
 0x1a9   :  { %7063 = vst [vmem:[#allocation57_spill] sm:$0xff] %v5849_v18  ;;  %v2710_v37 = vrot.slane %v1699_v49, 7  ;;  %v1701_v20 = vadd.f32 %v1700_v1, %v5553_v22 }
 0x1aa   :  { %v1702_v38 = vpop.f32.mrf.mxu0  ;;  %v5865_v25 = vpop.f32.mrf.mxu1  ;;  %7064 = vst [vmem:[#allocation58_spill] sm:$0xff] %v5869_v31 }
 0x1ab   :  { %v5871_v47 = vadd.f32 %v2902_v12, %v1701_v20  ;;  %v1703_v49 = vadd.f32 %v1702_v38, %v5566_v16  ;;  %v5878_v51 = vsel %vm2726_vm2, %v2707_v46, %v2710_v37  ;;  %v5886_v20 = vsel %vm2594_vm15, 1.0, %v7019_v48 }
 0x1ac   :  { %v1704_v22 = vpop.f32.mrf.mxu0  ;;  %v5880_v1 = vpop.f32.mrf.mxu1  ;;  %7066 = vst [vmem:[#allocation60_spill] sm:$0xff] %v5886_v20  ;;  %v7067_v16 = vand.u32 7, %v5847_v11  ;;  %v2908_v46 = vmul.f32 %v5886_v20, %v5520_v3 }
 0x1ad   :  { %7065 = vst [vmem:[#allocation59_spill] sm:$0xff] %v5871_v47  ;;  %v2713_v18 = vrot.slane %v1703_v49, 7  ;;  %v1705_v63 = vadd.f32 %v1704_v22, %v5578_v50  ;;  %v5897_v50 = vadd.s32 120, %v5315_v2 }
 0x1ae   :  { %v1708_v12 = vpop.f32.mrf.mxu0  ;;  %vm2595_vm0 = vcmp.ne.s32.totalorder %v7067_v16, 0  ;;  %v5890_v38 = vpop.f32.mrf.mxu1 }
 0x1af   :  { %v5893_v13 = vadd.f32 %v2905_v45, %v1705_v63  ;;  %v1709_v49 = vadd.f32 %v1708_v12, %v5604_v41  ;;  %7069 = vst [vmem:[#allocation62_spill] sm:$0xff] %v5897_v50  ;;  %v5901_v26 = vsel %vm2726_vm2, %v2710_v37, %v2713_v18  ;;  %v5909_v63 = vsel %vm2595_vm0, 1.0, %v7019_v48 }
 0x1b0   :  { %7070 = vst [vmem:[#allocation63_spill] sm:$0xff] %v5901_v26  ;;  %v1710_v22 = vpop.f32.mrf.mxu0  ;;  %v5903_v47 = vpop.f32.mrf.mxu1  ;;  %7071 = vst [vmem:[#allocation64_spill] sm:$0xff] %v5909_v63  ;;  %v7072_v41 = vand.u32 7, %v5869_v31  ;;  %v7074_v31 = vld [vmem:[#allocation29_spill] sm:$0xff] }
 0x1b1   :  { %7068 = vst [vmem:[#allocation61_spill] sm:$0xff] %v5893_v13  ;;  %v2716_v11 = vrot.slane %v1709_v49, 7  ;;  %v1711_v16 = vadd.f32 %v1710_v22, %v5624_v53  ;;  %v6973_v49 = vand.u32 7, %v5897_v50 }
 0x1b2   :  { %v1712_v45 = vpop.f32.mrf.mxu0  ;;  %vm2596_vm1 = vcmp.ne.s32.totalorder %v7072_v41, 0  ;;  %v5913_v12 = vpop.f32.mrf.mxu1  ;;  %v2911_v41 = vmul.f32 %v5909_v63, %v7074_v31 }
 0x1b3   :  { %v5915_v37 = vadd.f32 %v2908_v46, %v1711_v16  ;;  %v1713_v13 = vadd.f32 %v1712_v45, %v5635_v33  ;;  %v5921_v53 = vsel %vm2726_vm2, %v2713_v18, %v2716_v11  ;;  %v5929_v46 = vsel %vm2596_vm1, 1.0, %v7019_v48 }
 0x1b4   :  { %v1714_v3 = vpop.f32.mrf.mxu0  ;;  %v5923_v22 = vpop.f32.mrf.mxu1  ;;  %vm2597_vm3 = vcmp.ne.s32.totalorder %v6973_v49, 0 }
 0x1b5   :  { %7073 = vst [vmem:[#allocation65_spill] sm:$0xff] %v5915_v37  ;;  %v2719_v24 = vrot.slane %v1713_v13, 7  ;;  %v1715_v20 = vadd.f32 %v1714_v3, %v5646_v40  ;;  %v7076_v37 = vld [vmem:[#allocation32_spill] sm:$0xff] }
 0x1b6   :  { %v1718_v26 = vpop.f32.mrf.mxu0  ;;  %v5931_v33 = vpop.f32.mrf.mxu1  ;;  %v2914_v63 = vmul.f32 %v5929_v46, %v7076_v37 }
 0x1b7   :  { %v5933_v16 = vadd.f32 %v2911_v41, %v1715_v20  ;;  %v1719_v18 = vadd.f32 %v1718_v26, %v5665_v61  ;;  %v5940_v13 = vsel %vm2726_vm2, %v2716_v11, %v2719_v24  ;;  %v5948_v41 = vsel %vm2597_vm3, 1.0, %v7019_v48 }
 0x1b8   :  { %v1720_v40 = vpop.f32.mrf.mxu0  ;;  %v5942_v45 = vpop.f32.mrf.mxu1 }
 0x1b9   :  { %7075 = vst [vmem:[#allocation29_spill] sm:$0xff] %v5933_v16  ;;  %v2722_v31 = vrot.slane %v1719_v18, 7  ;;  %v1721_v3 = vadd.f32 %v1720_v40, %v5675_v43  ;;  %v2917_v40 = vmul.f32 %v5948_v41, %v5601_v35 }
 0x1ba   :  { %v1722_v20 = vpop.f32.mrf.mxu0  ;;  %v5950_v61 = vpop.f32.mrf.mxu1 }
 0x1bb   :  { %v5952_v26 = vadd.f32 %v2914_v63, %v1721_v3  ;;  %v1723_v11 = vadd.f32 %v1722_v20, %v5690_v0  ;;  %v5957_v49 = vsel %vm2726_vm2, %v2719_v24, %v2722_v31  ;;  %v2873_v63 = vmul.f32 %v5570_v21, %v5613_v44 }
 0x1bc   :  { %v1724_v18 = vpop.f32.mrf.mxu0  ;;  %v5959_v16 = vpop.f32.mrf.mxu1  ;;  %v7079_v20 = vrot.slane %v5591_v54, 7 }
 0x1bd   :  { %7077 = vst [vmem:[#allocation32_spill] sm:$0xff] %v5952_v26  ;;  %v2725_v43 = vrot.slane %v1723_v11, 7  ;;  %v1725_v37 = vadd.f32 %v1724_v18, %v5700_v28 }
 0x1be   :  { %v1874_v50 = vpop.f32.mrf.mxu0  ;;  %v5966_v3 = vpop.f32.mrf.mxu1 }
 0x1bf   :  { %v5968_v0 = vadd.f32 %v2917_v40, %v1725_v37  ;;  %v1875_v24 = vadd.f32 %v1874_v50, %v5717_v62  ;;  %v2774_v11 = vsel %vm2726_vm2, %v2725_v43, %v7079_v20  ;;  %v5977_v28 = vsel %vm2726_vm2, %v2722_v31, %v2725_v43  ;;  %v7081_v20 = vld [vmem:[#allocation14_spill] sm:$0xff] }
 0x1c0   :  { %v1876_v35 = vpop.f32.mrf.mxu0  ;;  %v2874_v18 = vmul.f32 %v5570_v21, %v2774_v11  ;;  %v5980_v26 = vpop.f32.mrf.mxu1  ;;  %v2876_v31 = vmul.f32 %v5622_v30, %v7081_v20 }
 0x1c1   :  { %7078 = vst [vmem:[#allocation66_spill] sm:$0xff] %v5968_v0  ;;  %v5982_v44 = vadd.f32 %v2873_v63, %v1875_v24  ;;  %v1877_v37 = vadd.f32 %v1876_v35, %v5725_v36  ;;  %v2877_v36 = vmul.f32 %v5622_v30, %v5663_v55  ;;  %v2880_v30 = vmul.f32 %v5644_v23, %v5688_v32 }
 0x1c2   :  { %v1878_v40 = vpop.f32.mrf.mxu0  ;;  %v5985_v62 = vpop.f32.mrf.mxu1 }
 0x1c3   :  { %v5987_v54 = vadd.f32 %v2874_v18, %v1877_v37  ;;  %v1879_v50 = vadd.f32 %v1878_v40, %v5740_v34  ;;  %v7083_v18 = vld [vmem:[#allocation16_spill] sm:$0xff] }
 0x1c4   :  { %v1880_v43 = vpop.f32.mrf.mxu0  ;;  %v5992_v0 = vpop.f32.mrf.mxu1  ;;  %v2879_v37 = vmul.f32 %v5644_v23, %v7083_v18  ;;  %v2883_v23 = vmul.f32 %v5673_v39, %v5715_v5 }
 0x1c5   :  { %7080 = vst [vmem:[#allocation67_spill] sm:$0xff] %v5987_v54  ;;  %v5994_v21 = vadd.f32 %v2876_v31, %v1879_v50  ;;  %v1881_v63 = vadd.f32 %v1880_v43, %v5752_v58 }
 0x1c6   :  { %v1884_v24 = vpop.f32.mrf.mxu0  ;;  %v5999_v11 = vpop.f32.mrf.mxu1 }
 0x1c7   :  { %v6001_v35 = vadd.f32 %v2877_v36, %v1881_v63  ;;  %v1885_v34 = vadd.f32 %v1884_v24, %v5765_v27  ;;  %v7085_v63 = vld [vmem:[#allocation18_spill] sm:$0xff] }
 0x1c8   :  { %v1886_v40 = vpop.f32.mrf.mxu0  ;;  %v6006_v20 = vpop.f32.mrf.mxu1  ;;  %v2882_v36 = vmul.f32 %v5673_v39, %v7085_v63  ;;  %v2886_v39 = vmul.f32 %v5698_v42, %v5738_v57 }
 0x1c9   :  { %7082 = vst [vmem:[#allocation14_spill] sm:$0xff] %v6001_v35  ;;  %v6008_v50 = vadd.f32 %v2879_v37, %v1885_v34  ;;  %v1887_v58 = vadd.f32 %v1886_v40, %v5775_v56 }
 0x1ca   :  { %v1888_v55 = vpop.f32.mrf.mxu0  ;;  %v6013_v31 = vpop.f32.mrf.mxu1 }
 0x1cb   :  { %v6015_v43 = vadd.f32 %v2880_v30, %v1887_v58  ;;  %v1889_v27 = vadd.f32 %v1888_v55, %v5788_v6  ;;  %v7087_v58 = vld [vmem:[#allocation19_spill] sm:$0xff] }
 0x1cc   :  { %v1890_v24 = vpop.f32.mrf.mxu0  ;;  %v6020_v18 = vpop.f32.mrf.mxu1  ;;  %v2885_v30 = vmul.f32 %v5698_v42, %v7087_v58  ;;  %v2889_v42 = vmul.f32 %v5723_v59, %v5763_v52 }
 0x1cd   :  { %7084 = vst [vmem:[#allocation16_spill] sm:$0xff] %v6015_v43  ;;  %v6022_v34 = vadd.f32 %v2882_v36, %v1889_v27  ;;  %v1891_v56 = vadd.f32 %v1890_v24, %v5796_v14  ;;  %v7163_v43 = vld [vmem:[#allocation47_spill] sm:$0xff] }
 0x1ce   :  { %v1894_v32 = vpop.f32.mrf.mxu0  ;;  %v6027_v37 = vpop.f32.mrf.mxu1 }
 0x1cf   :  { %v6029_v40 = vadd.f32 %v2883_v23, %v1891_v56  ;;  %v1895_v6 = vadd.f32 %v1894_v32, %v5811_v9  ;;  %v7089_v56 = vld [vmem:[#allocation20_spill] sm:$0xff] }
 0x1d0   :  { %v1896_v55 = vpop.f32.mrf.mxu0  ;;  %v6034_v63 = vpop.f32.mrf.mxu1  ;;  %v2888_v23 = vmul.f32 %v5723_v59, %v7089_v56 }
 0x1d1   :  { %7086 = vst [vmem:[#allocation18_spill] sm:$0xff] %v6029_v40  ;;  %v6036_v27 = vadd.f32 %v2885_v30, %v1895_v6  ;;  %v1897_v14 = vadd.f32 %v1896_v55, %v5821_v4  ;;  %v7136_v40 = vld [vmem:[#allocation35_spill] sm:$0xff] }
 0x1d2   :  { %v1898_v5 = vpop.f32.mrf.mxu0  ;;  %v6041_v36 = vpop.f32.mrf.mxu1 }
 0x1d3   :  { %v6043_v24 = vadd.f32 %v2886_v39, %v1897_v14  ;;  %v1899_v9 = vadd.f32 %v1898_v5, %v5834_v15  ;;  %v7091_v14 = vld [vmem:[#allocation21_spill] sm:$0xff]  ;;  %v7092_v39 = vld [vmem:[#allocation43_spill] sm:$0xff] }
 0x1d4   :  { %v1900_v32 = vpop.f32.mrf.mxu0  ;;  %v6048_v58 = vpop.f32.mrf.mxu1  ;;  %v2891_v5 = vmul.f32 %v7092_v39, %v7091_v14  ;;  %v2892_v59 = vmul.f32 %v7092_v39, %v5786_v8 }
 0x1d5   :  { %7088 = vst [vmem:[#allocation19_spill] sm:$0xff] %v6043_v24  ;;  %v6050_v6 = vadd.f32 %v2888_v23, %v1899_v9  ;;  %v1901_v4 = vadd.f32 %v1900_v32, %v5844_v29 }
 0x1d6   :  { %v1904_v57 = vpop.f32.mrf.mxu0  ;;  %v6055_v30 = vpop.f32.mrf.mxu1 }
 0x1d7   :  { %v6057_v55 = vadd.f32 %v2889_v42, %v1901_v4  ;;  %v1905_v15 = vadd.f32 %v1904_v57, %v5857_v7  ;;  %v7094_v4 = vld [vmem:[#allocation22_spill] sm:$0xff] }
 0x1d8   :  { %v1906_v56 = vpop.f32.mrf.mxu0  ;;  %v6062_v24 = vpop.f32.mrf.mxu1  ;;  %v7095_v42 = vld [vmem:[#allocation46_spill] sm:$0xff] }
 0x1d9   :  { %7090 = vst [vmem:[#allocation20_spill] sm:$0xff] %v6057_v55  ;;  %v6064_v9 = vadd.f32 %v2891_v5, %v1905_v15  ;;  %v1907_v29 = vadd.f32 %v1906_v56, %v5865_v25  ;;  %v2894_v57 = vmul.f32 %v7095_v42, %v7094_v4  ;;  %v2895_v8 = vmul.f32 %v7095_v42, %v5809_v60 }
 0x1da   :  { %v1908_v52 = vpop.f32.mrf.mxu0  ;;  %v6069_v23 = vpop.f32.mrf.mxu1 }
 0x1db   :  { %v6071_v32 = vadd.f32 %v2892_v59, %v1907_v29  ;;  %v1909_v7 = vadd.f32 %v1908_v52, %v5880_v1  ;;  %v7097_v29 = vld [vmem:[#allocation23_spill] sm:$0xff] }
 0x1dc   :  { %v1910_v14 = vpop.f32.mrf.mxu0  ;;  %v6076_v55 = vpop.f32.mrf.mxu1  ;;  %v2897_v59 = vmul.f32 %v5794_v10, %v7097_v29 }
 0x1dd   :  { %7093 = vst [vmem:[#allocation21_spill] sm:$0xff] %v6071_v32  ;;  %v6078_v15 = vadd.f32 %v2894_v57, %v1909_v7  ;;  %v1911_v25 = vadd.f32 %v1910_v14, %v5890_v38  ;;  %v7098_v57 = vld [vmem:[#allocation54_spill] sm:$0xff] }
 0x1de   :  { %v1914_v39 = vpop.f32.mrf.mxu0  ;;  %v6083_v5 = vpop.f32.mrf.mxu1  ;;  %v2898_v60 = vmul.f32 %v5794_v10, %v7098_v57  ;;  %v7104_v57 = vld [vmem:[#allocation25_spill] sm:$0xff] }
 0x1df   :  { %v6085_v56 = vadd.f32 %v2895_v8, %v1911_v25  ;;  %v1915_v1 = vadd.f32 %v1914_v39, %v5903_v47  ;;  %v7100_v8 = vld [vmem:[#allocation24_spill] sm:$0xff]  ;;  %v7101_v39 = vld [vmem:[#allocation51_spill] sm:$0xff] }
 0x1e0   :  { %v1916_v52 = vpop.f32.mrf.mxu0  ;;  %v6090_v4 = vpop.f32.mrf.mxu1  ;;  %v2900_v29 = vmul.f32 %v7101_v39, %v7100_v8  ;;  %v2901_v10 = vmul.f32 %v7101_v39, %v5855_v19 }
 0x1e1   :  { %7096 = vst [vmem:[#allocation43_spill] sm:$0xff] %v6085_v56  ;;  %v6092_v7 = vadd.f32 %v2897_v59, %v1915_v1  ;;  %v1917_v38 = vadd.f32 %v1916_v52, %v5913_v12 }
 0x1e2   :  { %v1918_v42 = vpop.f32.mrf.mxu0  ;;  %v6097_v14 = vpop.f32.mrf.mxu1 }
 0x1e3   :  { %v6099_v25 = vadd.f32 %v2898_v60, %v1917_v38  ;;  %v1919_v47 = vadd.f32 %v1918_v42, %v5923_v22  ;;  %v7105_v60 = vld [vmem:[#allocation55_spill] sm:$0xff] }
 0x1e4   :  { %v1920_v56 = vpop.f32.mrf.mxu0  ;;  %v6104_v32 = vpop.f32.mrf.mxu1  ;;  %v2903_v42 = vmul.f32 %v7105_v60, %v7104_v57  ;;  %v2904_v19 = vmul.f32 %v7105_v60, %v5878_v51 }
 0x1e5   :  { %7099 = vst [vmem:[#allocation22_spill] sm:$0xff] %v6099_v25  ;;  %v6106_v1 = vadd.f32 %v2900_v29, %v1919_v47  ;;  %v1921_v12 = vadd.f32 %v1920_v56, %v5931_v33 }
 0x1e6   :  { %v1924_v59 = vpop.f32.mrf.mxu0  ;;  %v6111_v52 = vpop.f32.mrf.mxu1 }
 0x1e7   :  { %7102 = vst [vmem:[#allocation46_spill] sm:$0xff] %v6106_v1  ;;  %v6113_v38 = vadd.f32 %v2901_v10, %v1921_v12  ;;  %v1925_v22 = vadd.f32 %v1924_v59, %v5942_v45  ;;  %v7108_v12 = vld [vmem:[#allocation26_spill] sm:$0xff] }
 0x1e8   :  { %v1926_v8 = vpop.f32.mrf.mxu0  ;;  %v6118_v25 = vpop.f32.mrf.mxu1  ;;  %v2906_v10 = vmul.f32 %v5863_v17, %v7108_v12 }
 0x1e9   :  { %7103 = vst [vmem:[#allocation23_spill] sm:$0xff] %v6113_v38  ;;  %v6120_v47 = vadd.f32 %v2903_v42, %v1925_v22  ;;  %v1927_v33 = vadd.f32 %v1926_v8, %v5950_v61  ;;  %v7110_v42 = vld [vmem:[#allocation63_spill] sm:$0xff] }
 0x1ea   :  { %v1928_v56 = vpop.f32.mrf.mxu0  ;;  %v6125_v39 = vpop.f32.mrf.mxu1  ;;  %v2907_v51 = vmul.f32 %v5863_v17, %v7110_v42  ;;  %v7116_v42 = vld [vmem:[#allocation30_spill] sm:$0xff] }
 0x1eb   :  { %7106 = vst [vmem:[#allocation54_spill] sm:$0xff] %v6120_v47  ;;  %v6127_v29 = vadd.f32 %v2904_v19, %v1927_v33  ;;  %v1929_v45 = vadd.f32 %v1928_v56, %v5959_v16  ;;  %v7112_v19 = vld [vmem:[#allocation27_spill] sm:$0xff]  ;;  %v7113_v56 = vld [vmem:[#allocation60_spill] sm:$0xff] }
 0x1ec   :  { %v1930_v59 = vpop.f32.mrf.mxu0  ;;  %v6132_v57 = vpop.f32.mrf.mxu1  ;;  %v2909_v12 = vmul.f32 %v7113_v56, %v7112_v19  ;;  %v2910_v17 = vmul.f32 %v7113_v56, %v5921_v53 }
 0x1ed   :  { %7107 = vst [vmem:[#allocation24_spill] sm:$0xff] %v6127_v29  ;;  %v6134_v22 = vadd.f32 %v2906_v10, %v1929_v45  ;;  %v1931_v61 = vadd.f32 %v1930_v59, %v5966_v3 }
 0x1ee   :  { %v1934_v60 = vpop.f32.mrf.mxu0  ;;  %v6139_v8 = vpop.f32.mrf.mxu1 }
 0x1ef   :  { %7109 = vst [vmem:[#allocation51_spill] sm:$0xff] %v6134_v22  ;;  %v6141_v33 = vadd.f32 %v2907_v51, %v1931_v61  ;;  %v1935_v16 = vadd.f32 %v1934_v60, %v5980_v26  ;;  %v7117_v51 = vld [vmem:[#allocation64_spill] sm:$0xff] }
 0x1f0   :  { %v1936_v29 = vpop.f32.mrf.mxu0  ;;  %v6146_v38 = vpop.f32.mrf.mxu1  ;;  %v2912_v60 = vmul.f32 %v7117_v51, %v7116_v42  ;;  %v2913_v53 = vmul.f32 %v7117_v51, %v5940_v13  ;;  %v2916_v51 = vmul.f32 %v5929_v46, %v5957_v49  ;;  %v7132_v49 = vld [vmem:[#allocation31_spill] sm:$0xff] }
 0x1f1   :  { %7111 = vst [vmem:[#allocation25_spill] sm:$0xff] %v6141_v33  ;;  %v6148_v45 = vadd.f32 %v2909_v12, %v1935_v16  ;;  %v1937_v3 = vadd.f32 %v1936_v29, %v5985_v62 }
 0x1f2   :  { %v1938_v10 = vpop.f32.mrf.mxu0  ;;  %v6153_v59 = vpop.f32.mrf.mxu1 }
 0x1f3   :  { %7114 = vst [vmem:[#allocation55_spill] sm:$0xff] %v6148_v45  ;;  %v6155_v61 = vadd.f32 %v2910_v17, %v1937_v3  ;;  %v1939_v26 = vadd.f32 %v1938_v10, %v5992_v0  ;;  %v7120_v3 = vld [vmem:[#allocation33_spill] sm:$0xff]  ;;  %v7121_v10 = vld [vmem:[#allocation28_spill] sm:$0xff] }
 0x1f4   :  { %v1940_v19 = vpop.f32.mrf.mxu0  ;;  %v6160_v33 = vpop.f32.mrf.mxu1  ;;  %v2915_v17 = vmul.f32 %v5929_v46, %v7120_v3  ;;  %v6175_v42 = vadd.s32 4, %v7121_v10  ;;  %v7171_v45 = vld [vmem:[#allocation53_spill] sm:$0xff] }
 0x1f5   :  { %7115 = vst [vmem:[#allocation26_spill] sm:$0xff] %v6155_v61  ;;  %v6162_v16 = vadd.f32 %v2912_v60, %v1939_v26  ;;  %v1941_v62 = vadd.f32 %v1940_v19, %v5999_v11  ;;  %v7124_v19 = vand.u32 7, %v5315_v2 }
 0x1f6   :  { %v1944_v29 = vpop.f32.mrf.mxu0  ;;  %v6167_v56 = vpop.f32.mrf.mxu1  ;;  %7122 = vst [vmem:[#allocation60_spill] sm:$0xff] %v6175_v42 }
 0x1f7   :  { %7118 = vst [vmem:[#allocation63_spill] sm:$0xff] %v6162_v16  ;;  %v6169_v12 = vadd.f32 %v2913_v53, %v1941_v62  ;;  %v1945_v0 = vadd.f32 %v1944_v29, %v6006_v20  ;;  %vm2630_vm2 = vcmp.ne.s32.totalorder %v7124_v19, 7  ;;  %v7133_v53 = vand.u32 7, %v7132_v49  ;;  %v7167_v49 = vld [vmem:[#allocation49_spill] sm:$0xff] }
 0x1f8   :  { %v1946_v26 = vpop.f32.mrf.mxu0  ;;  %v6177_v60 = vpop.f32.mrf.mxu1 }
 0x1f9   :  { %7119 = vst [vmem:[#allocation27_spill] sm:$0xff] %v6169_v12  ;;  %v6179_v11 = vadd.f32 %v2915_v17, %v1945_v0  ;;  %v1947_v13 = vadd.f32 %v1946_v26, %v6013_v31  ;;  %v7126_v12 = vld [vmem:[#allocation13_spill] sm:$0xff]  ;;  %v6197_v31 = vld [vmem:[%s6930_s4] sm:$0x7]  ;;  %v6203_v26 = vsel %vm2630_vm2, 1.0, %v7019_v48  ;;  %vm2632_vm5 = vcmp.ne.s32.totalorder %v7133_v53, 7 }
 0x1fa   :  { %v1948_v20 = vpop.f32.mrf.mxu0  ;;  %v6186_v62 = vpop.f32.mrf.mxu1  ;;  %v2918_v0 = vmul.f32 %v5948_v41, %v7126_v12  ;;  %7127 = vst [vmem:[#allocation33_spill] sm:$0xff] %v6203_v26  ;;  %v7137_v12 = vand.u32 7, %v7136_v40  ;;  %v7142_v53 = vld [vmem:[#allocation37_spill] sm:$0xff] }
 0x1fb   :  { %7123 = vst [vmem:[#allocation30_spill] sm:$0xff] %v6179_v11  ;;  %v6189_v29 = vadd.f32 %v2916_v51, %v1947_v13  ;;  %v1949_v3 = vadd.f32 %v1948_v20, %v6020_v18  ;;  %v7128_v13 = vand.u32 7, %v7121_v10  ;;  %v2919_v20 = vmul.f32 %v5948_v41, %v5977_v28  ;;  %v7161_v18 = vld [vmem:[#allocation45_spill] sm:$0xff] }
 0x1fc   :  { %v1950_v46 = vpop.f32.mrf.mxu0  ;;  %v6200_v17 = vpop.f32.mrf.mxu1  ;;  %vm6226_vm8 = vcmp.ne.s32.totalorder %v7137_v12, 7  ;;  %v7150_v12 = vld [vmem:[#allocation17_spill] sm:$0xff]  ;;  %v7162_v54 = vand.u32 7, %v7161_v18 }
 0x1fd   :  { %7125 = vst [vmem:[#allocation64_spill] sm:$0xff] %v6189_v29  ;;  %vm6207_vm4 = vcmp.ne.s32.totalorder %v7128_v13, 7  ;;  %v6212_v51 = vadd.f32 %v2918_v0, %v1949_v3  ;;  %v1951_v19 = vadd.f32 %v1950_v46, %v6027_v37  ;;  %v7134_v13 = vld [vmem:[#allocation34_spill] sm:$0xff]  ;;  %v7140_v37 = vsub.s32 0, %v5315_v2 }
 0x1fe   :  { %v2100_v61 = vpop.f32.mrf.mxu0  ;;  %v6220_v10 = vpop.f32.mrf.mxu1  ;;  %v7135_v29 = vand.u32 7, %v7134_v13  ;;  %v7143_v0 = vand.u32 7, %v7142_v53  ;;  %v7151_v13 = vand.u32 7, %v7150_v12  ;;  %v6263_v53 = vsel %vm2632_vm5, 1.0, %v7019_v48 }
 0x1ff   :  { %7131 = vst [vmem:[#allocation28_spill] sm:$0xff] %v6212_v51  ;;  %v6233_v41 = vrot.slane %v6197_v31, %v7140_v37  ;;  %v6235_v28 = vadd.f32 %v2919_v20, %v1951_v19  ;;  %v6260_v37 = vsel %vm6207_vm4, 1.0, %v7019_v48  ;;  %7156 = vst [vmem:[#allocation35_spill] sm:$0xff] %v6263_v53  ;;  %vm2639_vm13 = vcmp.ne.s32.totalorder %v7162_v54, 7 }
 0x200   :  { %vm2633_vm7 = vcmp.ne.s32.totalorder %v7135_v29, 7  ;;  %vm6239_vm9 = vcmp.ne.s32.totalorder %v7143_v0, 7  ;;  %v7146_v29 = vld [vmem:[#allocation39_spill] sm:$0xff]  ;;  %vm6251_vm11 = vcmp.ne.s32.totalorder %v7151_v13, 7  ;;  %v2102_v19 = vpop.f32.mrf.mxu0  ;;  %v6255_v20 = vpop.f32.mrf.mxu1  ;;  %7155 = vst [vmem:[#allocation34_spill] sm:$0xff] %v6260_v37  ;;  %v7157_v0 = vld [vmem:[#allocation41_spill] sm:$0xff]  ;;  %v6273_v13 = vadd.f32 %v2100_v61, %v6034_v63 }
 0x201   :  { %7141 = vst [vmem:[#allocation13_spill] sm:$0xff] %v6235_v28  ;;  %v7147_v46 = vand.u32 7, %v7146_v29  ;;  %7154 = vst [vmem:[#allocation31_spill] sm:$0xff] %v6255_v20  ;;  %v7158_v29 = vand.u32 7, %v7157_v0  ;;  %v6276_v28 = vsel %vm2633_vm7, 1.0, %v7019_v48  ;;  %v7164_v51 = vand.u32 7, %v7163_v43 }
 0x202   :  { %7160 = vst [vmem:[#allocation37_spill] sm:$0xff] %v6273_v13  ;;  %v2104_v11 = vpop.f32.mrf.mxu0  ;;  %v6282_v0 = vpop.f32.mrf.mxu1  ;;  %v6292_v63 = vsel %vm6239_vm9, 1.0, %v7019_v48  ;;  %v6302_v43 = vsel %vm6251_vm11, 1.0, %v7019_v48  ;;  %v6305_v61 = vadd.f32 %v2102_v19, %v6041_v36  ;;  %v6316_v16 = vsel %vm2639_vm13, 1.0, %v7019_v48 }
 0x203   :  { %vm6245_vm10 = vcmp.ne.s32.totalorder %v7147_v46, 7  ;;  %vm2638_vm12 = vcmp.ne.s32.totalorder %v7158_v29, 7  ;;  %v7159_v46 = vsub.s32 1, %v5315_v2  ;;  %vm2640_vm14 = vcmp.ne.s32.totalorder %v7164_v51, 7  ;;  %7165 = vst [vmem:[#allocation39_spill] sm:$0xff] %v6282_v0 }
 0x204   :  { %v6287_v29 = vsel %vm6226_vm8, 1.0, %v7019_v48  ;;  %v6297_v54 = vsel %vm6245_vm10, 1.0, %v7019_v48  ;;  %7166 = vst [vmem:[#allocation17_spill] sm:$0xff] %v6305_v61  ;;  %v2105_v51 = vadd.f32 %v2104_v11, %v6048_v58  ;;  %v6309_v3 = vsel %vm2638_vm12, 1.0, %v7019_v48  ;;  %v2106_v18 = vpop.f32.mrf.mxu0  ;;  %v6313_v40 = vpop.f32.mrf.mxu1  ;;  %v7175_v58 = vld [vmem:[#allocation56_spill] sm:$0xff] }
 0x205   :  { %v6270_v12 = vrot.slane %v6197_v31, %v7159_v46  ;;  %v7168_v46 = vand.u32 7, %v7167_v49  ;;  %7169 = vst [vmem:[#allocation41_spill] sm:$0xff] %v6313_v40  ;;  %v6319_v35 = vsel %vm2640_vm14, 1.0, %v7019_v48  ;;  %v7172_v36 = vand.u32 7, %v7171_v45  ;;  %v7179_v40 = vld [vmem:[#allocation58_spill] sm:$0xff]  ;;  %v7192_v49 = vld [vmem:[#allocation36_spill] sm:$0xff] }
 0x206   :  { %7170 = vst [vmem:[#allocation45_spill] sm:$0xff] %v6319_v35  ;;  %v7176_v11 = vand.u32 7, %v7175_v58  ;;  %v2778_v22 = vrot.slane %v2105_v51, 1  ;;  %v2107_v47 = vadd.f32 %v2106_v18, %v6055_v30  ;;  %v7180_v0 = vand.u32 7, %v7179_v40  ;;  %v2110_v45 = vpop.f32.mrf.mxu0 }
 0x207   :  { %vm2641_vm15 = vcmp.ne.s32.totalorder %v7168_v46, 7  ;;  %vm6323_vm0 = vcmp.ne.s32.totalorder %v7172_v36, 7  ;;  %v6976_v46 = vrot.slane %v6273_v13, 1  ;;  %v6341_v36 = vpop.f32.mrf.mxu1  ;;  %v6982_v51 = vrot.slane %v6305_v61, 1 }
 0x208   :  { %vm6329_vm1 = vcmp.ne.s32.totalorder %v7176_v11, 7  ;;  %vm6337_vm3 = vcmp.ne.s32.totalorder %v7180_v0, 7  ;;  %7183 = vst [vmem:[#allocation47_spill] sm:$0xff] %v6341_v36  ;;  %v6344_v58 = vsel %vm2641_vm15, 1.0, %v7019_v48  ;;  %v7184_v11 = vld [vmem:[#allocation62_spill] sm:$0xff]  ;;  %v2779_v18 = vrot.slane %v2107_v47, 1 }
 0x209   :  { %v7185_v35 = vand.u32 7, %v7184_v11  ;;  %v2866_v0 = vsel %vm2823_vm6, %v6976_v46, %v2778_v22  ;;  %v2111_v40 = vadd.f32 %v2110_v45, %v6062_v24  ;;  %vm4989_vm4 = vmmov 0   ;;  %v2112_v11 = vpop.f32.mrf.mxu0  ;;  %v6362_v36 = vpop.f32.mrf.mxu1 }
 0x20a   :  { %4485 = vmatprep.mubr.msk.bf16.mxu0 %vm4989_vm4, %v7019_v48  ;;  %v6367_v30 = vsel %vm6323_vm0, 1.0, %v7019_v48  ;;  %v6372_v47 = vsel %vm6329_vm1, 1.0, %v7019_v48  ;;  %v6377_v24 = vsel %vm6337_vm3, 1.0, %v7019_v48  ;;  %v2867_v45 = vsel %vm2823_vm6, %v6982_v51, %v2779_v18 }
 0x20b   :  { %vm6348_vm2 = vcmp.ne.s32.totalorder %v7185_v35, 7  ;;  %v2968_v35 = vmul.f32 %v6203_v26, %v2866_v0  ;;  %7188 = vst [vmem:[#allocation49_spill] sm:$0xff] %v6367_v30  ;;  %7189 = vst [vmem:[#allocation53_spill] sm:$0xff] %v6372_v47  ;;  %v2781_v0 = vrot.slane %v2111_v40, 1  ;;  %v2113_v19 = vadd.f32 %v2112_v11, %v6069_v23  ;;  %v2114_v1 = vpop.f32.mrf.mxu0  ;;  %v6391_v30 = vpop.f32.mrf.mxu1 }
 0x20c   :  { %7190 = vst [vmem:[#allocation56_spill] sm:$0xff] %v6377_v24  ;;  %v6387_v46 = vsel %vm6348_vm2, 1.0, %v7019_v48  ;;  %v2969_v47 = vmul.f32 %v6203_v26, %v2867_v45  ;;  %v7193_v61 = vsub.s32 2, %v5315_v2  ;;  %v6399_v40 = vadd.s32 4, %v5315_v2 }
 0x20d   :  { %7191 = vst [vmem:[#allocation58_spill] sm:$0xff] %v6387_v46  ;;  %v3016_v13 = vadd.f32 %v2968_v35, %v7192_v49  ;;  %v2863_v23 = vsel %vm2823_vm6, %v2778_v22, %v2781_v0  ;;  %v2782_v20 = vrot.slane %v2113_v19, 1  ;;  %v2115_v11 = vadd.f32 %v2114_v1, %v6076_v55  ;;  %v2116_v51 = vpop.f32.mrf.mxu0  ;;  %v6408_v48 = vpop.f32.mrf.mxu1  ;;  %v7197_v1 = vld [vmem:[#allocation38_spill] sm:$0xff] }
 0x20e   :  { %v6396_v24 = vrot.slane %v6197_v31, %v7193_v61  ;;  %v7195_v35 = vlaneseq  ;;  %v2971_v45 = vmul.f32 %v6260_v37, %v2863_v23  ;;  %v3017_v31 = vadd.f32 %v2969_v47, %v5982_v44 }
 0x20f   :  { %vm3203_vm5 = vcmp.lt.s32.totalorder %v5315_v2, 2  ;;  %v2864_v22 = vsel %vm2823_vm6, %v2779_v18, %v2782_v20  ;;  %v2784_v19 = vrot.slane %v2115_v11, 1  ;;  %v2117_v55 = vadd.f32 %v2116_v51, %v6083_v5  ;;  %v2120_v23 = vpop.f32.mrf.mxu0 }
 0x210   :  { %7194 = vst [vmem:[#allocation62_spill] sm:$0xff] %v6396_v24  ;;  %v6405_v49 = vand.u32 127, %v7195_v35  ;;  %v3019_v35 = vadd.f32 %v2971_v45, %v7197_v1  ;;  %v6418_v24 = vpop.f32.mrf.mxu1  ;;  %v7198_v44 = vmul.u32 8, %v6175_v42  ;;  %v2121_v11 = vadd.f32 %v2120_v23, %v6090_v4 }
 0x211   :  { %v2860_v61 = vsel %vm2823_vm6, %v2781_v0, %v2784_v19  ;;  %v2785_v18 = vrot.slane %v2117_v55, 1  ;;  %v3081_v5 = vadd.f32 %v6233_v41, %v3016_v13  ;;  %v2122_v45 = vpop.f32.mrf.mxu0  ;;  %v4990_v42 = vmov 8   ;;  %v7201_v55 = vld [vmem:[#allocation15_spill] sm:$0xff] }
 0x212   :  { %7196 = vst [vmem:[#allocation36_spill] sm:$0xff] %v6405_v49  ;;  %v2972_v49 = vmul.f32 %v6260_v37, %v2864_v22  ;;  %v6423_v47 = vadd.s32 8, %v7198_v44  ;;  %v2974_v51 = vmul.f32 %v6263_v53, %v2860_v61  ;;  %v6430_v22 = vpop.f32.mrf.mxu1  ;;  %v3084_v26 = vadd.f32 %v6233_v41, %v3019_v35 }
 0x213   :  { %v6436_v44 = vsel %vm3203_vm5, 24, %v4990_v42  ;;  %v2861_v0 = vsel %vm2823_vm6, %v2782_v20, %v2785_v18  ;;  %v2787_v4 = vrot.slane %v2121_v11, 1  ;;  %v2123_v13 = vadd.f32 %v2122_v45, %v6097_v14 }
 0x214   :  { %7199 = vst [vmem:[#allocation38_spill] sm:$0xff] %v6423_v47  ;;  %v3020_v1 = vadd.f32 %v2972_v49, %v5994_v21  ;;  %7200 = vst [vmem:[#allocation68_spill] sm:$0xff] %v6436_v44  ;;  %v3082_v61 = vadd.f32 %v6270_v12, %v3017_v31  ;;  %v3022_v23 = vadd.f32 %v2974_v51, %v7201_v55  ;;  %v2124_v21 = vpop.f32.mrf.mxu0  ;;  %v6444_v49 = vpop.f32.mrf.mxu1  ;;  %v3132_v37 = vmax.f32 %v3084_v26, 0.0 }
 0x215   :  { %v2975_v47 = vmul.f32 %v6263_v53, %v2861_v0  ;;  %v2857_v42 = vsel %vm2823_vm6, %v2784_v19, %v2787_v4  ;;  %v2788_v44 = vrot.slane %v2123_v13, 1  ;;  %v2125_v20 = vadd.f32 %v2124_v21, %v6104_v32  ;;  %v7203_v13 = vld [vmem:[#allocation40_spill] sm:$0xff] }
 0x216   :  { %v3085_v35 = vadd.f32 %v6270_v12, %v3020_v1  ;;  %v3129_v11 = vmax.f32 %v3081_v5, 0.0  ;;  %v2977_v14 = vmul.f32 %v6276_v28, %v2857_v42  ;;  %v2126_v31 = vpop.f32.mrf.mxu0  ;;  %v4351_v45 = vpop.f32.mrf.mxu1  ;;  %v3087_v0 = vadd.f32 %v6233_v41, %v3022_v23 }
 0x217   :  { %v3023_v51 = vadd.f32 %v2975_v47, %v6008_v50  ;;  %v2858_v1 = vsel %vm2823_vm6, %v2785_v18, %v2788_v44  ;;  %v2790_v26 = vrot.slane %v2125_v20, 1  ;;  %v2127_v53 = vadd.f32 %v2126_v31, %v6111_v52 }
 0x218   :  { %v3133_v55 = vmax.f32 %v3085_v35, 0.0  ;;  %v6456_v19 = vpack.c.bf16 %v3132_v37, %v3129_v11  ;;  %v3025_v32 = vadd.f32 %v2977_v14, %v7203_v13  ;;  %v2978_v5 = vmul.f32 %v6276_v28, %v2858_v1  ;;  %v2130_v21 = vpop.f32.mrf.mxu0  ;;  %v4352_v42 = vpop.f32.mrf.mxu1 }
 0x219   :  { %v3088_v46 = vadd.f32 %v6270_v12, %v3023_v51  ;;  %v3130_v50 = vmax.f32 %v3082_v61, 0.0  ;;  %v2854_v47 = vsel %vm2823_vm6, %v2787_v4, %v2790_v26  ;;  %v2791_v23 = vrot.slane %v2127_v53, 1 }
 0x21a   :  { %7202 = vst [vmem:[#allocation15_spill] sm:$0xff] %v6456_v19  ;;  %v2131_v18 = vadd.f32 %v2130_v21, %v6118_v25  ;;  %v6464_v35 = vadd.f32 %v4352_v42, %v4351_v45  ;;  %v2980_v52 = vmul.f32 %v6287_v29, %v2854_v47  ;;  %v2132_v37 = vpop.f32.mrf.mxu0  ;;  %v4354_v20 = vpop.f32.mrf.mxu1  ;;  %v3026_v11 = vadd.f32 %v2978_v5, %v6022_v34  ;;  %v7205_v25 = vld [vmem:[#allocation42_spill] sm:$0xff] }
 0x21b   :  { %v3090_v14 = vadd.f32 %v6233_v41, %v3025_v32  ;;  %v3135_v31 = vmax.f32 %v3087_v0, 0.0  ;;  %v2855_v61 = vsel %vm2823_vm6, %v2788_v44, %v2791_v23  ;;  %v2133_v4 = vadd.f32 %v2132_v37, %v6125_v39 }
 0x21c   :  { %v2793_v51 = vrot.slane %v2131_v18, 1  ;;  %v6472_v53 = vpack.c.bf16 %v3133_v55, %v3130_v50  ;;  %v3028_v45 = vadd.f32 %v2980_v52, %v7205_v25  ;;  %v2981_v1 = vmul.f32 %v6287_v29, %v2855_v61  ;;  %v2134_v13 = vpop.f32.mrf.mxu0  ;;  %v4355_v21 = vpop.f32.mrf.mxu1 }
 0x21d   :  { %v3091_v42 = vadd.f32 %v6270_v12, %v3026_v11  ;;  %v3138_v34 = vmax.f32 %v3090_v14, 0.0  ;;  %v2794_v32 = vrot.slane %v2133_v4, 1  ;;  %v2135_v44 = vadd.f32 %v2134_v13, %v6132_v57  ;;  %v7207_v57 = vld [vmem:[#allocation44_spill] sm:$0xff] }
 0x21e   :  { %7204 = vst [vmem:[#allocation40_spill] sm:$0xff] %v6472_v53  ;;  %v2851_v0 = vsel %vm2823_vm6, %v2790_v26, %v2793_v51  ;;  %v6480_v5 = vadd.f32 %v4355_v21, %v4354_v20  ;;  %v2136_v55 = vpop.f32.mrf.mxu0  ;;  %v4357_v50 = vpop.f32.mrf.mxu1  ;;  %v3029_v47 = vadd.f32 %v2981_v1, %v6036_v27  ;;  %v3093_v18 = vadd.f32 %v6233_v41, %v3028_v45  ;;  %v7240_v53 = vld [vmem:[#allocation66_spill] sm:$0xff] }
 0x21f   :  { %v2983_v39 = vmul.f32 %v6292_v63, %v2851_v0  ;;  %v3139_v52 = vmax.f32 %v3091_v42, 0.0  ;;  %v2852_v37 = vsel %vm2823_vm6, %v2791_v23, %v2794_v32  ;;  %v2796_v11 = vrot.slane %v2135_v44, 1 }
 0x220   :  { %v2137_v26 = vadd.f32 %v2136_v55, %v6139_v8  ;;  %v6488_v14 = vpack.c.bf16 %v3138_v34, %v3135_v31  ;;  %v2984_v61 = vmul.f32 %v6292_v63, %v2852_v37  ;;  %v2140_v4 = vpop.f32.mrf.mxu0  ;;  %v4358_v25 = vpop.f32.mrf.mxu1  ;;  %v3094_v13 = vadd.f32 %v6270_v12, %v3029_v47 }
 0x221   :  { %v3031_v20 = vadd.f32 %v2983_v39, %v7207_v57  ;;  %v3136_v27 = vmax.f32 %v3088_v46, 0.0  ;;  %v2848_v45 = vsel %vm2823_vm6, %v2793_v51, %v2796_v11  ;;  %v2141_v23 = vadd.f32 %v2140_v4, %v6146_v38  ;;  %v7209_v38 = vld [vmem:[#allocation48_spill] sm:$0xff] }
 0x222   :  { %7206 = vst [vmem:[#allocation42_spill] sm:$0xff] %v6488_v14  ;;  %v2797_v1 = vrot.slane %v2137_v26, 1  ;;  %v6496_v21 = vadd.f32 %v4358_v25, %v4357_v50  ;;  %v2986_v8 = vmul.f32 %v6297_v54, %v2848_v45  ;;  %v2142_v31 = vpop.f32.mrf.mxu0  ;;  %v4360_v42 = vpop.f32.mrf.mxu1  ;;  %v3032_v34 = vadd.f32 %v2984_v61, %v6050_v6 }
 0x223   :  { %v3096_v0 = vadd.f32 %v6233_v41, %v3031_v20  ;;  %v3141_v44 = vmax.f32 %v3093_v18, 0.0  ;;  %v2799_v39 = vrot.slane %v2141_v23, 1  ;;  %v2143_v51 = vadd.f32 %v2142_v31, %v6153_v59 }
 0x224   :  { %v2849_v46 = vsel %vm2823_vm6, %v2794_v32, %v2797_v1  ;;  %v6504_v55 = vpack.c.bf16 %v3139_v52, %v3136_v27  ;;  %v3034_v50 = vadd.f32 %v2986_v8, %v7209_v38  ;;  %v2144_v37 = vpop.f32.mrf.mxu0  ;;  %v4361_v26 = vpop.f32.mrf.mxu1  ;;  %v3097_v57 = vadd.f32 %v6270_v12, %v3032_v34  ;;  %v7213_v34 = vld [vmem:[#allocation50_spill] sm:$0xff] }
 0x225   :  { %v2987_v47 = vmul.f32 %v6297_v54, %v2849_v46  ;;  %v3144_v6 = vmax.f32 %v3096_v0, 0.0  ;;  %v2845_v18 = vsel %vm2823_vm6, %v2796_v11, %v2799_v39  ;;  %v2800_v20 = vrot.slane %v2143_v51, 1 }
 0x226   :  { %7208 = vst [vmem:[#allocation44_spill] sm:$0xff] %v6504_v55  ;;  %v2145_v32 = vadd.f32 %v2144_v37, %v6160_v33  ;;  %v6512_v61 = vadd.f32 %v4361_v26, %v4360_v42  ;;  %v2989_v59 = vmul.f32 %v6302_v43, %v2845_v18  ;;  %v2146_v52 = vpop.f32.mrf.mxu0  ;;  %v4363_v4 = vpop.f32.mrf.mxu1  ;;  %v3145_v27 = vmax.f32 %v3097_v57, 0.0 }
 0x227   :  { %v3035_v25 = vadd.f32 %v2987_v47, %v6064_v9  ;;  %v7210_v45 = vmul.u32 8, %v6399_v40  ;;  %v7211_v23 = vmul.u32 24, %v5315_v2  ;;  %v2846_v33 = vsel %vm2823_vm6, %v2797_v1, %v2800_v20 }
 0x228   :  { %v2802_v11 = vrot.slane %v2145_v32, 1  ;;  %v2147_v31 = vadd.f32 %v2146_v52, %v6167_v56  ;;  %v6527_v42 = vpack.c.bf16 %v3144_v6, %v3141_v44  ;;  %v6531_v9 = vadd.f32 %v6444_v49, %v6430_v22  ;;  %v2150_v46 = vpop.f32.mrf.mxu0  ;;  %v4364_v51 = vpop.f32.mrf.mxu1 }
 0x229   :  { %v6522_v8 = vsel %vm3203_vm5, %v7211_v23, %v7210_v45  ;;  %v3037_v40 = vadd.f32 %v2989_v59, %v7213_v34  ;;  %v2990_v0 = vmul.f32 %v6302_v43, %v2846_v33  ;;  %v3142_v38 = vmax.f32 %v3094_v13, 0.0 }
 0x22a   :  { %7212 = vst [vmem:[#allocation48_spill] sm:$0xff] %v6527_v42  ;;  %v2842_v47 = vsel %vm2823_vm6, %v2799_v39, %v2802_v11  ;;  %v2803_v1 = vrot.slane %v2147_v31, 1  ;;  %v2151_v37 = vadd.f32 %v2150_v46, %v6177_v60  ;;  %v3099_v56 = vadd.f32 %v6233_v41, %v3034_v50  ;;  %v2152_v26 = vpop.f32.mrf.mxu0  ;;  %v4366_v22 = vpop.f32.mrf.mxu1  ;;  %v7215_v60 = vld [vmem:[#allocation52_spill] sm:$0xff] }
 0x22b   :  { %v2992_v44 = vmul.f32 %v6309_v3, %v2842_v47  ;;  %v3038_v49 = vadd.f32 %v2990_v0, %v6078_v15  ;;  %v3100_v57 = vadd.f32 %v6270_v12, %v3035_v25  ;;  %v3102_v6 = vadd.f32 %v6233_v41, %v3037_v40 }
 0x22c   :  { %v2843_v13 = vsel %vm2823_vm6, %v2800_v20, %v2803_v1  ;;  %v2805_v18 = vrot.slane %v2151_v37, 1  ;;  %v2153_v39 = vadd.f32 %v2152_v26, %v6186_v62  ;;  %v6546_v32 = vpack.c.bf16 %v3145_v27, %v3142_v38  ;;  %v2154_v52 = vpop.f32.mrf.mxu0  ;;  %v4367_v45 = vpop.f32.mrf.mxu1 }
 0x22d   :  { %v3040_v50 = vadd.f32 %v2992_v44, %v7215_v60  ;;  %v2993_v59 = vmul.f32 %v6309_v3, %v2843_v13  ;;  %v3103_v15 = vadd.f32 %v6270_v12, %v3038_v49  ;;  %v3150_v23 = vmax.f32 %v3102_v6, 0.0  ;;  %v7216_v44 = vld [vmem:[#allocation57_spill] sm:$0xff]  ;;  %v7217_v13 = vld [vmem:[#allocation31_spill] sm:$0xff] }
 0x22e   :  { %7214 = vst [vmem:[#allocation50_spill] sm:$0xff] %v6546_v32  ;;  %v2839_v25 = vsel %vm2823_vm6, %v2802_v11, %v2805_v18  ;;  %v2806_v33 = vrot.slane %v2153_v39, 1  ;;  %v2155_v20 = vadd.f32 %v2154_v52, %v6200_v17  ;;  %v3147_v31 = vmax.f32 %v3099_v56, 0.0  ;;  %v2156_v27 = vpop.f32.mrf.mxu0  ;;  %v4369_v40 = vpop.f32.mrf.mxu1 }
 0x22f   :  { %v2995_v62 = vmul.f32 %v6316_v16, %v2839_v25  ;;  %v6555_v34 = vadd.f32 %v4364_v51, %v4363_v4  ;;  %v3041_v0 = vadd.f32 %v2993_v59, %v6092_v7  ;;  %v3151_v46 = vmax.f32 %v3103_v15, 0.0  ;;  %v7219_v15 = vld [vmem:[#allocation46_spill] sm:$0xff] }
 0x230   :  { %v2840_v38 = vsel %vm2823_vm6, %v2803_v1, %v2806_v33  ;;  %v2808_v47 = vrot.slane %v2155_v20, 1  ;;  %v2157_v37 = vadd.f32 %v2156_v27, %v6220_v10  ;;  %v6561_v11 = vpack.c.bf16 %v3150_v23, %v3147_v31  ;;  %v2160_v26 = vpop.f32.mrf.mxu0  ;;  %v4370_v4 = vpop.f32.mrf.mxu1  ;;  %v7218_v10 = vld [vmem:[#allocation45_spill] sm:$0xff] }
 0x231   :  { %v3043_v17 = vadd.f32 %v2995_v62, %v7216_v44  ;;  %v2996_v56 = vmul.f32 %v6316_v16, %v2840_v38  ;;  %v6565_v49 = vadd.f32 %v4367_v45, %v4366_v22  ;;  %v3148_v51 = vmax.f32 %v3100_v57, 0.0  ;;  %v7221_v62 = vld [vmem:[#allocation59_spill] sm:$0xff] }
 0x232   :  { %v2836_v7 = vsel %vm2823_vm6, %v2805_v18, %v2808_v47  ;;  %v2809_v6 = vrot.slane %v2157_v37, 1  ;;  %v2161_v1 = vadd.f32 %v2160_v26, %v7217_v13  ;;  %v3105_v39 = vadd.f32 %v6233_v41, %v3040_v50  ;;  %v2162_v59 = vpop.f32.mrf.mxu0  ;;  %v4372_v52 = vpop.f32.mrf.mxu1  ;;  %v7220_v18 = vld [vmem:[#allocation39_spill] sm:$0xff]  ;;  %v7222_v26 = vld [vmem:[#allocation41_spill] sm:$0xff] }
 0x233   :  { %v2998_v60 = vmul.f32 %v7218_v10, %v2836_v7  ;;  %v3044_v23 = vadd.f32 %v2996_v56, %v7219_v15  ;;  %v3106_v25 = vadd.f32 %v6270_v12, %v3041_v0  ;;  %v3108_v22 = vadd.f32 %v6233_v41, %v3043_v17 }
 0x234   :  { %v2837_v57 = vsel %vm2823_vm6, %v2806_v33, %v2809_v6  ;;  %v2811_v45 = vrot.slane %v2161_v1, 1  ;;  %v2163_v20 = vadd.f32 %v2162_v59, %v7220_v18  ;;  %v6578_v31 = vpack.c.bf16 %v3151_v46, %v3148_v51  ;;  %v2164_v38 = vpop.f32.mrf.mxu0  ;;  %v4373_v37 = vpop.f32.mrf.mxu1 }
 0x235   :  { %v3046_v50 = vadd.f32 %v2998_v60, %v7221_v62  ;;  %v2999_v27 = vmul.f32 %v7218_v10, %v2837_v57  ;;  %v3109_v44 = vadd.f32 %v6270_v12, %v3044_v23  ;;  %v3156_v56 = vmax.f32 %v3108_v22, 0.0  ;;  %v7223_v60 = vld [vmem:[#allocation54_spill] sm:$0xff]  ;;  %v7224_v57 = vld [vmem:[#allocation47_spill] sm:$0xff] }
 0x236   :  { %v2833_v0 = vsel %vm2823_vm6, %v2808_v47, %v2811_v45  ;;  %v2812_v17 = vrot.slane %v2163_v20, 1  ;;  %v2165_v33 = vadd.f32 %v2164_v38, %v7222_v26  ;;  %v3153_v7 = vmax.f32 %v3105_v39, 0.0  ;;  %v2166_v46 = vpop.f32.mrf.mxu0  ;;  %v4375_v1 = vpop.f32.mrf.mxu1  ;;  %v7225_v20 = vld [vmem:[#allocation61_spill] sm:$0xff] }
 0x237   :  { %v3001_v13 = vmul.f32 %v6344_v58, %v2833_v0  ;;  %v6587_v51 = vadd.f32 %v4370_v4, %v4369_v40  ;;  %v3047_v59 = vadd.f32 %v2999_v27, %v7223_v60  ;;  %v3157_v15 = vmax.f32 %v3109_v44, 0.0 }
 0x238   :  { %v2834_v23 = vsel %vm2823_vm6, %v2809_v6, %v2812_v17  ;;  %v2814_v22 = vrot.slane %v2165_v33, 1  ;;  %v2167_v18 = vadd.f32 %v2166_v46, %v7224_v57  ;;  %v6593_v47 = vpack.c.bf16 %v3156_v56, %v3153_v7  ;;  %v2170_v38 = vpop.f32.mrf.mxu0  ;;  %v4376_v40 = vpop.f32.mrf.mxu1  ;;  %v7226_v33 = vld [vmem:[#allocation49_spill] sm:$0xff] }
 0x239   :  { %v3049_v62 = vadd.f32 %v3001_v13, %v7225_v20  ;;  %v3002_v39 = vmul.f32 %v6344_v58, %v2834_v23  ;;  %v6597_v0 = vadd.f32 %v4373_v37, %v4372_v52  ;;  %v3154_v4 = vmax.f32 %v3106_v25, 0.0  ;;  %v7227_v13 = vld [vmem:[#allocation51_spill] sm:$0xff] }
 0x23a   :  { %v2830_v27 = vsel %vm2823_vm6, %v2811_v45, %v2814_v22  ;;  %v2815_v44 = vrot.slane %v2167_v18, 1  ;;  %v2171_v6 = vadd.f32 %v2170_v38, %v6362_v36  ;;  %v3111_v26 = vadd.f32 %v6233_v41, %v3046_v50  ;;  %v2172_v7 = vpop.f32.mrf.mxu0  ;;  %v4378_v46 = vpop.f32.mrf.mxu1  ;;  %v7228_v50 = vld [vmem:[#allocation65_spill] sm:$0xff] }
 0x23b   :  { %v3004_v56 = vmul.f32 %v7226_v33, %v2830_v27  ;;  %v3050_v60 = vadd.f32 %v3002_v39, %v7227_v13  ;;  %v6606_v23 = vadd.f32 %v6270_v12, %v3047_v59  ;;  %v3114_v52 = vadd.f32 %v6233_v41, %v3049_v62  ;;  %v7230_v13 = vld [vmem:[#allocation55_spill] sm:$0xff] }
 0x23c   :  { %v2831_v25 = vsel %vm2823_vm6, %v2812_v17, %v2815_v44  ;;  %v2817_v45 = vrot.slane %v2171_v6, 1  ;;  %v2173_v37 = vadd.f32 %v2172_v7, %v6391_v30  ;;  %v6612_v36 = vpack.c.bf16 %v3157_v15, %v3154_v4  ;;  %v2174_v20 = vpop.f32.mrf.mxu0  ;;  %v4379_v38 = vpop.f32.mrf.mxu1  ;;  %v7229_v30 = vld [vmem:[#allocation53_spill] sm:$0xff] }
 0x23d   :  { %v3052_v57 = vadd.f32 %v3004_v56, %v7228_v50  ;;  %v3005_v18 = vmul.f32 %v7226_v33, %v2831_v25  ;;  %v6617_v39 = vadd.f32 %v6270_v12, %v3050_v60  ;;  %v3162_v59 = vmax.f32 %v3114_v52, 0.0 }
 0x23e   :  { %v2827_v62 = vsel %vm2823_vm6, %v2814_v22, %v2817_v45  ;;  %v2818_v27 = vrot.slane %v2173_v37, 1  ;;  %v2175_v17 = vadd.f32 %v2174_v20, %v6408_v48  ;;  %v3159_v6 = vmax.f32 %v3111_v26, 0.0  ;;  %v2176_v4 = vpop.f32.mrf.mxu0  ;;  %v4381_v56 = vpop.f32.mrf.mxu1 }
 0x23f   :  { %v3007_v15 = vmul.f32 %v7229_v30, %v2827_v62  ;;  %v6623_v7 = vadd.f32 %v4376_v40, %v4375_v1  ;;  %v3053_v25 = vadd.f32 %v3005_v18, %v7230_v13  ;;  %v2177_v22 = vadd.f32 %v2176_v4, %v6418_v24  ;;  %v7231_v62 = vld [vmem:[#allocation29_spill] sm:$0xff]  ;;  %v7235_v4 = vld [vmem:[#allocation58_spill] sm:$0xff]  ;;  %v7236_v18 = vld [vmem:[#allocation63_spill] sm:$0xff] }
 0x240   :  { %v2828_v60 = vsel %vm2823_vm6, %v2815_v44, %v2818_v27  ;;  %v2820_v52 = vrot.slane %v2175_v17, 1  ;;  %v6630_v37 = vpack.c.bf16 %v3162_v59, %v3159_v6  ;;  %v4455_v26 = vpop.f32.mrf.mxu0  ;;  %v6633_v20 = vadd.f32 %v4379_v38, %v4378_v46  ;;  %v4382_v1 = vpop.f32.mrf.mxu1  ;;  %v7232_v24 = vld [vmem:[#allocation37_spill] sm:$0xff]  ;;  %v7234_v46 = vld [vmem:[#allocation56_spill] sm:$0xff] }
 0x241   :  { %v3008_v48 = vmul.f32 %v7229_v30, %v2828_v60  ;;  %v6636_v40 = vadd.f32 %v6233_v41, %v3052_v57  ;;  %v6640_v13 = vadd.f32 %v3007_v15, %v7231_v62  ;;  %v7233_v59 = vrot.slane %v7232_v24, 1  ;;  %v7237_v62 = vld [vmem:[#allocation17_spill] sm:$0xff] }
 0x242   :  { %v2824_v44 = vsel %vm2823_vm6, %v2817_v45, %v2820_v52  ;;  %v2821_v6 = vrot.slane %v2177_v22, 1  ;;  %v2310_v57 = vpop.f32.mrf.mxu0  ;;  %v6650_v50 = vpop.f32.mrf.mxu1  ;;  %v3118_v15 = vadd.f32 %v6270_v12, %v3053_v25  ;;  %v7238_v24 = vrot.slane %v7237_v62, 1 }
 0x243   :  { %v2869_v17 = vsel %vm2823_vm6, %v2820_v52, %v7233_v59  ;;  %v3010_v38 = vmul.f32 %v7234_v46, %v2824_v44  ;;  %v3056_v19 = vadd.f32 %v3008_v48, %v7236_v18  ;;  %v2319_v22 = vadd.f32 %v4455_v26, %v6480_v5  ;;  %v7239_v59 = vld [vmem:[#allocation32_spill] sm:$0xff] }
 0x244   :  { %v3013_v60 = vmul.f32 %v7235_v4, %v2869_v17  ;;  %v2825_v45 = vsel %vm2823_vm6, %v2818_v27, %v2821_v6  ;;  %v2870_v52 = vsel %vm2823_vm6, %v2821_v6, %v7238_v24  ;;  %v6662_v44 = vadd.f32 %v6531_v9, %v2310_v57  ;;  %v4456_v18 = vpop.f32.mrf.mxu0  ;;  %v4385_v27 = vpop.f32.mrf.mxu1 }
 0x245   :  { %v3058_v17 = vadd.f32 %v3010_v38, %v7239_v59  ;;  %v3011_v48 = vmul.f32 %v7234_v46, %v2825_v45  ;;  %v3014_v25 = vmul.f32 %v7235_v4, %v2870_v52  ;;  %v2322_v62 = vadd.f32 %v4456_v18, %v6496_v21  ;;  %v7241_v38 = vld [vmem:[#allocation30_spill] sm:$0xff]  ;;  %v7248_v46 = vld [vmem:[#allocation67_spill] sm:$0xff] }
 0x246   :  { %v3061_v14 = vadd.f32 %v3013_v60, %v7240_v53  ;;  %v6669_v55 = vadd.f32 %v4382_v1, %v4381_v56  ;;  %v3121_v6 = vadd.f32 %v6270_v12, %v3056_v19  ;;  %v2313_v9 = vpop.f32.mrf.mxu0  ;;  %v6673_v26 = vpop.f32.mrf.mxu1  ;;  %v7242_v53 = vld [vmem:[#allocation28_spill] sm:$0xff]  ;;  %v2783_v52 = vrot.slane %v2319_v22, 1 }
 0x247   :  { %v3059_v57 = vadd.f32 %v3011_v48, %v7241_v38  ;;  %v3062_v60 = vadd.f32 %v3014_v25, %v7242_v53  ;;  %v3123_v45 = vadd.f32 %v6233_v41, %v3058_v17  ;;  %v2786_v56 = vrot.slane %v2322_v62, 1  ;;  %v7243_v53 = vld [vmem:[#allocation35_spill] sm:$0xff] }
 0x248   :  { %v3126_v24 = vadd.f32 %v6233_v41, %v3061_v14  ;;  %v2314_v1 = vadd.f32 %v6464_v35, %v2313_v9  ;;  %v4459_v19 = vpop.f32.mrf.mxu0  ;;  %v6681_v59 = vpop.f32.mrf.mxu1  ;;  %v3169_v22 = vmax.f32 %v3121_v6, 0.0 }
 0x249   :  { %v3124_v18 = vadd.f32 %v6270_v12, %v3059_v57  ;;  %v3127_v5 = vadd.f32 %v6270_v12, %v3062_v60  ;;  %v3171_v48 = vmax.f32 %v3123_v45, 0.0  ;;  %v2862_v17 = vsel %vm2823_vm6, %v2783_v52, %v2786_v56 }
 0x24a   :  { %v3174_v38 = vmax.f32 %v3126_v24, 0.0  ;;  %v2780_v25 = vrot.slane %v2314_v1, 1  ;;  %v2335_v14 = vadd.f32 %v4459_v19, %v6565_v49  ;;  %v2976_v62 = vmul.f32 %v7243_v53, %v2862_v17  ;;  %v2326_v21 = vpop.f32.mrf.mxu0  ;;  %v4390_v30 = vpop.f32.mrf.mxu1  ;;  %v7245_v49 = vld [vmem:[#allocation16_spill] sm:$0xff]  ;;  %v7246_v1 = vld [vmem:[#allocation33_spill] sm:$0xff]  ;;  %v7247_v17 = vld [vmem:[#allocation34_spill] sm:$0xff] }
 0x24b   :  { %v3172_v35 = vmax.f32 %v3124_v18, 0.0  ;;  %v3175_v9 = vmax.f32 %v3127_v5, 0.0  ;;  %v7244_v12 = vrot.slane %v6662_v44, 1  ;;  %v2327_v45 = vadd.f32 %v6512_v61, %v2326_v21 }
 0x24c   :  { %v3198_v42 = vpack.c.bf16 %v3174_v38, %v3171_v48  ;;  %v2865_v57 = vsel %vm2823_vm6, %v2780_v25, %v2783_v52  ;;  %v3166_v24 = vmax.f32 %v3118_v15, 0.0  ;;  %v3024_v6 = vadd.f32 %v2976_v62, %v7245_v49  ;;  %v4460_v5 = vpop.f32.mrf.mxu0  ;;  %v4391_v4 = vpop.f32.mrf.mxu1 }
 0x24d   :  { %v2868_v60 = vsel %vm2823_vm6, %v7244_v12, %v2780_v25  ;;  %v2973_v18 = vmul.f32 %v7247_v17, %v2865_v57  ;;  %v3199_v48 = vpack.c.bf16 %v3175_v9, %v3172_v35  ;;  %v2795_v38 = vrot.slane %v2335_v14, 1  ;;  %v7249_v25 = vld [vmem:[#allocation14_spill] sm:$0xff] }
 0x24e   :  { %v2970_v19 = vmul.f32 %v7246_v1, %v2868_v60  ;;  %v2789_v53 = vrot.slane %v2327_v45, 1  ;;  %v2338_v52 = vadd.f32 %v4460_v5, %v6587_v51  ;;  %v3196_v33 = vpack.c.bf16 %v3169_v22, %v3166_v24  ;;  %v2329_v61 = vpop.f32.mrf.mxu0  ;;  %v4393_v24 = vpop.f32.mrf.mxu1 }
 0x24f   :  { %v3021_v12 = vadd.f32 %v2973_v18, %v7249_v25  ;;  %3226 = vmatprep.subr.bf16.mxu1 %v3199_v48  ;;  %v3120_v15 = vadd.f32 %v6233_v41, %v6640_v13  ;;  %v7250_v21 = vmax.f32 %v6606_v23, 0.0  ;;  %v7251_v62 = vmax.f32 %v6617_v39, 0.0  ;;  %v7256_v25 = vld [vmem:[#allocation19_spill] sm:$0xff] }
 0x250   :  { %v3018_v32 = vadd.f32 %v2970_v19, %v7248_v46  ;;  %v2859_v14 = vsel %vm2823_vm6, %v2786_v56, %v2789_v53  ;;  %v2798_v51 = vrot.slane %v2338_v52, 1  ;;  %v2330_v22 = vadd.f32 %v6555_v34, %v2329_v61  ;;  %3227 = vmatpush1.bf16.msra.mxu1 %v3198_v42  ;;  %v7252_v46 = vld [vmem:[#allocation62_spill] sm:$0xff]  ;;  %v4463_v45 = vpop.f32.mrf.mxu0  ;;  %v7255_v19 = vld [vmem:[#allocation21_spill] sm:$0xff] }
 0x251   :  { %v3193_v35 = vpack.c.bf16 %v7251_v62, %v7250_v21  ;;  %v3089_v9 = vadd.f32 %v7252_v46, %v3024_v6  ;;  %v4386_v57 = vadd.f32 %v4385_v27, %v6650_v50  ;;  %v2979_v60 = vmul.f32 %v6276_v28, %v2859_v14  ;;  %3228 = vmatprep.subr.bf16.mxu1 %v3196_v33  ;;  %v7253_v42 = vld [vmem:[#allocation18_spill] sm:$0xff] }
 0x252   :  { %v4392_v41 = vadd.f32 %v4391_v4, %v4390_v30  ;;  %v3168_v23 = vmax.f32 %v3120_v15, 0.0  ;;  %v2850_v39 = vsel %vm2823_vm6, %v2795_v38, %v2798_v51  ;;  %v2792_v13 = vrot.slane %v2330_v22, 1  ;;  %v2342_v28 = vpop.f32.mrf.mxu0 }
 0x253   :  { %v3083_v56 = vadd.f32 %v7252_v46, %v3018_v32  ;;  %v3086_v34 = vadd.f32 %v7252_v46, %v3021_v12  ;;  %v3027_v49 = vadd.f32 %v2979_v60, %v7253_v42  ;;  %v2988_v6 = vmul.f32 %v6297_v54, %v2850_v39  ;;  %v7257_v12 = vld [vmem:[#allocation20_spill] sm:$0xff] }
 0x254   :  { %v2351_v50 = vadd.f32 %v4463_v45, %v6633_v20  ;;  %v7254_v33 = vmax.f32 %v6636_v40, 0.0  ;;  %v2853_v4 = vsel %vm2823_vm6, %v2792_v13, %v2795_v38  ;;  %v2856_v27 = vsel %vm2823_vm6, %v2789_v53, %v2792_v13  ;;  %v4464_v20 = vpop.f32.mrf.mxu0  ;;  %v4394_v38 = vpop.f32.mrf.mxu1  ;;  %v7258_v13 = vld [vmem:[#allocation43_spill] sm:$0xff] }
 0x255   :  { %v2343_v32 = vadd.f32 %v6597_v0, %v2342_v28  ;;  %v3137_v1 = vmax.f32 %v3089_v9, 0.0  ;;  %v3036_v17 = vadd.f32 %v2988_v6, %v7255_v19  ;;  %v2982_v18 = vmul.f32 %v6287_v29, %v2856_v27  ;;  %v7259_v27 = vld [vmem:[#allocation60_spill] sm:$0xff]  ;;  %v7266_v19 = vld [vmem:[#allocation23_spill] sm:$0xff] }
 0x256   :  { %v3195_v30 = vpack.c.bf16 %v3168_v23, %v7254_v33  ;;  %v2985_v54 = vmul.f32 %v6292_v63, %v2853_v4  ;;  %v3092_v40 = vadd.f32 %v7252_v46, %v3027_v49  ;;  %v2354_v48 = vadd.f32 %v4464_v20, %v6669_v55  ;;  %v2345_v21 = vpop.f32.mrf.mxu0  ;;  %v7267_v20 = vld [vmem:[#allocation24_spill] sm:$0xff] }
 0x257   :  { %v2801_v5 = vrot.slane %v2343_v32, 1  ;;  %v3131_v52 = vmax.f32 %v3083_v56, 0.0  ;;  %v3134_v53 = vmax.f32 %v3086_v34, 0.0  ;;  %v3030_v0 = vadd.f32 %v2982_v18, %v7256_v25 }
 0x258   :  { %3229 = vmatpush1.bf16.msra.mxu1 %v3195_v30  ;;  %v3033_v61 = vadd.f32 %v2985_v54, %v7257_v12  ;;  %v2807_v15 = vrot.slane %v2351_v50, 1  ;;  %v3140_v29 = vmax.f32 %v3092_v40, 0.0  ;;  %v2810_v62 = vrot.slane %v2354_v48, 1  ;;  %v4467_v9 = vpop.f32.mrf.mxu0 }
 0x259   :  { %3230 = vmatprep.subr.bf16.mxu1 %v3193_v35  ;;  %v2847_v63 = vsel %vm2823_vm6, %v2798_v51, %v2801_v5  ;;  %v2346_v14 = vadd.f32 %v6623_v7, %v2345_v21  ;;  %v6738_v22 = vpack.c.bf16 %v3134_v53, %v3131_v52  ;;  %v4395_v35 = vadd.f32 %v4394_v38, %v4393_v24  ;;  %v7268_v53 = vld [vmem:[#allocation68_spill] sm:$0xff] }
 0x25a   :  { %v2991_v55 = vmul.f32 %v6302_v43, %v2847_v63  ;;  %v3095_v60 = vadd.f32 %v7252_v46, %v3030_v0  ;;  %v3098_v45 = vadd.f32 %v7252_v46, %v3033_v61  ;;  %v2838_v23 = vsel %vm2823_vm6, %v2807_v15, %v2810_v62  ;;  %v2358_v56 = vpop.f32.mrf.mxu0  ;;  %v7270_v63 = vld [vmem:[#allocation50_spill] sm:$0xff] }
 0x25b   :  { %v2804_v39 = vrot.slane %v2346_v14, 1  ;;  %v3101_v7 = vadd.f32 %v7252_v46, %v3036_v17  ;;  %v6748_v51 = vpack.c.bf16 %v3140_v29, %v3137_v1  ;;  %v2367_v24 = vadd.f32 %v4467_v9, %v4392_v41  ;;  %v7261_v1 = vld [vmem:[#allocation36_spill] sm:$0xff] }
 0x25c   :  { %3231 = vmatpush1.bf16.msra.mxu1 %v6630_v37  ;;  %v3039_v43 = vadd.f32 %v2991_v55, %v7258_v13  ;;  %v3143_v37 = vmax.f32 %v3095_v60, 0.0  ;;  %v3146_v34 = vmax.f32 %v3098_v45, 0.0  ;;  %v3000_v42 = vmul.f32 %v7218_v10, %v2838_v23  ;;  %v4468_v41 = vpop.f32.mrf.mxu0  ;;  %v7272_v14 = vld [vmem:[#allocation56_spill] sm:$0xff] }
 0x25d   :  { %3232 = vmatprep.subr.bf16.mxu1 %v6612_v36  ;;  %v2841_v49 = vsel %vm2823_vm6, %v2804_v39, %v2807_v15  ;;  %v2844_v6 = vsel %vm2823_vm6, %v2801_v5, %v2804_v39  ;;  %v2359_v50 = vadd.f32 %v4386_v57, %v2358_v56  ;;  %v4389_v36 = vadd.f32 %v6681_v59, %v6673_v26  ;;  %v7264_v26 = vld [vmem:[#allocation38_spill] sm:$0xff]  ;;  %v7276_v56 = vld [vmem:[#allocation49_spill] sm:$0xff] }
 0x25e   :  { %v2994_v28 = vmul.f32 %v6309_v3, %v2844_v6  ;;  %v2997_v33 = vmul.f32 %v6316_v16, %v2841_v49  ;;  %v3104_v30 = vadd.f32 %v7252_v46, %v3039_v43  ;;  %v2370_v4 = vadd.f32 %v4468_v41, %v4395_v35  ;;  %v2361_v54 = vpop.f32.mrf.mxu0  ;;  %v7273_v35 = vld [vmem:[#allocation58_spill] sm:$0xff]  ;;  %v7275_v43 = vld [vmem:[#allocation13_spill] sm:$0xff]  ;;  %v7278_v49 = vld [vmem:[#allocation48_spill] sm:$0xff] }
 0x25f   :  { %v2813_v10 = vrot.slane %v2359_v50, 1  ;;  %v7260_v32 = vmul.u32 8, %v7259_v27  ;;  %vm3220_vm8 = vcmp.lt.s32.totalorder %v7261_v1, %v7264_v26  ;;  %v3149_v16 = vmax.f32 %v3101_v7, 0.0  ;;  %v7274_v7 = vld [vmem:[#allocation64_spill] sm:$0xff]  ;;  %v7281_v41 = vld [vmem:[#allocation27_spill] sm:$0xff] }
 0x260   :  { %3233 = vmatpush1.bf16.msra.mxu1 %v6593_v47  ;;  %v6772_v3 = vpack.c.bf16 %v3146_v34, %v3143_v37  ;;  %v7265_v47 = vld [vmem:[#allocation22_spill] sm:$0xff]  ;;  %v3045_v17 = vadd.f32 %v2997_v33, %v7266_v19  ;;  %v2819_v18 = vrot.slane %v2367_v24, 1  ;;  %v3048_v40 = vadd.f32 %v3000_v42, %v7267_v20  ;;  %v7277_v34 = vld [vmem:[#allocation53_spill] sm:$0xff]  ;;  %v7279_v6 = vld [vmem:[#allocation44_spill] sm:$0xff] }
 0x261   :  { %3234 = vmatprep.subr.bf16.mxu1 %v6578_v31  ;;  %vm6766_vm7 = vcmp.ge.s32.totalorder %v7261_v1, %v7260_v32  ;;  %v3042_v59 = vadd.f32 %v2994_v28, %v7265_v47  ;;  %v3152_v31 = vmax.f32 %v3104_v30, 0.0  ;;  %v2835_v5 = vsel %vm2823_vm6, %v2810_v62, %v2813_v10  ;;  %v7280_v28 = vld [vmem:[#allocation26_spill] sm:$0xff] }
 0x262   :  { %v2822_v48 = vrot.slane %v2370_v4, 1  ;;  %v2362_v38 = vadd.f32 %v4389_v36, %v2361_v54  ;;  %v3003_v52 = vmul.f32 %v6344_v58, %v2835_v5  ;;  %v3217_v25 = vadd.s32 %v7268_v53, %v6522_v8  ;;  %vm6822_vm10 = vmand %vm6766_vm7, %vm3220_vm8  ;;  %v7285_v54 = vld [vmem:[#allocation40_spill] sm:$0xff] }
 0x263   :  { %v3107_v0 = vadd.f32 %v7252_v46, %v3042_v59  ;;  %v3110_v12 = vadd.f32 %v7252_v46, %v3045_v17  ;;  %v7269_v15 = vrot.slane %v6662_v44, 1  ;;  %v6792_v58 = vpack.c.bf16 %v3152_v31, %v3149_v16  ;;  %v7282_v16 = vld [vmem:[#allocation42_spill] sm:$0xff]  ;;  %v4777_v53 = vld [vmem:[#allocation9 + $0x90] ss:$12 sps:$4 sm:$0xff]  }
 0x264   :  { %3235 = vmatpush1.bf16.msra.mxu1 %v6561_v11  ;;  %v2826_v61 = vsel %vm2823_vm6, %v2819_v18, %v2822_v48  ;;  %v2816_v29 = vrot.slane %v2362_v38, 1  ;;  %v7271_v11 = vld [vmem:[#allocation25_spill] sm:$0xff]  ;;  %v3113_v23 = vadd.f32 %v7252_v46, %v3048_v40  ;;  %vm3215_vm9 = vcmp.ge.s32.totalorder %v7261_v1, %v6522_v8  ;;  %v4776_v26 = vld [vmem:[#allocation9 + $0xac] ss:$12 sps:$4 sm:$0xff]   ;;  %v4774_v38 = vld [vmem:[#allocation9 + $0xa8] ss:$12 sps:$4 sm:$0xff]  }
 0x265   :  { %v2871_v21 = vsel %vm2823_vm6, %v2822_v48, %v7269_v15  ;;  %3236 = vmatprep.subr.bf16.mxu1 %v7270_v63  ;;  %v3051_v62 = vadd.f32 %v3003_v52, %v7271_v11  ;;  %v3012_v55 = vmul.f32 %v7272_v14, %v2826_v61  ;;  %v3155_v60 = vmax.f32 %v3107_v0, 0.0  ;;  %v7288_v48 = vld [vmem:[#allocation15_spill] sm:$0xff]  ;;  %v4780_v0 = vld [vmem:[#allocation9 + $0x78] ss:$12 sps:$4 sm:$0xff]   ;;  %v4783_v61 = vld [vmem:[#allocation9 + $0x60] ss:$12 sps:$4 sm:$0xff]  }
 0x266   :  { %v3015_v9 = vmul.f32 %v7273_v35, %v2871_v21  ;;  %v2829_v45 = vsel %vm2823_vm6, %v2816_v29, %v2819_v18  ;;  %v2832_v44 = vsel %vm2823_vm6, %v2813_v10, %v2816_v29  ;;  %v3158_v39 = vmax.f32 %v3110_v12, 0.0  ;;  %v4785_v12 = vld [vmem:[#allocation9 + $0x64] ss:$12 sps:$4 sm:$0xff]   ;;  %v4788_v15 = vld [vmem:[#allocation9 + $0x4c] ss:$12 sps:$4 sm:$0xff]  }
 0x267   :  { %v3060_v13 = vadd.f32 %v3012_v55, %v7274_v7  ;;  %v3006_v37 = vmul.f32 %v7276_v56, %v2832_v44  ;;  %v3009_v42 = vmul.f32 %v7277_v34, %v2829_v45  ;;  %vm3219_vm6 = vcmp.lt.s32.totalorder %v7261_v1, %v3217_v25  ;;  %v4779_v1 = vld [vmem:[#allocation9 + $0x94] ss:$12 sps:$4 sm:$0xff]   ;;  %v4782_v25 = vld [vmem:[#allocation9 + $0x7c] ss:$12 sps:$4 sm:$0xff]   ;;  %v4809_v45 = vld [vmem:[#allocation9 + $0x124] ss:$12 sps:$4 sm:$0xff]  }
 0x268   :  { %v3063_v24 = vadd.f32 %v3015_v9, %v7275_v43  ;;  %3237 = vmatpush1.bf16.msra.mxu1 %v7278_v49  ;;  %v3116_v50 = vadd.f32 %v7252_v46, %v3051_v62  ;;  %v3191_v36 = vpack.c.bf16 %v3158_v39, %v3155_v60  ;;  %v3161_v27 = vmax.f32 %v3113_v23, 0.0  ;;  %vm6834_vm11 = vmand %vm3215_vm9, %vm3219_vm6  ;;  %v4786_v21 = vld [vmem:[#allocation9 + $0x48] ss:$12 sps:$4 sm:$0xff]   ;;  %v4789_v63 = vld [vmem:[#allocation9 + $0x30] ss:$12 sps:$4 sm:$0xff]  }
 0x269   :  { %3238 = vmatprep.subr.bf16.mxu1 %v7279_v6  ;;  %v3054_v33 = vadd.f32 %v3006_v37, %v7280_v28  ;;  %v3057_v30 = vadd.f32 %v3009_v42, %v7281_v41  ;;  %v3125_v10 = vadd.f32 %v7252_v46, %v3060_v13  ;;  %vm4256_vm12 = vmpackc.low %vm6822_vm10, %vm6834_vm11  ;;  %v7289_v8 = vmov 0.0   ;;  %v4791_v29 = vld [vmem:[#allocation9 + $0x34] ss:$12 sps:$4 sm:$0xff]   ;;  %v4794_v11 = vld [vmem:[#allocation9 + $0x1c] ss:$12 sps:$4 sm:$0xff]  }
 0x26a   :  { %v3128_v4 = vadd.f32 %v7252_v46, %v3063_v24  ;;  %v3164_v32 = vmax.f32 %v3116_v50, 0.0  ;;  %v4991_v52 = vmov 1.0|1.0   ;;  %v4792_v62 = vld [vmem:[#allocation9 + $0x18] ss:$12 sps:$4 sm:$0xff]   ;;  %v7290_v55 = vmov 0  }
 0x26b   :  { %v3173_v47 = vmax.f32 %v3125_v10, 0.0  ;;  %v3119_v17 = vadd.f32 %v7252_v46, %v3054_v33  ;;  %v3122_v18 = vadd.f32 %v7252_v46, %v3057_v30  ;;  %v4795_v14 = vld [vmem:[#allocation9] ss:$12 sps:$4 sm:$0xff]   ;;  %v4801_v9 = vld [vmem:[#allocation9 + $0x150] ss:$12 sps:$4 sm:$0xff]  }
 0x26c   :  { %3239 = vmatpush1.bf16.msra.mxu1 %v7282_v16  ;;  %v3176_v59 = vmax.f32 %v3128_v4, 0.0  ;;  %v3194_v57 = vpack.c.bf16 %v3164_v32, %v3161_v27  ;;  %v4803_v35 = vld [vmem:[#allocation9 + $0x154] ss:$12 sps:$4 sm:$0xff]   ;;  %v4804_v60 = vld [vmem:[#allocation9 + $0x138] ss:$12 sps:$4 sm:$0xff]  }
 0x26d   :  { %3240 = vmatprep.subr.bf16.mxu1 %v7285_v54  ;;  %v3167_v40 = vmax.f32 %v3119_v17, 0.0  ;;  %v3170_v5 = vmax.f32 %v3122_v18, 0.0  ;;  %v4807_v44 = vld [vmem:[#allocation9 + $0x120] ss:$12 sps:$4 sm:$0xff]   ;;  %v4810_v39 = vld [vmem:[#allocation9 + $0x108] ss:$12 sps:$4 sm:$0xff]  }
 0x26e   :  { %v3200_v20 = vpack.c.bf16 %v3176_v59, %v3173_v47  ;;  %v4812_v23 = vld [vmem:[#allocation9 + $0x10c] ss:$12 sps:$4 sm:$0xff]   ;;  %v4815_v7 = vld [vmem:[#allocation9 + $0xf4] ss:$12 sps:$4 sm:$0xff]   ;;  %v4813_v13 = vld [vmem:[#allocation9 + $0xf0] ss:$12 sps:$4 sm:$0xff]  }
 0x26f   :  { %v3197_v46 = vpack.c.bf16 %v3170_v5, %v3167_v40  ;;  %v4816_v43 = vld [vmem:[#allocation9 + $0xd8] ss:$12 sps:$4 sm:$0xff]   ;;  %v4818_v24 = vld [vmem:[#allocation9 + $0xdc] ss:$12 sps:$4 sm:$0xff]   ;;  %v4822_v34 = vld [vmem:[#allocation9 + $0xc0] ss:$12 sps:$4 sm:$0xff]  }
 0x270   :  { %3241 = vmatpush1.bf16.msra.mxu1 %v7288_v48  ;;  %4470 = vmatpush3.bf16.msra.mxu0 %v3200_v20  ;;  %v4819_v56 = vld [vmem:[#allocation9 + $0x228] ss:$12 sps:$4 sm:$0xff]   ;;  %v4821_v37 = vld [vmem:[#allocation9 + $0x22c] ss:$12 sps:$4 sm:$0xff]   ;;  %v4824_v42 = vld [vmem:[#allocation9 + $0xc4] ss:$12 sps:$4 sm:$0xff]  }
 0x271   :  { %4471 = vmatprep.subr.bf16.mxu0 %v7289_v8  ;;  %3818 = vmatprep.subr.bf16.mxu1 %v4776_v26  ;;  %v4825_v49 = vld [vmem:[#allocation9 + $0x210] ss:$12 sps:$4 sm:$0xff]   ;;  %v4827_v6 = vld [vmem:[#allocation9 + $0x214] ss:$12 sps:$4 sm:$0xff]   ;;  %v4839_v41 = vld [vmem:[#allocation9 + $0x1cc] ss:$12 sps:$4 sm:$0xff]  }
 0x272   :  { %v4831_v50 = vld [vmem:[#allocation9 + $0x1fc] ss:$12 sps:$4 sm:$0xff]   ;;  %v4835_v28 = vld [vmem:[#allocation9 + $0x1e4] ss:$12 sps:$4 sm:$0xff]   ;;  %v4833_v33 = vld [vmem:[#allocation9 + $0x1e0] ss:$12 sps:$4 sm:$0xff]  }
 0x273   :  { %4257 = vmatmul.mubr.msk.bf16.vlgmr.msra.gmra.mxu1 %vm4256_vm12, %v4991_v52  ;;  %v4837_v30 = vld [vmem:[#allocation9 + $0x1c8] ss:$12 sps:$4 sm:$0xff]   ;;  %v4841_v4 = vld [vmem:[#allocation9 + $0x1b0] ss:$12 sps:$4 sm:$0xff]   ;;  %v4845_v32 = vld [vmem:[#allocation9 + $0x198] ss:$12 sps:$4 sm:$0xff]  }
 0x274   :  { %4472 = vmatpush3.bf16.msra.mxu0 %v3197_v46  ;;  %3819 = vmatpush1.bf16.msra.mxu1 %v4774_v38  ;;  %v4843_v10 = vld [vmem:[#allocation9 + $0x1b4] ss:$12 sps:$4 sm:$0xff]   ;;  %v4847_v27 = vld [vmem:[#allocation9 + $0x19c] ss:$12 sps:$4 sm:$0xff]   ;;  %v4851_v47 = vld [vmem:[#allocation9 + $0x184] ss:$12 sps:$4 sm:$0xff]  }
 0x275   :  { %4473 = vmatprep.subr.bf16.mxu0 %v7289_v8  ;;  %3820 = vmatprep.subr.bf16.mxu1 %v4779_v1  ;;  %v4849_v16 = vld [vmem:[#allocation9 + $0x180] ss:$12 sps:$4 sm:$0xff]   ;;  %v4853_v59 = vld [vmem:[#allocation9 + $0x170] ss:$12 sps:$4 sm:$0xff]   ;;  %v4992_v17 = vmov 0.125  }
 0x276   :  { %v3310_v18 = vsel %vm3203_vm5, 0.041666668, %v4992_v17  ;;  %v4828_v38 = vld [vmem:[#allocation9 + $0x230] ss:$12 sps:$4 sm:$0xff]   ;;  %v4832_v1 = vld [vmem:[#allocation9 + $0x218] ss:$12 sps:$4 sm:$0xff]  }
 0x278   :  { %4474 = vmatpush3.bf16.msra.mxu0 %v3194_v57  ;;  %3821 = vmatpush1.bf16.msra.mxu1 %v4777_v53  ;;  %v4840_v53 = vld [vmem:[#allocation9 + $0x1e8] ss:$12 sps:$4 sm:$0xff]  }
 0x279   :  { %4475 = vmatprep.subr.bf16.mxu0 %v7289_v8  ;;  %3822 = vmatprep.subr.bf16.mxu1 %v4782_v25  ;;  %v4844_v25 = vld [vmem:[#allocation9 + $0x1d0] ss:$12 sps:$4 sm:$0xff]  }
 0x27c   :  { %4476 = vmatpush3.bf16.msra.mxu0 %v3191_v36  ;;  %3823 = vmatpush1.bf16.msra.mxu1 %v4780_v0  ;;  %v4829_v36 = vld [vmem:[#allocation9 + $0x1f8] ss:$12 sps:$4 sm:$0xff]  }
 0x27d   :  { %4477 = vmatprep.subr.bf16.mxu0 %v7289_v8  ;;  %3824 = vmatprep.subr.bf16.mxu1 %v4785_v12  ;;  %v4848_v12 = vld [vmem:[#allocation9 + $0x1b8] ss:$12 sps:$4 sm:$0xff]  }
 0x280   :  { %4478 = vmatpush3.bf16.msra.mxu0 %v6792_v58  ;;  %3825 = vmatpush1.bf16.msra.mxu1 %v4783_v61  ;;  %v4797_v58 = vld [vmem:[#allocation9 + $0x4] ss:$12 sps:$4 sm:$0xff]  }
 0x281   :  { %4479 = vmatprep.subr.bf16.mxu0 %v7289_v8  ;;  %3826 = vmatprep.subr.bf16.mxu1 %v4788_v15 }
 0x284   :  { %4480 = vmatpush3.bf16.msra.mxu0 %v6772_v3  ;;  %3827 = vmatpush1.bf16.msra.mxu1 %v4786_v21  ;;  %v4800_v3 = vld [vmem:[#allocation9 + $0x16c] ss:$12 sps:$4 sm:$0xff]  }
 0x285   :  { %4481 = vmatprep.subr.bf16.mxu0 %v7289_v8  ;;  %3828 = vmatprep.subr.bf16.mxu1 %v4791_v29 }
 0x288   :  { %4482 = vmatpush3.bf16.msra.mxu0 %v6748_v51  ;;  %3829 = vmatpush1.bf16.msra.mxu1 %v4789_v63  ;;  %v4798_v51 = vld [vmem:[#allocation9 + $0x168] ss:$12 sps:$4 sm:$0xff]   ;;  %v4852_v63 = vld [vmem:[#allocation9 + $0x1a0] ss:$12 sps:$4 sm:$0xff]  }
 0x289   :  { %4483 = vmatprep.subr.bf16.mxu0 %v7289_v8  ;;  %3830 = vmatprep.subr.bf16.mxu1 %v4794_v11 }
 0x28c   :  { %4484 = vmatpush3.bf16.msra.mxu0 %v6738_v22  ;;  %3831 = vmatpush1.bf16.msra.mxu1 %v4792_v62  ;;  %v4806_v22 = vld [vmem:[#allocation9 + $0x13c] ss:$12 sps:$4 sm:$0xff]  }
 0x28d   :  { %3832 = vmatprep.subr.bf16.mxu1 %v4797_v58  ;;  %3861 = vmatprep.subr.bf16.mxu0 %v4821_v37  ;;  %v4854_v62 = vld [vmem:[#allocation9 + $0xb0] ss:$12 sps:$4 sm:$0xff]  }
 0x28f   :  { %4486 = vmatmul.mubr.msk.bf16.vlgmr.msra.gmra.mxu0 %vm4256_vm12, %v4991_v52  ;;  %v4836_v52 = vld [vmem:[#allocation9 + $0x200] ss:$12 sps:$4 sm:$0xff]  }
 0x290   :  { %3833 = vmatpush1.bf16.msra.mxu1 %v4795_v14  ;;  %3893 = vmatprep.mubr.bf16.mxu0 %v7290_v55  ;;  %v4856_v14 = vld [vmem:[#allocation9 + $0x158] ss:$12 sps:$4 sm:$0xff]   ;;  %v4858_v55 = vld [vmem:[#allocation9 + $0x140] ss:$12 sps:$4 sm:$0xff]  }
 0x291   :  { %3834 = vmatprep.subr.bf16.mxu1 %v4800_v3  ;;  %3862 = vmatpush1.bf16.msra.mxu0 %v4819_v56  ;;  %v4855_v3 = vld [vmem:[#allocation9 + $0x188] ss:$12 sps:$4 sm:$0xff]  }
 0x292   :  { %3863 = vmatprep.subr.bf16.mxu0 %v4827_v6 }
 0x294   :  { %3835 = vmatpush2.bf16.msra.mxu1 %v4798_v51  ;;  %v4857_v51 = vld [vmem:[#allocation9 + $0x98] ss:$12 sps:$4 sm:$0xff]  }
 0x295   :  { %3836 = vmatprep.subr.bf16.mxu1 %v4803_v35  ;;  %3864 = vmatpush1.bf16.msra.mxu0 %v4825_v49  ;;  %v4859_v35 = vld [vmem:[#allocation9 + $0x80] ss:$12 sps:$4 sm:$0xff]  }
 0x296   :  { %3865 = vmatprep.subr.bf16.mxu0 %v4831_v50  ;;  %v7292_v50 = vsub.s32 1, %v5315_v2 }
 0x298   :  { %3837 = vmatpush2.bf16.msra.mxu1 %v4801_v9  ;;  %v4860_v9 = vld [vmem:[#allocation9 + $0x128] ss:$12 sps:$4 sm:$0xff]  }
 0x299   :  { %3838 = vmatprep.subr.bf16.mxu1 %v4806_v22  ;;  %3866 = vmatpush1.bf16.msra.mxu0 %v4829_v36  ;;  %v4861_v22 = vld [vmem:[#allocation9 + $0x68] ss:$12 sps:$4 sm:$0xff]  }
 0x29a   :  { %3867 = vmatprep.subr.bf16.mxu0 %v4835_v28 }
 0x29c   :  { %3839 = vmatpush2.bf16.msra.mxu1 %v4804_v60  ;;  %v4862_v60 = vld [vmem:[#allocation9 + $0x110] ss:$12 sps:$4 sm:$0xff]  }
 0x29d   :  { %3840 = vmatprep.subr.bf16.mxu1 %v4809_v45  ;;  %3868 = vmatpush1.bf16.msra.mxu0 %v4833_v33  ;;  %v4863_v45 = vld [vmem:[#allocation9 + $0x50] ss:$12 sps:$4 sm:$0xff]  }
 0x29e   :  { %3869 = vmatprep.subr.bf16.mxu0 %v4839_v41 }
 0x2a0   :  { %3841 = vmatpush2.bf16.msra.mxu1 %v4807_v44  ;;  %v4864_v44 = vld [vmem:[#allocation9 + $0xf8] ss:$12 sps:$4 sm:$0xff]  }
 0x2a1   :  { %3842 = vmatprep.subr.bf16.mxu1 %v4812_v23  ;;  %3870 = vmatpush1.bf16.msra.mxu0 %v4837_v30  ;;  %v4865_v23 = vld [vmem:[#allocation9 + $0x38] ss:$12 sps:$4 sm:$0xff]  }
 0x2a2   :  { %3871 = vmatprep.subr.bf16.mxu0 %v4843_v10 }
 0x2a4   :  { %3843 = vmatpush2.bf16.msra.mxu1 %v4810_v39  ;;  %v4867_v39 = vld [vmem:[#allocation9 + $0x20] ss:$12 sps:$4 sm:$0xff]  }
 0x2a5   :  { %3844 = vmatprep.subr.bf16.mxu1 %v4815_v7  ;;  %3872 = vmatpush1.bf16.msra.mxu0 %v4841_v4  ;;  %v4868_v7 = vld [vmem:[#allocation9 + $0xc8] ss:$12 sps:$4 sm:$0xff]  }
 0x2a6   :  { %3873 = vmatprep.subr.bf16.mxu0 %v4847_v27 }
 0x2a8   :  { %3845 = vmatpush2.bf16.msra.mxu1 %v4813_v13  ;;  %v4869_v13 = vld [vmem:[#allocation9 + $0x8] ss:$12 sps:$4 sm:$0xff]  }
 0x2a9   :  { %3846 = vmatprep.subr.bf16.mxu1 %v4818_v24  ;;  %3874 = vmatpush1.bf16.msra.mxu0 %v4845_v32 }
 0x2aa   :  { %3875 = vmatprep.subr.bf16.mxu0 %v4851_v47 }
 0x2ac   :  { %3847 = vmatpush2.bf16.msra.mxu1 %v4816_v43 }
 0x2ad   :  { %3848 = vmatprep.subr.bf16.mxu1 %v4824_v42  ;;  %3876 = vmatpush1.bf16.msra.mxu0 %v4849_v16  ;;  %v7291_v42 = vsub.s32 0, %v5315_v2 }
 0x2ae   :  { %4416 = vmatprep.subr.bf16.mxu0 %v4853_v59 }
 0x2b0   :  { %3849 = vmatpush2.bf16.msra.mxu1 %v4822_v34  ;;  %v3417_v34 = vld [vmem:[%s6932_s6] sm:$0x7] }
 0x2b1   :  { %4489 = vmatprep.subr.bf16.mxu1 %v7289_v8  ;;  %v3422_v49 = vrot.slane %v3417_v34, %v7291_v42  ;;  %v3426_v36 = vrot.slane %v3417_v34, %v7292_v50 }
 0x333   :  { %v3260_v19 = vpop.f32.mrf.mxu1 }
 0x334   :  { %v6868_v31 = vmul.f32 %v3310_v18, %v3260_v19 }
 0x335   :  { %v3262_v54 = vpop.f32.mrf.mxu1 }
 0x336   :  { %v6870_v26 = vmul.f32 %v3310_v18, %v3262_v54  ;;  %v7293_v54 = vsub.s32 2, %v5315_v2 }
 0x337   :  { %v3264_v57 = vpop.f32.mrf.mxu1 }
 0x338   :  { %v3315_v20 = vmul.f32 0.125, %v3264_v57 }
 0x339   :  { %v3266_v40 = vpop.f32.mrf.mxu1 }
 0x33a   :  { %3999 = vst [vmem:[%s6933_s7 + $0x18] sm:$0xff] %v3315_v20  ;;  %v3316_v5 = vmul.f32 0.125, %v3266_v40  ;;  %v6876_v48 = vpack.c.bf16 %v3315_v20, %v6868_v31 }
 0x33c   :  { %v3319_v46 = vpack.c.bf16 %v3316_v5, %v6870_v26  ;;  %4000 = vst [vmem:[%s6933_s7 + $0x20] sm:$0xff] %v3316_v5 }
 0x33e   :  { %3850 = vmatprep.mubr.bf16.mxu1 %v3319_v46 }
 0x33f   :  { %3851 = vmatmul.mubr.bf16.vlgmr.msra.gmra.mxu1 %v6876_v48 }
 0x340   :  { %4490 = vmatpush3.bf16.msra.mxu1 %v4828_v38  ;;  %4505 = vmatprep.mubr.msk.bf16.mxu1 %vm4989_vm4, %v7289_v8 }
 0x341   :  { %4491 = vmatprep.subr.bf16.mxu1 %v7289_v8 }
 0x344   :  { %4492 = vmatpush3.bf16.msra.mxu1 %v4832_v1 }
 0x345   :  { %4493 = vmatprep.subr.bf16.mxu1 %v7289_v8 }
 0x348   :  { %4494 = vmatpush3.bf16.msra.mxu1 %v4836_v52 }
 0x349   :  { %4495 = vmatprep.subr.bf16.mxu1 %v7289_v8 }
 0x34c   :  { %4496 = vmatpush3.bf16.msra.mxu1 %v4840_v53 }
 0x34d   :  { %4497 = vmatprep.subr.bf16.mxu1 %v7289_v8 }
 0x34f   :  { %v3303_v0 = vpop.f32.mrf.mxu0 }
 0x350   :  { %4498 = vmatpush3.bf16.msra.mxu1 %v4844_v25  ;;  %v6890_v21 = vmul.f32 %v3310_v18, %v3303_v0 }
 0x351   :  { %v4487_v61 = vpop.f32.mrf.mxu0  ;;  %4499 = vmatprep.subr.bf16.mxu1 %v7289_v8 }
 0x353   :  { %v3306_v15 = vpop.f32.mrf.mxu0 }
 0x354   :  { %4500 = vmatpush3.bf16.msra.mxu1 %v4848_v12  ;;  %v3317_v29 = vmul.f32 0.125, %v3306_v15 }
 0x355   :  { %v4488_v11 = vpop.f32.mrf.mxu0  ;;  %4501 = vmatprep.subr.bf16.mxu1 %v7289_v8 }
 0x356   :  { %v3320_v58 = vpack.c.bf16 %v3317_v29, %v6890_v21  ;;  %4001 = vst [vmem:[%s6933_s7 + $0x28] sm:$0xff] %v3317_v29 }
 0x358   :  { %4502 = vmatpush3.bf16.msra.mxu1 %v4852_v63  ;;  %3894 = vmatmul.mubr.bf16.vlgmr.msra.gmra.mxu0 %v3320_v58 }
 0x359   :  { %4417 = vmatpush3.bf16.msra.mxu0 %v4854_v62  ;;  %3936 = vmatprep.mubr.bf16.mxu0 %v3319_v46 }
 0x35a   :  { %4503 = vmatprep.subr.bf16.mxu1 %v7289_v8  ;;  %4418 = vmatprep.subr.bf16.mxu0 %v4856_v14  ;;  %v4866_v8 = vld [vmem:[#allocation9 + $0xe0] ss:$12 sps:$4 sm:$0xff]  }
 0x35c   :  { %4504 = vmatpush3.bf16.msra.mxu1 %v4855_v3 }
 0x35d   :  { %4419 = vmatpush3.bf16.msra.mxu0 %v4857_v51 }
 0x35e   :  { %4420 = vmatprep.subr.bf16.mxu0 %v4858_v55 }
 0x35f   :  { %4506 = vmatmul.mubr.bf16.vlgmr.msra.gmra.mxu1 %v3320_v58 }
 0x361   :  { %4421 = vmatpush3.bf16.msra.mxu0 %v4859_v35 }
 0x362   :  { %4422 = vmatprep.subr.bf16.mxu0 %v4860_v9 }
 0x365   :  { %4423 = vmatpush3.bf16.msra.mxu0 %v4861_v22 }
 0x366   :  { %4424 = vmatprep.subr.bf16.mxu0 %v4862_v60 }
 0x369   :  { %4425 = vmatpush3.bf16.msra.mxu0 %v4863_v45 }
 0x36a   :  { %4426 = vmatprep.subr.bf16.mxu0 %v4864_v44 }
 0x36d   :  { %4427 = vmatpush3.bf16.msra.mxu0 %v4865_v23 }
 0x36e   :  { %4428 = vmatprep.subr.bf16.mxu0 %v4866_v8 }
 0x371   :  { %4429 = vmatpush3.bf16.msra.mxu0 %v4867_v39 }
 0x372   :  { %4430 = vmatprep.subr.bf16.mxu0 %v4868_v7 }
 0x375   :  { %4431 = vmatpush3.bf16.msra.mxu0 %v4869_v13 }
 0x378   :  { %3937 = vmatmul.mubr.bf16.vlgmr.msra.gmra.mxu0 %v6876_v48 }
 0x3ff   :  { %v3852_v43 = vpop.f32.mrf.mxu1 }
 0x400   :  { %v3853_v6 = vadd.f32 %v3852_v43, %v3422_v49 }
 0x401   :  { %v3854_v24 = vpop.f32.mrf.mxu1 }
 0x402   :  { %v3855_v33 = vadd.f32 %v3854_v24, %v3426_v36 }
 0x403   :  { %v3856_v56 = vpop.f32.mrf.mxu1 }
 0x405   :  { %v3858_v37 = vpop.f32.mrf.mxu1 }
 0x418   :  { %v3895_v28 = vpop.f32.mrf.mxu0 }
 0x419   :  { %v3896_v41 = vadd.f32 %v3895_v28, %v3853_v6 }
 0x41a   :  { %v3897_v30 = vpop.f32.mrf.mxu0 }
 0x41b   :  { %v3990_v10 = vsel %vm3203_vm5, %v3896_v41, %v6868_v31  ;;  %v3898_v4 = vadd.f32 %v3897_v30, %v3855_v33  ;;  %v3430_v31 = vrot.slane %v3417_v34, %v7293_v54 }
 0x41c   :  { %3996 = vst [vmem:[%s6933_s7] sm:$0xff] %v3990_v10  ;;  %v3899_v27 = vpop.f32.mrf.mxu0 }
 0x41d   :  { %v3991_v32 = vsel %vm3203_vm5, %v3898_v4, %v6870_v26 }
 0x41e   :  { %3997 = vst [vmem:[%s6933_s7 + $0x8] sm:$0xff] %v3991_v32  ;;  %v3901_v16 = vpop.f32.mrf.mxu0 }
 0x41f   :  { %v3979_v47 = vpop.f32.mrf.mxu1 }
 0x421   :  { %v4507_v59 = vpop.f32.mrf.mxu1 }
 0x423   :  { %v3982_v19 = vpop.f32.mrf.mxu1 }
 0x425   :  { %v4508_v17 = vpop.f32.mrf.mxu1 }
 0x438   :  { %v4432_v18 = vpop.f32.mrf.mxu0 }
 0x43a   :  { %v4433_v57 = vpop.f32.mrf.mxu0 }
 0x43b   :  { %v4434_v20 = vadd.f32 %v4433_v57, %v4432_v18 }
 0x43c   :  { %v4435_v40 = vpop.f32.mrf.mxu0 }
 0x43d   :  { %v3939_v5 = vadd.f32 %v4434_v20, %v3430_v31 }
 0x43e   :  { %v4436_v48 = vpop.f32.mrf.mxu0 }
 0x43f   :  { %v3980_v46 = vadd.f32 %v3979_v47, %v3939_v5 }
 0x441   :  { %v3992_v26 = vsel %vm3203_vm5, %v3980_v46, %v6890_v21 }
 0x442   :  { %3998 = vst [vmem:[%s6933_s7 + $0x10] sm:$0xff] %v3992_v26 }
 0x443   :  { %4006 = vsyncpa [#allocation3], 1 }
 0x444   :  { %4007 = vsyncpa [#allocation5], 1 }
 0x445   :  { %4008 = vsyncpa [#allocation8], 1 }

</bundles_post_ra>
